<compile_context>
chip_gen: v7x
topology: tpu7x:2x2x1
jax: 0.10.0
libtpu: 0.0.40
codegen_flags: <defaults>
</compile_context>

<pallas_src>
import math

import jax
import jax.numpy as jnp
from jax import lax
from jax.experimental import pallas as pl
from jax.experimental.pallas import tpu as pltpu
import jax.scipy.linalg as jsl

N_OSC = 50
N_PER = 40
N_STATE = N_OSC * 2              # 100
N_STATE_PAD = 128                # lane-aligned oscillator-state width
N_ACT = N_OSC * N_PER            # 2000
NB = 32
STEPS = 700
DT = 0.001
PI_2 = math.pi / 2.0

# ---- stand-in one-link / two-muscle limb constants --------------------------
# TODO(synk): TorchOneLinkMuscleLimb source was not provided; these dynamics
# are a plausible one-link, two-antagonist-muscle stand-in with the same state
# layout (theta, omega, m1_len, m2_len) and the same f()/get_m*_length() API.
L0 = 0.3        # muscle rest length
R_ARM = 0.03    # moment arm
FMAX = 50.0     # max muscle force
K_SPRING = 0.5  # passive joint stiffness
DAMP = 0.2      # joint damping
INERTIA = 0.05  # link inertia
TAU_M = 0.05    # muscle-length relaxation time constant


def _net_kernel(x_ref, w1_ref, b1_ref, w2_ref, b2_ref, w3_ref, b3_ref,
                wd_ref, bd_ref, enc_ref, encb_ref, dw_ref,
                b4_ref, w5_ref, b5_ref,
                l_states_ref, acts_ref):
    """Single grid step; the 700-step Euler integration runs in-body."""
    bsz = x_ref.shape[0]
    xv = x_ref[...]

    # ---- one-time MLP preamble: fc1 -> relu -> {fcdirect, fc2 -> relu -> fc3}
    h1 = jnp.maximum(
        jnp.dot(xv, w1_ref[...], preferred_element_type=jnp.float32)
        + b1_ref[...], 0.0)
    direct = (jnp.dot(h1, wd_ref[...], preferred_element_type=jnp.float32)
              + bd_ref[...])
    h2 = jnp.maximum(
        jnp.dot(h1, w2_ref[...], preferred_element_type=jnp.float32)
        + b2_ref[...], 0.0)
    # fc3 output IS the concatenated initial oscillator state, padded to 128
    s0 = (jnp.dot(h2, w3_ref[...], preferred_element_type=jnp.float32)
          + b3_ref[...])                                             # (B, 128)

    # ---- constants hoisted out of the step loop ------------------------------
    col4 = lax.broadcasted_iota(jnp.int32, (bsz, 4), 1)
    is0 = col4 == 0
    is1 = col4 == 1
    is2 = col4 == 2
    is3 = col4 == 3

    theta0 = xv[:, 0:1]                                              # current angle
    l0 = jnp.where(is0, theta0,
         jnp.where(is2, L0 - R_ARM * theta0,
         jnp.where(is3, L0 + R_ARM * theta0, 0.0)))                  # (B, 4)

    enc_w = enc_ref[...]                                             # (128, 2000) bf16
    dw_w = dw_ref[...]                                               # (2000, 160) bf16
    w5 = w5_ref[...]                                                 # (32, 2)    f32
    encb_b = jnp.broadcast_to(encb_ref[...], (bsz, N_ACT))           # (B, 2000)
    b4_b = jnp.broadcast_to(b4_ref[...], (bsz, NB))                  # (B, 32)
    out_bias = b5_ref[...] + direct                                  # (B, 2)

    # ---- 700 Euler steps ------------------------------------------------------
    def step(i, carry):
        s, l = carry                                                 # (B,128), (B,4) f32

        # oscillator activities: block-diagonal encoder (bf16 MXU, f32 acc)
        acti = jnp.maximum(
            jnp.dot(s.astype(jnp.bfloat16), enc_w,
                    preferred_element_type=jnp.float32) + encb_b, 0.0)   # (B, 2000)

        # fused [decoder | fc4] matmul over the shared K=2000 activation
        fused = jnp.dot(acti.astype(jnp.bfloat16), dw_w,
                        preferred_element_type=jnp.float32)              # (B, 160)
        ds = fused[:, :N_STATE_PAD]                                      # (B, 128)
        b = jnp.maximum(fused[:, N_STATE_PAD:] + b4_b, 0.0)              # (B, 32)

        activation = (jnp.dot(b, w5, preferred_element_type=jnp.float32)
                      + out_bias)                                        # (B, 2)
        acts_ref[pl.ds(i, 1), :, :] = activation[None, :, :]

        s_new = s + DT * ds

        # limb Euler step (f32, VPU)
        theta = l[:, 0:1]
        omega = l[:, 1:2]
        lm1 = l[:, 2:3]
        lm2 = l[:, 3:4]
        f1 = FMAX * jnp.maximum(activation[:, 0:1], 0.0)
        f2 = FMAX * jnp.maximum(activation[:, 1:2], 0.0)
        torque = R_ARM * (f1 - f2) - K_SPRING * theta - DAMP * omega
        deriv = jnp.where(is0, omega,
                jnp.where(is1, torque / INERTIA,
                jnp.where(is2, (L0 - R_ARM * theta - lm1) / TAU_M,
                               (L0 + R_ARM * theta - lm2) / TAU_M)))
        l_new = l + DT * deriv

        # joint limits
        pos = l_new[:, 0:1]
        vel = l_new[:, 1:2]
        pos_c = jnp.clip(pos, -PI_2, PI_2)
        gate = jnp.where((pos > -PI_2) & (pos < PI_2), 1.0, 0.0)
        l_lim = jnp.where(is0, pos_c, jnp.where(is1, vel * gate, l_new))
        l_states_ref[pl.ds(i, 1), :, :] = l_lim[None, :, :]

        return s_new, l_lim

    lax.fori_loop(0, STEPS, step, (s0, l0))


def net_forward(x, params):
    bsz = x.shape[0]
    arrays = (x,) + tuple(params)

    def full_spec(a):
        nd = a.ndim
        return pl.BlockSpec(a.shape, lambda i, _nd=nd: (0,) * _nd)

    grid_spec = pltpu.PrefetchScalarGridSpec(
        num_scalar_prefetch=0,
        grid=(1,),
        in_specs=[full_spec(a) for a in arrays],
        out_specs=[
            pl.BlockSpec((STEPS, bsz, 4), lambda i: (0, 0, 0)),
            pl.BlockSpec((STEPS, bsz, 2), lambda i: (0, 0, 0)),
        ],
    )
    out_shape = (
        jax.ShapeDtypeStruct((STEPS, bsz, 4), jnp.float32),
        jax.ShapeDtypeStruct((STEPS, bsz, 2), jnp.float32),
    )
    return pl.pallas_call(
        _net_kernel,
        out_shape=out_shape,
        grid_spec=grid_spec,
        compiler_params=pltpu.CompilerParams(
            dimension_semantics=("arbitrary",)),
    )(*arrays)


def init_params(key):
    ks = jax.random.split(key, 16)

    def lin(kw, kb, fan_in, fan_out):
        s = 1.0 / math.sqrt(fan_in)
        w = jax.random.uniform(kw, (fan_in, fan_out), jnp.float32, -s, s)
        b = jax.random.uniform(kb, (1, fan_out), jnp.float32, -s, s)
        return w, b

    w1, b1 = lin(ks[0], ks[1], 2, 128)
    w2, b2 = lin(ks[2], ks[3], 128, 128)
    w3, b3 = lin(ks[4], ks[5], 128, N_STATE)
    # pad fc3 to the lane-aligned state width (extra columns exactly zero)
    w3p = jnp.pad(w3, ((0, 0), (0, N_STATE_PAD - N_STATE)))
    b3p = jnp.pad(b3, ((0, 0), (0, N_STATE_PAD - N_STATE)))
    wd, _ = lin(ks[6], ks[7], 128, 2)
    wd = wd / 100.0                                   # fcdirect.weight / 100
    bd = jnp.full((1, 2), 0.1, jnp.float32)           # fcdirect.bias * 0 + 0.1
    w4, b4 = lin(ks[8], ks[9], N_ACT, NB)
    w5, _ = lin(ks[10], ks[11], NB, 2)
    w5 = w5 / 10000.0                                 # fc5b.weight / 10000
    b5 = jnp.zeros((1, 2), jnp.float32)               # fc5b.bias * 0

    # Oscillator bank parameters (deterministic synthetic tuning curves).
    # TODO(synk): Oscillator/TorchOscillator source was not provided; activities
    # are modeled as relu(state @ encoders + bias) with small random decoders.
    ang = jax.random.uniform(ks[12], (N_OSC, N_PER), jnp.float32,
                             0.0, 2.0 * math.pi)
    enc = jnp.stack([jnp.cos(ang), jnp.sin(ang)], axis=1)          # (50, 2, 40)
    encb = jax.random.uniform(ks[13], (N_OSC, N_PER), jnp.float32, -0.5, 0.5)
    dec = 0.05 * jax.random.normal(ks[14], (N_OSC, 2, N_PER), jnp.float32)

    # Block-diagonal forms (exactly equivalent to the per-oscillator loops).
    enc_big = jsl.block_diag(*[enc[j] for j in range(N_OSC)])       # (100, 2000)
    dec_big = jsl.block_diag(*[dec[j].T for j in range(N_OSC)])     # (2000, 100)
    encb_big = encb.reshape(1, N_ACT)

    # bf16 MXU operands: encoder padded to 128 state rows; decoder padded to
    # 128 output columns and fused with fc4's weight -> (2000, 160).
    enc_pad = jnp.pad(
        enc_big, ((0, N_STATE_PAD - N_STATE), (0, 0))).astype(jnp.bfloat16)
    dec_pad = jnp.pad(dec_big, ((0, 0), (0, N_STATE_PAD - N_STATE)))
    dw_fused = jnp.concatenate([dec_pad, w4], axis=1).astype(jnp.bfloat16)

    return (w1, b1, w2, b2, w3p, b3p, wd, bd,
            enc_pad, encb_big, dw_fused, b4, w5, b5)


if __name__ == "__main__":
    key = jax.random.PRNGKey(0)
    kx, kp = jax.random.split(key)
    bsz = 8   # multiple of 8 -> full sublane occupancy; per-step cost ~flat vs B=2
    # x = (current angle, desired angle)
    x = jax.random.uniform(kx, (bsz, 2), jnp.float32,
                           -math.pi / 3.0, math.pi / 3.0)
    params = init_params(kp)
    fwd = jax.jit(net_forward)
    l_states, activations = fwd(x, params)
    jax.block_until_ready((l_states, activations))
    assert l_states.shape == (STEPS, bsz, 4)
    assert activations.shape == (STEPS, bsz, 2)
    assert bool(jnp.all(jnp.isfinite(l_states)))
    assert bool(jnp.all(jnp.isfinite(activations)))
    print("KERNEL_OK")
</pallas_src>

<mosaic_0001>
module attributes {stable_mosaic.version = 11 : i64} {
  func.func @_net_kernel(%arg0: i32, %arg1: memref<8x2xf32, #tpu.memory_space<vmem>>, %arg2: memref<2x128xf32, #tpu.memory_space<vmem>>, %arg3: memref<1x128xf32, #tpu.memory_space<vmem>>, %arg4: memref<128x128xf32, #tpu.memory_space<vmem>>, %arg5: memref<1x128xf32, #tpu.memory_space<vmem>>, %arg6: memref<128x128xf32, #tpu.memory_space<vmem>>, %arg7: memref<1x128xf32, #tpu.memory_space<vmem>>, %arg8: memref<128x2xf32, #tpu.memory_space<vmem>>, %arg9: memref<1x2xf32, #tpu.memory_space<vmem>>, %arg10: memref<128x2000xbf16, #tpu.memory_space<vmem>>, %arg11: memref<1x2000xf32, #tpu.memory_space<vmem>>, %arg12: memref<2000x160xbf16, #tpu.memory_space<vmem>>, %arg13: memref<1x32xf32, #tpu.memory_space<vmem>>, %arg14: memref<32x2xf32, #tpu.memory_space<vmem>>, %arg15: memref<1x2xf32, #tpu.memory_space<vmem>>, %arg16: memref<700x8x4xf32, #tpu.memory_space<vmem>>, %arg17: memref<700x8x2xf32, #tpu.memory_space<vmem>>) attributes {dimension_semantics = [#tpu.dimension_semantics<arbitrary>], iteration_bounds = array<i64: 1>, scalar_prefetch = 0 : i64, scratch_operands = 0 : i64, tpu.core_type = #tpu.core_type<tc>, window_params = [{pipeline_mode = #tpu.pipeline_mode<synchronous>, transform_indices = @transform_0, window_bounds = array<i64: 8, 2>}, {pipeline_mode = #tpu.pipeline_mode<synchronous>, transform_indices = @transform_1, window_bounds = array<i64: 2, 128>}, {pipeline_mode = #tpu.pipeline_mode<synchronous>, transform_indices = @transform_2, window_bounds = array<i64: 1, 128>}, {pipeline_mode = #tpu.pipeline_mode<synchronous>, transform_indices = @transform_3, window_bounds = array<i64: 128, 128>}, {pipeline_mode = #tpu.pipeline_mode<synchronous>, transform_indices = @transform_4, window_bounds = array<i64: 1, 128>}, {pipeline_mode = #tpu.pipeline_mode<synchronous>, transform_indices = @transform_5, window_bounds = array<i64: 128, 128>}, {pipeline_mode = #tpu.pipeline_mode<synchronous>, transform_indices = @transform_6, window_bounds = array<i64: 1, 128>}, {pipeline_mode = #tpu.pipeline_mode<synchronous>, transform_indices = @transform_7, window_bounds = array<i64: 128, 2>}, {pipeline_mode = #tpu.pipeline_mode<synchronous>, transform_indices = @transform_8, window_bounds = array<i64: 1, 2>}, {pipeline_mode = #tpu.pipeline_mode<synchronous>, transform_indices = @transform_9, window_bounds = array<i64: 128, 2000>}, {pipeline_mode = #tpu.pipeline_mode<synchronous>, transform_indices = @transform_10, window_bounds = array<i64: 1, 2000>}, {pipeline_mode = #tpu.pipeline_mode<synchronous>, transform_indices = @transform_11, window_bounds = array<i64: 2000, 160>}, {pipeline_mode = #tpu.pipeline_mode<synchronous>, transform_indices = @transform_12, window_bounds = array<i64: 1, 32>}, {pipeline_mode = #tpu.pipeline_mode<synchronous>, transform_indices = @transform_13, window_bounds = array<i64: 32, 2>}, {pipeline_mode = #tpu.pipeline_mode<synchronous>, transform_indices = @transform_14, window_bounds = array<i64: 1, 2>}, {pipeline_mode = #tpu.pipeline_mode<synchronous>, transform_indices = @transform_15, window_bounds = array<i64: 700, 8, 4>}, {pipeline_mode = #tpu.pipeline_mode<synchronous>, transform_indices = @transform_16, window_bounds = array<i64: 700, 8, 2>}]} {
    %c0 = arith.constant 0 : index
    %c0_0 = arith.constant 0 : index
    %0 = vector.load %arg1[%c0, %c0_0] : memref<8x2xf32, #tpu.memory_space<vmem>>, vector<8x2xf32>
    %c0_1 = arith.constant 0 : index
    %c0_2 = arith.constant 0 : index
    %1 = vector.load %arg2[%c0_1, %c0_2] : memref<2x128xf32, #tpu.memory_space<vmem>>, vector<2x128xf32>
    %cst = arith.constant dense<0.000000e+00> : vector<8x128xf32>
    %2 = tpu.matmul %0, %1, %cst {dimension_numbers = #tpu.dot_dimension_numbers<[1], [0], [0], [1], [0, 0, 1, 1], [], []>} : vector<8x2xf32>, vector<2x128xf32>, vector<8x128xf32> -> vector<8x128xf32>
    %c0_3 = arith.constant 0 : index
    %c0_4 = arith.constant 0 : index
    %3 = vector.load %arg3[%c0_3, %c0_4] : memref<1x128xf32, #tpu.memory_space<vmem>>, vector<1x128xf32>
    %4 = vector.broadcast %3 : vector<1x128xf32> to vector<8x128xf32>
    %5 = arith.addf %2, %4 : vector<8x128xf32>
    %cst_5 = arith.constant 0.000000e+00 : f32
    %6 = vector.broadcast %cst_5 : f32 to vector<8x128xf32>
    %7 = arith.maximumf %5, %6 : vector<8x128xf32>
    %c0_6 = arith.constant 0 : index
    %c0_7 = arith.constant 0 : index
    %8 = vector.load %arg8[%c0_6, %c0_7] : memref<128x2xf32, #tpu.memory_space<vmem>>, vector<128x2xf32>
    %cst_8 = arith.constant dense<0.000000e+00> : vector<8x2xf32>
    %9 = tpu.matmul %7, %8, %cst_8 {dimension_numbers = #tpu.dot_dimension_numbers<[1], [0], [0], [1], [0, 0, 1, 1], [], []>} : vector<8x128xf32>, vector<128x2xf32>, vector<8x2xf32> -> vector<8x2xf32>
    %c0_9 = arith.constant 0 : index
    %c0_10 = arith.constant 0 : index
    %10 = vector.load %arg9[%c0_9, %c0_10] : memref<1x2xf32, #tpu.memory_space<vmem>>, vector<1x2xf32>
    %11 = vector.broadcast %10 : vector<1x2xf32> to vector<8x2xf32>
    %12 = arith.addf %9, %11 : vector<8x2xf32>
    %c0_11 = arith.constant 0 : index
    %c0_12 = arith.constant 0 : index
    %13 = vector.load %arg4[%c0_11, %c0_12] : memref<128x128xf32, #tpu.memory_space<vmem>>, vector<128x128xf32>
    %cst_13 = arith.constant dense<0.000000e+00> : vector<8x128xf32>
    %14 = tpu.matmul %7, %13, %cst_13 {dimension_numbers = #tpu.dot_dimension_numbers<[1], [0], [0], [1], [0, 0, 1, 1], [], []>} : vector<8x128xf32>, vector<128x128xf32>, vector<8x128xf32> -> vector<8x128xf32>
    %c0_14 = arith.constant 0 : index
    %c0_15 = arith.constant 0 : index
    %15 = vector.load %arg5[%c0_14, %c0_15] : memref<1x128xf32, #tpu.memory_space<vmem>>, vector<1x128xf32>
    %16 = vector.broadcast %15 : vector<1x128xf32> to vector<8x128xf32>
    %17 = arith.addf %14, %16 : vector<8x128xf32>
    %cst_16 = arith.constant 0.000000e+00 : f32
    %18 = vector.broadcast %cst_16 : f32 to vector<8x128xf32>
    %19 = arith.maximumf %17, %18 : vector<8x128xf32>
    %c0_17 = arith.constant 0 : index
    %c0_18 = arith.constant 0 : index
    %20 = vector.load %arg6[%c0_17, %c0_18] : memref<128x128xf32, #tpu.memory_space<vmem>>, vector<128x128xf32>
    %cst_19 = arith.constant dense<0.000000e+00> : vector<8x128xf32>
    %21 = tpu.matmul %19, %20, %cst_19 {dimension_numbers = #tpu.dot_dimension_numbers<[1], [0], [0], [1], [0, 0, 1, 1], [], []>} : vector<8x128xf32>, vector<128x128xf32>, vector<8x128xf32> -> vector<8x128xf32>
    %c0_20 = arith.constant 0 : index
    %c0_21 = arith.constant 0 : index
    %22 = vector.load %arg7[%c0_20, %c0_21] : memref<1x128xf32, #tpu.memory_space<vmem>>, vector<1x128xf32>
    %23 = vector.broadcast %22 : vector<1x128xf32> to vector<8x128xf32>
    %24 = arith.addf %21, %23 : vector<8x128xf32>
    %25 = tpu.iota {dimensions = array<i32: 1>} : vector<8x4xi32>
    %c0_i32 = arith.constant 0 : i32
    %26 = vector.broadcast %c0_i32 : i32 to vector<8x4xi32>
    %27 = arith.cmpi eq, %25, %26 : vector<8x4xi32>
    %c1_i32 = arith.constant 1 : i32
    %28 = vector.broadcast %c1_i32 : i32 to vector<8x4xi32>
    %29 = arith.cmpi eq, %25, %28 : vector<8x4xi32>
    %c2_i32 = arith.constant 2 : i32
    %30 = vector.broadcast %c2_i32 : i32 to vector<8x4xi32>
    %31 = arith.cmpi eq, %25, %30 : vector<8x4xi32>
    %c3_i32 = arith.constant 3 : i32
    %32 = vector.broadcast %c3_i32 : i32 to vector<8x4xi32>
    %33 = arith.cmpi eq, %25, %32 : vector<8x4xi32>
    %34 = vector.extract_strided_slice %0 {offsets = [0, 0], sizes = [8, 1], strides = [1, 1]} : vector<8x2xf32> to vector<8x1xf32>
    %cst_22 = arith.constant 3.000000e-02 : f32
    %35 = vector.broadcast %cst_22 : f32 to vector<8x1xf32>
    %36 = arith.mulf %35, %34 : vector<8x1xf32>
    %cst_23 = arith.constant 3.000000e-01 : f32
    %37 = vector.broadcast %cst_23 : f32 to vector<8x1xf32>
    %38 = arith.subf %37, %36 : vector<8x1xf32>
    %cst_24 = arith.constant 3.000000e-02 : f32
    %39 = vector.broadcast %cst_24 : f32 to vector<8x1xf32>
    %40 = arith.mulf %39, %34 : vector<8x1xf32>
    %cst_25 = arith.constant 3.000000e-01 : f32
    %41 = vector.broadcast %cst_25 : f32 to vector<8x1xf32>
    %42 = arith.addf %41, %40 : vector<8x1xf32>
    %cst_26 = arith.constant 0.000000e+00 : f32
    %43 = vector.shape_cast %42 : vector<8x1xf32> to vector<8x1xf32>
    %44 = vector.broadcast %43 : vector<8x1xf32> to vector<8x4xf32>
    %45 = vector.broadcast %cst_26 : f32 to vector<8x4xf32>
    %46 = arith.select %33, %44, %45 : vector<8x4xi1>, vector<8x4xf32>
    %47 = vector.shape_cast %38 : vector<8x1xf32> to vector<8x1xf32>
    %48 = vector.broadcast %47 : vector<8x1xf32> to vector<8x4xf32>
    %49 = arith.select %31, %48, %46 : vector<8x4xi1>, vector<8x4xf32>
    %50 = vector.shape_cast %34 : vector<8x1xf32> to vector<8x1xf32>
    %51 = vector.broadcast %50 : vector<8x1xf32> to vector<8x4xf32>
    %52 = arith.select %27, %51, %49 : vector<8x4xi1>, vector<8x4xf32>
    %c0_27 = arith.constant 0 : index
    %c0_28 = arith.constant 0 : index
    %53 = vector.load %arg10[%c0_27, %c0_28] : memref<128x2000xbf16, #tpu.memory_space<vmem>>, vector<128x2000xbf16>
    %c0_29 = arith.constant 0 : index
    %c0_30 = arith.constant 0 : index
    %54 = vector.load %arg12[%c0_29, %c0_30] : memref<2000x160xbf16, #tpu.memory_space<vmem>>, vector<2000x160xbf16>
    %c0_31 = arith.constant 0 : index
    %c0_32 = arith.constant 0 : index
    %55 = vector.load %arg14[%c0_31, %c0_32] : memref<32x2xf32, #tpu.memory_space<vmem>>, vector<32x2xf32>
    %c0_33 = arith.constant 0 : index
    %c0_34 = arith.constant 0 : index
    %56 = vector.load %arg11[%c0_33, %c0_34] : memref<1x2000xf32, #tpu.memory_space<vmem>>, vector<1x2000xf32>
    %57 = vector.shape_cast %56 : vector<1x2000xf32> to vector<1x2000xf32>
    %58 = vector.broadcast %57 : vector<1x2000xf32> to vector<8x2000xf32>
    %c0_35 = arith.constant 0 : index
    %c0_36 = arith.constant 0 : index
    %59 = vector.load %arg13[%c0_35, %c0_36] : memref<1x32xf32, #tpu.memory_space<vmem>>, vector<1x32xf32>
    %60 = vector.shape_cast %59 : vector<1x32xf32> to vector<1x32xf32>
    %61 = vector.broadcast %60 : vector<1x32xf32> to vector<8x32xf32>
    %c0_37 = arith.constant 0 : index
    %c0_38 = arith.constant 0 : index
    %62 = vector.load %arg15[%c0_37, %c0_38] : memref<1x2xf32, #tpu.memory_space<vmem>>, vector<1x2xf32>
    %63 = vector.broadcast %62 : vector<1x2xf32> to vector<8x2xf32>
    %64 = arith.addf %63, %12 : vector<8x2xf32>
    %c0_i32_39 = arith.constant 0 : i32
    %c700_i32 = arith.constant 700 : i32
    %65 = arith.addi %c0_i32_39, %c700_i32 : i32
    %c1_i32_40 = arith.constant 1 : i32
    %66:2 = scf.for %arg18 = %c0_i32_39 to %65 step %c1_i32_40 iter_args(%arg19 = %24, %arg20 = %52) -> (vector<8x128xf32>, vector<8x4xf32>)  : i32 {
      %67 = arith.truncf %arg19 : vector<8x128xf32> to vector<8x128xbf16>
      %cst_42 = arith.constant dense<0.000000e+00> : vector<8x2000xf32>
      %68 = tpu.matmul %67, %53, %cst_42 {dimension_numbers = #tpu.dot_dimension_numbers<[1], [0], [0], [1], [0, 0, 1, 1], [], []>} : vector<8x128xbf16>, vector<128x2000xbf16>, vector<8x2000xf32> -> vector<8x2000xf32>
      %69 = arith.addf %68, %58 : vector<8x2000xf32>
      %cst_43 = arith.constant 0.000000e+00 : f32
      %70 = vector.broadcast %cst_43 : f32 to vector<8x2000xf32>
      %71 = arith.maximumf %69, %70 : vector<8x2000xf32>
      %72 = arith.truncf %71 : vector<8x2000xf32> to vector<8x2000xbf16>
      %cst_44 = arith.constant dense<0.000000e+00> : vector<8x160xf32>
      %73 = tpu.matmul %72, %54, %cst_44 {dimension_numbers = #tpu.dot_dimension_numbers<[1], [0], [0], [1], [0, 0, 1, 1], [], []>} : vector<8x2000xbf16>, vector<2000x160xbf16>, vector<8x160xf32> -> vector<8x160xf32>
      %74 = vector.extract_strided_slice %73 {offsets = [0, 0], sizes = [8, 128], strides = [1, 1]} : vector<8x160xf32> to vector<8x128xf32>
      %75 = vector.extract_strided_slice %73 {offsets = [0, 128], sizes = [8, 32], strides = [1, 1]} : vector<8x160xf32> to vector<8x32xf32>
      %76 = arith.addf %75, %61 : vector<8x32xf32>
      %cst_45 = arith.constant 0.000000e+00 : f32
      %77 = vector.broadcast %cst_45 : f32 to vector<8x32xf32>
      %78 = arith.maximumf %76, %77 : vector<8x32xf32>
      %cst_46 = arith.constant dense<0.000000e+00> : vector<8x2xf32>
      %79 = tpu.matmul %78, %55, %cst_46 {dimension_numbers = #tpu.dot_dimension_numbers<[1], [0], [0], [1], [0, 0, 1, 1], [], []>} : vector<8x32xf32>, vector<32x2xf32>, vector<8x2xf32> -> vector<8x2xf32>
      %80 = arith.addf %79, %64 : vector<8x2xf32>
      %81 = vector.shape_cast %80 : vector<8x2xf32> to vector<1x8x2xf32>
      %82 = arith.index_cast %arg18 : i32 to index
      %c0_47 = arith.constant 0 : index
      %c0_48 = arith.constant 0 : index
      %83 = vector.load %arg17[%82, %c0_47, %c0_48] : memref<700x8x2xf32, #tpu.memory_space<vmem>>, vector<1x8x2xf32>
      tpu.vector_store %arg17[%82, %c0_47, %c0_48], %81 {strides = array<i32>} : memref<700x8x2xf32, #tpu.memory_space<vmem>>, vector<1x8x2xf32>,
      %cst_49 = arith.constant 1.000000e-03 : f32
      %84 = vector.broadcast %cst_49 : f32 to vector<8x128xf32>
      %85 = arith.mulf %84, %74 : vector<8x128xf32>
      %86 = arith.addf %arg19, %85 : vector<8x128xf32>
      %87 = vector.extract_strided_slice %arg20 {offsets = [0, 0], sizes = [8, 1], strides = [1, 1]} : vector<8x4xf32> to vector<8x1xf32>
      %88 = vector.extract_strided_slice %arg20 {offsets = [0, 1], sizes = [8, 1], strides = [1, 1]} : vector<8x4xf32> to vector<8x1xf32>
      %89 = vector.extract_strided_slice %arg20 {offsets = [0, 2], sizes = [8, 1], strides = [1, 1]} : vector<8x4xf32> to vector<8x1xf32>
      %90 = vector.extract_strided_slice %arg20 {offsets = [0, 3], sizes = [8, 1], strides = [1, 1]} : vector<8x4xf32> to vector<8x1xf32>
      %91 = vector.extract_strided_slice %80 {offsets = [0, 0], sizes = [8, 1], strides = [1, 1]} : vector<8x2xf32> to vector<8x1xf32>
      %cst_50 = arith.constant 0.000000e+00 : f32
      %92 = vector.broadcast %cst_50 : f32 to vector<8x1xf32>
      %93 = arith.maximumf %91, %92 : vector<8x1xf32>
      %cst_51 = arith.constant 5.000000e+01 : f32
      %94 = vector.broadcast %cst_51 : f32 to vector<8x1xf32>
      %95 = arith.mulf %94, %93 : vector<8x1xf32>
      %96 = vector.extract_strided_slice %80 {offsets = [0, 1], sizes = [8, 1], strides = [1, 1]} : vector<8x2xf32> to vector<8x1xf32>
      %cst_52 = arith.constant 0.000000e+00 : f32
      %97 = vector.broadcast %cst_52 : f32 to vector<8x1xf32>
      %98 = arith.maximumf %96, %97 : vector<8x1xf32>
      %cst_53 = arith.constant 5.000000e+01 : f32
      %99 = vector.broadcast %cst_53 : f32 to vector<8x1xf32>
      %100 = arith.mulf %99, %98 : vector<8x1xf32>
      %101 = arith.subf %95, %100 : vector<8x1xf32>
      %cst_54 = arith.constant 3.000000e-02 : f32
      %102 = vector.broadcast %cst_54 : f32 to vector<8x1xf32>
      %103 = arith.mulf %102, %101 : vector<8x1xf32>
      %cst_55 = arith.constant 5.000000e-01 : f32
      %104 = vector.broadcast %cst_55 : f32 to vector<8x1xf32>
      %105 = arith.mulf %104, %87 : vector<8x1xf32>
      %106 = arith.subf %103, %105 : vector<8x1xf32>
      %cst_56 = arith.constant 2.000000e-01 : f32
      %107 = vector.broadcast %cst_56 : f32 to vector<8x1xf32>
      %108 = arith.mulf %107, %88 : vector<8x1xf32>
      %109 = arith.subf %106, %108 : vector<8x1xf32>
      %cst_57 = arith.constant 5.000000e-02 : f32
      %110 = vector.broadcast %cst_57 : f32 to vector<8x1xf32>
      %111 = arith.divf %109, %110 : vector<8x1xf32>
      %cst_58 = arith.constant 3.000000e-02 : f32
      %112 = vector.broadcast %cst_58 : f32 to vector<8x1xf32>
      %113 = arith.mulf %112, %87 : vector<8x1xf32>
      %cst_59 = arith.constant 3.000000e-01 : f32
      %114 = vector.broadcast %cst_59 : f32 to vector<8x1xf32>
      %115 = arith.subf %114, %113 : vector<8x1xf32>
      %116 = arith.subf %115, %89 : vector<8x1xf32>
      %cst_60 = arith.constant 5.000000e-02 : f32
      %117 = vector.broadcast %cst_60 : f32 to vector<8x1xf32>
      %118 = arith.divf %116, %117 : vector<8x1xf32>
      %cst_61 = arith.constant 3.000000e-02 : f32
      %119 = vector.broadcast %cst_61 : f32 to vector<8x1xf32>
      %120 = arith.mulf %119, %87 : vector<8x1xf32>
      %cst_62 = arith.constant 3.000000e-01 : f32
      %121 = vector.broadcast %cst_62 : f32 to vector<8x1xf32>
      %122 = arith.addf %121, %120 : vector<8x1xf32>
      %123 = arith.subf %122, %90 : vector<8x1xf32>
      %cst_63 = arith.constant 5.000000e-02 : f32
      %124 = vector.broadcast %cst_63 : f32 to vector<8x1xf32>
      %125 = arith.divf %123, %124 : vector<8x1xf32>
      %126 = vector.shape_cast %118 : vector<8x1xf32> to vector<8x1xf32>
      %127 = vector.broadcast %126 : vector<8x1xf32> to vector<8x4xf32>
      %128 = vector.shape_cast %125 : vector<8x1xf32> to vector<8x1xf32>
      %129 = vector.broadcast %128 : vector<8x1xf32> to vector<8x4xf32>
      %130 = arith.select %31, %127, %129 : vector<8x4xi1>, vector<8x4xf32>
      %131 = vector.shape_cast %111 : vector<8x1xf32> to vector<8x1xf32>
      %132 = vector.broadcast %131 : vector<8x1xf32> to vector<8x4xf32>
      %133 = arith.select %29, %132, %130 : vector<8x4xi1>, vector<8x4xf32>
      %134 = vector.shape_cast %88 : vector<8x1xf32> to vector<8x1xf32>
      %135 = vector.broadcast %134 : vector<8x1xf32> to vector<8x4xf32>
      %136 = arith.select %27, %135, %133 : vector<8x4xi1>, vector<8x4xf32>
      %cst_64 = arith.constant 1.000000e-03 : f32
      %137 = vector.broadcast %cst_64 : f32 to vector<8x4xf32>
      %138 = arith.mulf %137, %136 : vector<8x4xf32>
      %139 = arith.addf %arg20, %138 : vector<8x4xf32>
      %140 = vector.extract_strided_slice %139 {offsets = [0, 0], sizes = [8, 1], strides = [1, 1]} : vector<8x4xf32> to vector<8x1xf32>
      %141 = vector.extract_strided_slice %139 {offsets = [0, 1], sizes = [8, 1], strides = [1, 1]} : vector<8x4xf32> to vector<8x1xf32>
      %cst_65 = arith.constant -1.57079637 : f32
      %cst_66 = arith.constant 1.57079637 : f32
      %142 = vector.broadcast %cst_65 : f32 to vector<8x1xf32>
      %143 = arith.maximumf %142, %140 : vector<8x1xf32>
      %144 = vector.broadcast %cst_66 : f32 to vector<8x1xf32>
      %145 = arith.minimumf %144, %143 : vector<8x1xf32>
      %cst_67 = arith.constant -1.57079637 : f32
      %146 = vector.broadcast %cst_67 : f32 to vector<8x1xf32>
      %147 = arith.cmpf ogt, %140, %146 : vector<8x1xf32>
      %cst_68 = arith.constant 1.57079637 : f32
      %148 = vector.broadcast %cst_68 : f32 to vector<8x1xf32>
      %149 = arith.cmpf olt, %140, %148 : vector<8x1xf32>
      %150 = arith.andi %147, %149 : vector<8x1xi1>
      %cst_69 = arith.constant 1.000000e+00 : f32
      %cst_70 = arith.constant 0.000000e+00 : f32
      %151 = vector.broadcast %cst_69 : f32 to vector<8x1xf32>
      %152 = vector.broadcast %cst_70 : f32 to vector<8x1xf32>
      %153 = arith.select %150, %151, %152 : vector<8x1xi1>, vector<8x1xf32>
      %154 = arith.mulf %141, %153 : vector<8x1xf32>
      %155 = vector.shape_cast %154 : vector<8x1xf32> to vector<8x1xf32>
      %156 = vector.broadcast %155 : vector<8x1xf32> to vector<8x4xf32>
      %157 = arith.select %29, %156, %139 : vector<8x4xi1>, vector<8x4xf32>
      %158 = vector.shape_cast %145 : vector<8x1xf32> to vector<8x1xf32>
      %159 = vector.broadcast %158 : vector<8x1xf32> to vector<8x4xf32>
      %160 = arith.select %27, %159, %157 : vector<8x4xi1>, vector<8x4xf32>
      %161 = vector.shape_cast %160 : vector<8x4xf32> to vector<1x8x4xf32>
      %162 = arith.index_cast %arg18 : i32 to index
      %c0_71 = arith.constant 0 : index
      %c0_72 = arith.constant 0 : index
      %163 = vector.load %arg16[%162, %c0_71, %c0_72] : memref<700x8x4xf32, #tpu.memory_space<vmem>>, vector<1x8x4xf32>
      tpu.vector_store %arg16[%162, %c0_71, %c0_72], %161 {strides = array<i32>} : memref<700x8x4xf32, #tpu.memory_space<vmem>>, vector<1x8x4xf32>,
      scf.yield %86, %160 : vector<8x128xf32>, vector<8x4xf32>
    }
    %c700_i32_41 = arith.constant 700 : i32
    return
  }
  func.func @transform_0(%arg0: i32) -> (i32, i32) {
    %c0_i32 = arith.constant 0 : i32
    %c0_i32_0 = arith.constant 0 : i32
    %c0_i32_1 = arith.constant 0 : i32
    return %c0_i32, %c0_i32_0 : i32, i32
  }
  func.func @transform_1(%arg0: i32) -> (i32, i32) {
    %c0_i32 = arith.constant 0 : i32
    %c0_i32_0 = arith.constant 0 : i32
    %c0_i32_1 = arith.constant 0 : i32
    return %c0_i32, %c0_i32_0 : i32, i32
  }
  func.func @transform_2(%arg0: i32) -> (i32, i32) {
    %c0_i32 = arith.constant 0 : i32
    %c0_i32_0 = arith.constant 0 : i32
    %c0_i32_1 = arith.constant 0 : i32
    return %c0_i32, %c0_i32_0 : i32, i32
  }
  func.func @transform_3(%arg0: i32) -> (i32, i32) {
    %c0_i32 = arith.constant 0 : i32
    %c0_i32_0 = arith.constant 0 : i32
    %c0_i32_1 = arith.constant 0 : i32
    return %c0_i32, %c0_i32_0 : i32, i32
  }
  func.func @transform_4(%arg0: i32) -> (i32, i32) {
    %c0_i32 = arith.constant 0 : i32
    %c0_i32_0 = arith.constant 0 : i32
    %c0_i32_1 = arith.constant 0 : i32
    return %c0_i32, %c0_i32_0 : i32, i32
  }
  func.func @transform_5(%arg0: i32) -> (i32, i32) {
    %c0_i32 = arith.constant 0 : i32
    %c0_i32_0 = arith.constant 0 : i32
    %c0_i32_1 = arith.constant 0 : i32
    return %c0_i32, %c0_i32_0 : i32, i32
  }
  func.func @transform_6(%arg0: i32) -> (i32, i32) {
    %c0_i32 = arith.constant 0 : i32
    %c0_i32_0 = arith.constant 0 : i32
    %c0_i32_1 = arith.constant 0 : i32
    return %c0_i32, %c0_i32_0 : i32, i32
  }
  func.func @transform_7(%arg0: i32) -> (i32, i32) {
    %c0_i32 = arith.constant 0 : i32
    %c0_i32_0 = arith.constant 0 : i32
    %c0_i32_1 = arith.constant 0 : i32
    return %c0_i32, %c0_i32_0 : i32, i32
  }
  func.func @transform_8(%arg0: i32) -> (i32, i32) {
    %c0_i32 = arith.constant 0 : i32
    %c0_i32_0 = arith.constant 0 : i32
    %c0_i32_1 = arith.constant 0 : i32
    return %c0_i32, %c0_i32_0 : i32, i32
  }
  func.func @transform_9(%arg0: i32) -> (i32, i32) {
    %c0_i32 = arith.constant 0 : i32
    %c0_i32_0 = arith.constant 0 : i32
    %c0_i32_1 = arith.constant 0 : i32
    return %c0_i32, %c0_i32_0 : i32, i32
  }
  func.func @transform_10(%arg0: i32) -> (i32, i32) {
    %c0_i32 = arith.constant 0 : i32
    %c0_i32_0 = arith.constant 0 : i32
    %c0_i32_1 = arith.constant 0 : i32
    return %c0_i32, %c0_i32_0 : i32, i32
  }
  func.func @transform_11(%arg0: i32) -> (i32, i32) {
    %c0_i32 = arith.constant 0 : i32
    %c0_i32_0 = arith.constant 0 : i32
    %c0_i32_1 = arith.constant 0 : i32
    return %c0_i32, %c0_i32_0 : i32, i32
  }
  func.func @transform_12(%arg0: i32) -> (i32, i32) {
    %c0_i32 = arith.constant 0 : i32
    %c0_i32_0 = arith.constant 0 : i32
    %c0_i32_1 = arith.constant 0 : i32
    return %c0_i32, %c0_i32_0 : i32, i32
  }
  func.func @transform_13(%arg0: i32) -> (i32, i32) {
    %c0_i32 = arith.constant 0 : i32
    %c0_i32_0 = arith.constant 0 : i32
    %c0_i32_1 = arith.constant 0 : i32
    return %c0_i32, %c0_i32_0 : i32, i32
  }
  func.func @transform_14(%arg0: i32) -> (i32, i32) {
    %c0_i32 = arith.constant 0 : i32
    %c0_i32_0 = arith.constant 0 : i32
    %c0_i32_1 = arith.constant 0 : i32
    return %c0_i32, %c0_i32_0 : i32, i32
  }
  func.func @transform_15(%arg0: i32) -> (i32, i32, i32) {
    %c0_i32 = arith.constant 0 : i32
    %c0_i32_0 = arith.constant 0 : i32
    %c0_i32_1 = arith.constant 0 : i32
    %c0_i32_2 = arith.constant 0 : i32
    return %c0_i32, %c0_i32_0, %c0_i32_1 : i32, i32, i32
  }
  func.func @transform_16(%arg0: i32) -> (i32, i32, i32) {
    %c0_i32 = arith.constant 0 : i32
    %c0_i32_0 = arith.constant 0 : i32
    %c0_i32_1 = arith.constant 0 : i32
    %c0_i32_2 = arith.constant 0 : i32
    return %c0_i32, %c0_i32_0, %c0_i32_1 : i32, i32, i32
  }
}

</mosaic_0001>

<bundles_post_ra>
// kernel: net_forward.1
= control target key start
LH: loop header
LB: loop body
LE: loop exit
PB: predicated region body
PF: predicated region fallthrough
CT: control target
= control target key end

     0   :  { %s7955_s0 = inlined_call_operand.vmem [shape: f32[8,2], index: 0, kind: input, shape index: {}]   ;;  %s7956_s1 = inlined_call_operand.hbm [shape: f32[2,128], index: 1, kind: input, shape index: {}]   ;;  %s7957_s2 = inlined_call_operand.hbm [shape: f32[1,128], index: 2, kind: input, shape index: {}]   ;;  %s7958_s3 = inlined_call_operand.hbm [shape: f32[128,128], index: 3, kind: input, shape index: {}]   ;;  %s7959_s4 = inlined_call_operand.hbm [shape: f32[1,128], index: 4, kind: input, shape index: {}]   ;;  %s7960_s5 = inlined_call_operand.hbm [shape: f32[128,128], index: 5, kind: input, shape index: {}]   ;;  %s7961_s6 = inlined_call_operand.hbm [shape: f32[1,128], index: 6, kind: input, shape index: {}]   ;;  %s7962_s7 = inlined_call_operand.vmem [shape: f32[128,2], index: 7, kind: input, shape index: {}]   ;;  %s7963_s8 = inlined_call_operand.hbm [shape: f32[1,2], index: 8, kind: input, shape index: {}]   ;;  %s7964_s9 = inlined_call_operand.vmem [shape: bf16[128,2000], index: 9, kind: input, shape index: {}]   ;;  %s7965_s10 = inlined_call_operand.hbm [shape: f32[1,2000], index: 10, kind: input, shape index: {}]   ;;  %s7966_s11 = inlined_call_operand.vmem [shape: bf16[2000,160], index: 11, kind: input, shape index: {}]   ;;  %s7967_s12 = inlined_call_operand.hbm [shape: f32[1,32], index: 12, kind: input, shape index: {}]   ;;  %s7968_s13 = inlined_call_operand.vmem [shape: f32[32,2], index: 13, kind: input, shape index: {}]   ;;  %s7969_s14 = inlined_call_operand.hbm [shape: f32[1,2], index: 14, kind: input, shape index: {}]   ;;  %s7970_s15 = inlined_call_operand.vmem [shape: f32[700,8,4], index: 15, kind: output, shape index: {0}]   ;;  %s7971_s16 = inlined_call_operand.vmem [shape: f32[700,8,2], index: 16, kind: output, shape index: {1}]  }
   0x1   :  { %8661 = sst [smem:[#allocation402_spill]] %s7955_s0 }
   0x2   :  { %22 = vsyncpa [#allocation3], 0 }
   0x3   :  { %23 = vsyncpa [#allocation5], 0 }
   0x4   :  { %24 = vsyncpa [#allocation8], 0 }
   0x5   :  { %25 = vsyncpa [#allocation11], 0 }
   0x6   :  { %26 = vsyncpa [#allocation14], 0 }
   0x7   :  { %27 = vsyncpa [#allocation17], 0  ;;  %s4790_s21 = smov [#allocation4]   ;;  %s4791_s23 = smov [#allocation7]  }
   0x8   :  { %s46_s22 = sshll.u32 %s4790_s21, 4  ;;  %s68_s24 = sshll.u32 %s4791_s23, 4  ;;  %s47_s22 = int_to_ptr.vmem [resolvable:$true] %s46_s22  ;;  %s69_s24 = int_to_ptr.vmem [resolvable:$true] %s68_s24 }
   0x9   :  { %s4534_s27 = scalar_lea.hbm %s7957_s2, 16 }
   0xa   :  { %p4535_p0 = scmp.ne.s32.totalorder %s7957_s2, %s4534_s27  ;;  %p4538_p1 = scmp.lt.u32.totalorder %s4534_s27, %s7957_s2 }
   0xc   :  { %p4540_p2 = pnand %p4538_p1, %p4535_p0 }
   0xe   :  { %4543 = shalt.err (!%p4540_p2)
}
   0xf   :  { %s4544_s17 = scalar_lea.vmem %s47_s22, 16  ;;  %s4548_s18 = scalar_lea.vmem %s47_s22, 32 }
  0x10   :  { %p4545_p3 = scmp.ne.s32.totalorder %s47_s22, %s4544_s17  ;;  %p4549_p4 = scmp.lt.s32.totalorder %s47_s22, %s47_s22 }
  0x11   :  { %p4550_p5 = scmp.lt.s32.totalorder %s4548_s18, %s4544_s17 }
  0x13   :  { %p4551_p6 = por %p4550_p5, %p4549_p4 }
  0x15   :  { %p4552_p7 = pnand %p4551_p6, %p4545_p3 }
  0x17   :  { %4555 = shalt.err (!%p4552_p7)
}
  0x18   :  { %49 = dma.hbm_to_vmem [thread:$0]  %s7957_s2, 16, %s47_s22, [#allocation5]  }
  0x19   :  { %s4556_s25 = scalar_lea.hbm %s7959_s4, 16 }
  0x1a   :  { %p4557_p8 = scmp.ne.s32.totalorder %s7959_s4, %s4556_s25  ;;  %p4560_p9 = scmp.lt.u32.totalorder %s4556_s25, %s7959_s4 }
  0x1c   :  { %p4562_p10 = pnand %p4560_p9, %p4557_p8 }
  0x1e   :  { %4565 = shalt.err (!%p4562_p10)
}
  0x1f   :  { %s4566_s30 = scalar_lea.vmem %s69_s24, 16  ;;  %s4570_s0 = scalar_lea.vmem %s69_s24, 32 }
  0x20   :  { %p4567_p11 = scmp.ne.s32.totalorder %s69_s24, %s4566_s30  ;;  %p4571_p12 = scmp.lt.s32.totalorder %s69_s24, %s69_s24 }
  0x21   :  { %p4572_p13 = scmp.lt.s32.totalorder %s4570_s0, %s4566_s30 }
  0x23   :  { %p4573_p0 = por %p4572_p13, %p4571_p12 }
  0x25   :  { %p4574_p1 = pnand %p4573_p0, %p4567_p11 }
  0x27   :  { %4577 = shalt.err (!%p4574_p1)
}
  0x28   :  { %71 = dma.hbm_to_vmem [thread:$0]  %s7959_s4, 16, %s69_s24, [#allocation8]  }
  0x29   :  { %s4792_s17 = smov [#allocation10]   ;;  %s4793_s19 = smov [#allocation13]  }
  0x2a   :  { %s90_s18 = sshll.u32 %s4792_s17, 4  ;;  %s114_s20 = sshll.u32 %s4793_s19, 4  ;;  %s91_s18 = int_to_ptr.vmem [resolvable:$true] %s90_s18  ;;  %s115_s20 = int_to_ptr.vmem [resolvable:$true] %s114_s20 }
  0x2b   :  { %s4578_s25 = scalar_lea.hbm %s7961_s6, 16 }
  0x2c   :  { %p4579_p2 = scmp.ne.s32.totalorder %s7961_s6, %s4578_s25  ;;  %p4582_p3 = scmp.lt.u32.totalorder %s4578_s25, %s7961_s6 }
  0x2e   :  { %p4584_p4 = pnand %p4582_p3, %p4579_p2 }
  0x30   :  { %4587 = shalt.err (!%p4584_p4)
}
  0x31   :  { %s4588_s4 = scalar_lea.vmem %s91_s18, 16  ;;  %s4592_s24 = scalar_lea.vmem %s91_s18, 32 }
  0x32   :  { %p4589_p5 = scmp.ne.s32.totalorder %s91_s18, %s4588_s4  ;;  %p4593_p6 = scmp.lt.s32.totalorder %s91_s18, %s91_s18 }
  0x33   :  { %p4594_p7 = scmp.lt.s32.totalorder %s4592_s24, %s4588_s4 }
  0x35   :  { %p4595_p8 = por %p4594_p7, %p4593_p6 }
  0x37   :  { %p4596_p9 = pnand %p4595_p8, %p4589_p5 }
  0x39   :  { %4599 = shalt.err (!%p4596_p9)
}
  0x3a   :  { %93 = dma.hbm_to_vmem [thread:$0]  %s7961_s6, 16, %s91_s18, [#allocation11]  }
  0x3b   :  { %s4600_s17 = scalar_lea.hbm %s7965_s10, 256 }
  0x3c   :  { %p4601_p10 = scmp.ne.s32.totalorder %s7965_s10, %s4600_s17  ;;  %p4604_p11 = scmp.lt.u32.totalorder %s4600_s17, %s7965_s10 }
  0x3e   :  { %p4606_p12 = pnand %p4604_p11, %p4601_p10 }
  0x40   :  { %4609 = shalt.err (!%p4606_p12)
}
  0x41   :  { %s4610_s26 = scalar_lea.vmem %s115_s20, 256  ;;  %p4615_p0 = scmp.lt.s32.totalorder %s115_s20, %s115_s20 }
  0x42   :  { %p4611_p13 = scmp.ne.s32.totalorder %s115_s20, %s4610_s26  ;;  %p4616_p1 = scmp.lt.s32.totalorder %s4610_s26, %s4610_s26 }
  0x44   :  { %p4617_p2 = por %p4616_p1, %p4615_p0 }
  0x46   :  { %p4618_p3 = pnand %p4617_p2, %p4611_p13 }
  0x48   :  { %4621 = shalt.err (!%p4618_p3)
}
  0x49   :  { %117 = dma.hbm_to_vmem [thread:$0]  %s7965_s10, 256, %s115_s20, [#allocation14]  }
  0x4a   :  { %s4794_s27 = smov [#allocation2]   ;;  %s4795_s29 = smov [#allocation6]  }
  0x4b   :  { %s36_s28 = sshll.u32 %s4794_s27, 4  ;;  %s55_s4 = sshll.u32 %s4795_s29, 4  ;;  %s37_s28 = int_to_ptr.vmem [resolvable:$true] %s36_s28  ;;  %s4948_s4 = int_to_ptr.vmem [resolvable:$true] %s55_s4 }
  0x4c   :  { %s4622_s0 = scalar_lea.hbm %s7956_s1, 32 }
  0x4d   :  { %p4623_p4 = scmp.ne.s32.totalorder %s7956_s1, %s4622_s0  ;;  %p4626_p5 = scmp.lt.u32.totalorder %s4622_s0, %s7956_s1 }
  0x4f   :  { %p4628_p6 = pnand %p4626_p5, %p4623_p4 }
  0x51   :  { %4631 = shalt.err (!%p4628_p6)
}
  0x52   :  { %s4632_s10 = scalar_lea.vmem %s37_s28, 32  ;;  %p4637_p8 = scmp.lt.s32.totalorder %s37_s28, %s37_s28 }
  0x53   :  { %p4633_p7 = scmp.ne.s32.totalorder %s37_s28, %s4632_s10  ;;  %p4638_p9 = scmp.lt.s32.totalorder %s4632_s10, %s4632_s10 }
  0x55   :  { %p4639_p10 = por %p4638_p9, %p4637_p8 }
  0x57   :  { %p4640_p11 = pnand %p4639_p10, %p4633_p7 }
  0x59   :  { %4643 = shalt.err (!%p4640_p11)
}
  0x5a   :  { %39 = dma.hbm_to_vmem [thread:$0]  %s7956_s1, 32, %s37_s28, [#allocation3]  }
  0x5b   :  { %s4644_s26 = scalar_lea.hbm %s7958_s3, 2048 }
  0x5c   :  { %p4645_p12 = scmp.ne.s32.totalorder %s7958_s3, %s4644_s26  ;;  %p4648_p13 = scmp.lt.u32.totalorder %s4644_s26, %s7958_s3 }
  0x5e   :  { %p4650_p0 = pnand %p4648_p13, %p4645_p12 }
  0x60   :  { %4653 = shalt.err (!%p4650_p0)
}
  0x61   :  { %s4654_s24 = scalar_lea.vmem %s4948_s4, 2048  ;;  %p4659_p2 = scmp.lt.s32.totalorder %s4948_s4, %s4948_s4 }
  0x62   :  { %p4655_p1 = scmp.ne.s32.totalorder %s4948_s4, %s4654_s24  ;;  %p4660_p3 = scmp.lt.s32.totalorder %s4654_s24, %s4654_s24 }
  0x64   :  { %p4661_p4 = por %p4660_p3, %p4659_p2 }
  0x66   :  { %p4662_p5 = pnand %p4661_p4, %p4655_p1 }
  0x68   :  { %4665 = shalt.err (!%p4662_p5)
}
  0x69   :  { %s4796_s1 = smov 128   ;;  %s4797_s28 = smov 8  }
  0x6a   :  { %61 = dma.hbm_to_vmem [thread:$0]  %s7958_s3, 2048, %s4948_s4, [#allocation5], %s4796_s1, %s4796_s1, %s4797_s28  }
  0x6b   :  { %s4798_s2 = smov [#allocation9]   ;;  %s4799_s17 = smov [#allocation12]  }
  0x6c   :  { %s77_s22 = sshll.u32 %s4798_s2, 4  ;;  %s102_s19 = sshll.u32 %s4799_s17, 4  ;;  %s78_s22 = int_to_ptr.vmem [resolvable:$true] %s77_s22  ;;  %s103_s19 = int_to_ptr.vmem [resolvable:$true] %s102_s19 }
  0x6d   :  { %s4666_s21 = scalar_lea.hbm %s7960_s5, 2048 }
  0x6e   :  { %p4667_p6 = scmp.ne.s32.totalorder %s7960_s5, %s4666_s21  ;;  %p4670_p7 = scmp.lt.u32.totalorder %s4666_s21, %s7960_s5 }
  0x70   :  { %p4672_p8 = pnand %p4670_p7, %p4667_p6 }
  0x72   :  { %4675 = shalt.err (!%p4672_p8)
}
  0x73   :  { %s4676_s3 = scalar_lea.vmem %s78_s22, 2048  ;;  %p4681_p10 = scmp.lt.s32.totalorder %s78_s22, %s78_s22 }
  0x74   :  { %p4677_p9 = scmp.ne.s32.totalorder %s78_s22, %s4676_s3  ;;  %p4682_p11 = scmp.lt.s32.totalorder %s4676_s3, %s4676_s3 }
  0x76   :  { %p4683_p12 = por %p4682_p11, %p4681_p10 }
  0x78   :  { %p4684_p13 = pnand %p4683_p12, %p4677_p9 }
  0x7a   :  { %4687 = shalt.err (!%p4684_p13)
}
  0x7b   :  { %83 = dma.hbm_to_vmem [thread:$0]  %s7960_s5, 2048, %s78_s22, [#allocation8], %s4796_s1, %s4796_s1, %s4797_s28  }
  0x7c   :  { %s4688_s24 = scalar_lea.hbm %s7963_s8, 16 }
  0x7d   :  { %p4689_p0 = scmp.ne.s32.totalorder %s7963_s8, %s4688_s24  ;;  %p4692_p1 = scmp.lt.u32.totalorder %s4688_s24, %s7963_s8 }
  0x7f   :  { %p4694_p2 = pnand %p4692_p1, %p4689_p0 }
  0x81   :  { %4697 = shalt.err (!%p4694_p2)
}
  0x82   :  { %s4698_s10 = scalar_lea.vmem %s103_s19, 16  ;;  %s4702_s20 = scalar_lea.vmem %s103_s19, 32 }
  0x83   :  { %p4699_p3 = scmp.ne.s32.totalorder %s103_s19, %s4698_s10  ;;  %p4703_p4 = scmp.lt.s32.totalorder %s103_s19, %s103_s19 }
  0x84   :  { %p4704_p5 = scmp.lt.s32.totalorder %s4702_s20, %s4698_s10 }
  0x86   :  { %p4705_p6 = por %p4704_p5, %p4703_p4 }
  0x88   :  { %p4706_p7 = pnand %p4705_p6, %p4699_p3 }
  0x8a   :  { %4709 = shalt.err (!%p4706_p7)
}
  0x8b   :  { %105 = dma.hbm_to_vmem [thread:$0]  %s7963_s8, 16, %s103_s19, [#allocation11]  }
  0x8c   :  { %s4800_s28 = smov [#allocation15]   ;;  %s4801_s21 = smov [#allocation16]  }
  0x8d   :  { %s126_s22 = sshll.u32 %s4800_s28, 4  ;;  %s138_s23 = sshll.u32 %s4801_s21, 4  ;;  %s127_s22 = int_to_ptr.vmem [resolvable:$true] %s126_s22  ;;  %s139_s23 = int_to_ptr.vmem [resolvable:$true] %s138_s23 }
  0x8e   :  { %s4710_s6 = scalar_lea.hbm %s7967_s12, 16 }
  0x8f   :  { %p4711_p8 = scmp.ne.s32.totalorder %s7967_s12, %s4710_s6  ;;  %p4714_p9 = scmp.lt.u32.totalorder %s4710_s6, %s7967_s12 }
  0x91   :  { %p4716_p10 = pnand %p4714_p9, %p4711_p8 }
  0x93   :  { %4719 = shalt.err (!%p4716_p10)
}
  0x94   :  { %s4720_s8 = scalar_lea.vmem %s127_s22, 16  ;;  %s4724_s19 = scalar_lea.vmem %s127_s22, 32 }
  0x95   :  { %p4721_p11 = scmp.ne.s32.totalorder %s127_s22, %s4720_s8  ;;  %p4725_p12 = scmp.lt.s32.totalorder %s127_s22, %s127_s22 }
  0x96   :  { %p4726_p13 = scmp.lt.s32.totalorder %s4724_s19, %s4720_s8 }
  0x98   :  { %p4727_p0 = por %p4726_p13, %p4725_p12 }
  0x9a   :  { %p4728_p1 = pnand %p4727_p0, %p4721_p11 }
  0x9c   :  { %4731 = shalt.err (!%p4728_p1)
}
  0x9d   :  { %129 = dma.hbm_to_vmem [thread:$0]  %s7967_s12, 16, %s127_s22, [#allocation14]  }
  0x9e   :  { %s4732_s2 = scalar_lea.hbm %s7969_s14, 16 }
  0x9f   :  { %p4733_p2 = scmp.ne.s32.totalorder %s7969_s14, %s4732_s2  ;;  %p4736_p3 = scmp.lt.u32.totalorder %s4732_s2, %s7969_s14 }
  0xa1   :  { %p4738_p4 = pnand %p4736_p3, %p4733_p2 }
  0xa3   :  { %4741 = shalt.err (!%p4738_p4)
}
  0xa4   :  { %s4742_s1 = scalar_lea.vmem %s139_s23, 16  ;;  %s4746_s28 = scalar_lea.vmem %s139_s23, 32 }
  0xa5   :  { %p4743_p5 = scmp.ne.s32.totalorder %s139_s23, %s4742_s1  ;;  %p4747_p6 = scmp.lt.s32.totalorder %s139_s23, %s139_s23 }
  0xa6   :  { %p4748_p7 = scmp.lt.s32.totalorder %s4746_s28, %s4742_s1 }
  0xa8   :  { %p4749_p8 = por %p4748_p7, %p4747_p6 }
  0xaa   :  { %p4750_p9 = pnand %p4749_p8, %p4743_p5 }
  0xac   :  { %4753 = shalt.err (!%p4750_p9)
}
  0xad   :  { %141 = dma.hbm_to_vmem [thread:$0]  %s7969_s14, 16, %s139_s23, [#allocation17]  }
  0xae   :  { %4766 = dma.done.wait [#allocation3], 32  }
  0xaf   :  { %4767 = vsyncadd [#allocation3], 4294967264 }
  0xb0   :  { %4768 = dma.done.wait [#allocation5], 2064  }
  0xb1   :  { %4769 = vsyncadd [#allocation5], 4294965232 }
  0xb2   :  { %4770 = dma.done.wait [#allocation8], 2064  }
  0xb3   :  { %4771 = vsyncadd [#allocation8], 4294965232 }
  0xb4   :  { %4772 = dma.done.wait [#allocation11], 32  }
  0xb5   :  { %4773 = vsyncadd [#allocation11], 4294967264 }
  0xb6   :  { %4774 = dma.done.wait [#allocation14], 272  }
  0xb7   :  { %4775 = vsyncadd [#allocation14], 4294967024 }
  0xb8   :  { %4776 = dma.done.wait [#allocation17], 16  }
  0xb9   :  { %4777 = vsyncadd [#allocation17], 4294967280  ;;  %v7972_v0 = vmov 0.0   ;;  %v5031_v1 = vld [vmem:[%s7964_s9] sm:$0xff]  ;;  %v5036_v2 = vld [vmem:[%s7964_s9 + $0x8] sm:$0xff]  ;;  %vm4803_vm0 = vmmov 0  }
  0xba   :  { %4279 = vmatprep.subr.mxu0 %v7972_v0  ;;  %8662 = vst [vmem:[#allocation24_spill] sm:$0xff] %v5031_v1  ;;  %8663 = vst [vmem:[#allocation25_spill] sm:$0xff] %v5036_v2  ;;  %v5041_v3 = vld [vmem:[%s7964_s9 + $0x10] sm:$0xff]  ;;  %4281 = vmatprep.mubr.msk.f32.mxu0 %vm4803_vm0, %v7972_v0  ;;  %v5050_v4 = vld [vmem:[%s7964_s9 + $0x18] sm:$0xff]  ;;  %v7974_v10 = vmov 0.0|0.0   ;;  %vm186_vm1 = vcmask 1041408  }
  0xbb   :  { %8664 = vst [vmem:[#allocation26_spill] sm:$0xff] %v5041_v3  ;;  %4316 = vmatprep.mubr.msk.f32.mxu1 %vm4803_vm0, %v7972_v0  ;;  %8665 = vst [vmem:[#allocation27_spill] sm:$0xff] %v5050_v4  ;;  %v5055_v5 = vld [vmem:[%s7964_s9 + $0x20] sm:$0xff]  ;;  %v5060_v6 = vld [vmem:[%s7964_s9 + $0x28] sm:$0xff]  ;;  %4400 = vmatprep.subr.bf16.mxu1 %v7974_v10  ;;  %vm182_vm2 = vcmask 15360   ;;  %s9027_s5 = sld [smem:[#allocation402_spill]] }
  0xbc   :  { %8666 = vst [vmem:[#allocation28_spill] sm:$0xff] %v5055_v5  ;;  %8667 = vst [vmem:[#allocation29_spill] sm:$0xff] %v5060_v6  ;;  %v5065_v7 = vld [vmem:[%s7964_s9 + $0x30] sm:$0xff]  ;;  %v5070_v8 = vld [vmem:[%s7964_s9 + $0x38] sm:$0xff] }
  0xbd   :  { %8668 = vst [vmem:[#allocation30_spill] sm:$0xff] %v5065_v7  ;;  %8669 = vst [vmem:[#allocation31_spill] sm:$0xff] %v5070_v8  ;;  %v5075_v9 = vld [vmem:[%s7964_s9 + $0x40] sm:$0xff]  ;;  %v5081_v11 = vld [vmem:[%s7964_s9 + $0x48] sm:$0xff] }
  0xbe   :  { %8670 = vst [vmem:[#allocation32_spill] sm:$0xff] %v5075_v9  ;;  %8671 = vst [vmem:[#allocation33_spill] sm:$0xff] %v5081_v11  ;;  %v5086_v12 = vld [vmem:[%s7964_s9 + $0x50] sm:$0xff]  ;;  %v5091_v13 = vld [vmem:[%s7964_s9 + $0x58] sm:$0xff] }
  0xbf   :  { %8672 = vst [vmem:[#allocation34_spill] sm:$0xff] %v5086_v12  ;;  %8673 = vst [vmem:[#allocation35_spill] sm:$0xff] %v5091_v13  ;;  %v5096_v14 = vld [vmem:[%s7964_s9 + $0x60] sm:$0xff]  ;;  %v5101_v15 = vld [vmem:[%s7964_s9 + $0x68] sm:$0xff] }
  0xc0   :  { %8674 = vst [vmem:[#allocation36_spill] sm:$0xff] %v5096_v14  ;;  %8675 = vst [vmem:[#allocation37_spill] sm:$0xff] %v5101_v15  ;;  %v5106_v16 = vld [vmem:[%s7964_s9 + $0x70] sm:$0xff]  ;;  %v5111_v17 = vld [vmem:[%s7964_s9 + $0x78] sm:$0xff] }
  0xc1   :  { %8676 = vst [vmem:[#allocation38_spill] sm:$0xff] %v5106_v16  ;;  %8677 = vst [vmem:[#allocation39_spill] sm:$0xff] %v5111_v17  ;;  %v5116_v18 = vld [vmem:[%s7964_s9 + $0x80] sm:$0xff]  ;;  %v5121_v19 = vld [vmem:[%s7964_s9 + $0x88] sm:$0xff] }
  0xc2   :  { %8678 = vst [vmem:[#allocation40_spill] sm:$0xff] %v5116_v18  ;;  %8679 = vst [vmem:[#allocation41_spill] sm:$0xff] %v5121_v19  ;;  %v5126_v20 = vld [vmem:[%s7964_s9 + $0x90] sm:$0xff]  ;;  %v5131_v21 = vld [vmem:[%s7964_s9 + $0x98] sm:$0xff] }
  0xc3   :  { %8680 = vst [vmem:[#allocation42_spill] sm:$0xff] %v5126_v20  ;;  %8681 = vst [vmem:[#allocation43_spill] sm:$0xff] %v5131_v21  ;;  %v5136_v22 = vld [vmem:[%s7964_s9 + $0xa0] sm:$0xff]  ;;  %v5141_v23 = vld [vmem:[%s7964_s9 + $0xa8] sm:$0xff] }
  0xc4   :  { %8682 = vst [vmem:[#allocation44_spill] sm:$0xff] %v5136_v22  ;;  %8683 = vst [vmem:[#allocation45_spill] sm:$0xff] %v5141_v23  ;;  %v5146_v24 = vld [vmem:[%s7964_s9 + $0xb0] sm:$0xff]  ;;  %v5151_v25 = vld [vmem:[%s7964_s9 + $0xb8] sm:$0xff] }
  0xc5   :  { %8684 = vst [vmem:[#allocation46_spill] sm:$0xff] %v5146_v24  ;;  %8685 = vst [vmem:[#allocation47_spill] sm:$0xff] %v5151_v25  ;;  %v5156_v26 = vld [vmem:[%s7964_s9 + $0xc0] sm:$0xff]  ;;  %v5161_v27 = vld [vmem:[%s7964_s9 + $0xc8] sm:$0xff] }
  0xc6   :  { %8686 = vst [vmem:[#allocation48_spill] sm:$0xff] %v5156_v26  ;;  %8687 = vst [vmem:[#allocation49_spill] sm:$0xff] %v5161_v27  ;;  %v5166_v28 = vld [vmem:[%s7964_s9 + $0xd0] sm:$0xff]  ;;  %v5171_v29 = vld [vmem:[%s7964_s9 + $0xd8] sm:$0xff] }
  0xc7   :  { %8688 = vst [vmem:[#allocation50_spill] sm:$0xff] %v5166_v28  ;;  %8689 = vst [vmem:[#allocation51_spill] sm:$0xff] %v5171_v29  ;;  %v5176_v30 = vld [vmem:[%s7964_s9 + $0xe0] sm:$0xff]  ;;  %v5181_v31 = vld [vmem:[%s7964_s9 + $0xe8] sm:$0xff] }
  0xc8   :  { %8690 = vst [vmem:[#allocation52_spill] sm:$0xff] %v5176_v30  ;;  %8691 = vst [vmem:[#allocation53_spill] sm:$0xff] %v5181_v31  ;;  %v5186_v32 = vld [vmem:[%s7964_s9 + $0xf0] sm:$0xff]  ;;  %v5191_v33 = vld [vmem:[%s7964_s9 + $0xf8] sm:$0xff] }
  0xc9   :  { %8692 = vst [vmem:[#allocation54_spill] sm:$0xff] %v5186_v32  ;;  %8693 = vst [vmem:[#allocation55_spill] sm:$0xff] %v5191_v33  ;;  %v5196_v34 = vld [vmem:[%s7964_s9 + $0x100] sm:$0xff]  ;;  %v5201_v35 = vld [vmem:[%s7964_s9 + $0x108] sm:$0xff] }
  0xca   :  { %v5206_v36 = vld [vmem:[%s7964_s9 + $0x110] sm:$0xff]  ;;  %v5211_v37 = vld [vmem:[%s7964_s9 + $0x118] sm:$0xff]  ;;  %v5216_v38 = vld [vmem:[%s7964_s9 + $0x120] sm:$0xff] }
  0xcb   :  { %8694 = vst [vmem:[#allocation56_spill] sm:$0xff] %v5211_v37  ;;  %8695 = vst [vmem:[#allocation57_spill] sm:$0xff] %v5216_v38  ;;  %v5221_v39 = vld [vmem:[%s7964_s9 + $0x128] sm:$0xff]  ;;  %v5226_v40 = vld [vmem:[%s7964_s9 + $0x130] sm:$0xff] }
  0xcc   :  { %8696 = vst [vmem:[#allocation58_spill] sm:$0xff] %v5221_v39  ;;  %8697 = vst [vmem:[#allocation59_spill] sm:$0xff] %v5226_v40  ;;  %v5231_v41 = vld [vmem:[%s7964_s9 + $0x138] sm:$0xff]  ;;  %v5236_v42 = vld [vmem:[%s7964_s9 + $0x140] sm:$0xff] }
  0xcd   :  { %8698 = vst [vmem:[#allocation60_spill] sm:$0xff] %v5231_v41  ;;  %v5241_v43 = vld [vmem:[%s7964_s9 + $0x148] sm:$0xff]  ;;  %v5246_v44 = vld [vmem:[%s7964_s9 + $0x150] sm:$0xff]  ;;  %v5251_v45 = vld [vmem:[%s7964_s9 + $0x158] sm:$0xff] }
  0xce   :  { %8699 = vst [vmem:[#allocation61_spill] sm:$0xff] %v5251_v45  ;;  %v5256_v46 = vld [vmem:[%s7964_s9 + $0x160] sm:$0xff]  ;;  %v5261_v47 = vld [vmem:[%s7964_s9 + $0x168] sm:$0xff]  ;;  %v5266_v48 = vld [vmem:[%s7964_s9 + $0x170] sm:$0xff] }
  0xcf   :  { %8700 = vst [vmem:[#allocation62_spill] sm:$0xff] %v5256_v46  ;;  %8701 = vst [vmem:[#allocation63_spill] sm:$0xff] %v5261_v47  ;;  %v5271_v49 = vld [vmem:[%s7964_s9 + $0x178] sm:$0xff]  ;;  %v5276_v50 = vld [vmem:[%s7964_s9 + $0x180] sm:$0xff] }
  0xd0   :  { %8702 = vst [vmem:[#allocation64_spill] sm:$0xff] %v5266_v48  ;;  %8703 = vst [vmem:[#allocation65_spill] sm:$0xff] %v5271_v49  ;;  %v5281_v51 = vld [vmem:[%s7964_s9 + $0x188] sm:$0xff]  ;;  %v5286_v52 = vld [vmem:[%s7964_s9 + $0x190] sm:$0xff] }
  0xd1   :  { %8704 = vst [vmem:[#allocation66_spill] sm:$0xff] %v5286_v52  ;;  %v5291_v53 = vld [vmem:[%s7964_s9 + $0x198] sm:$0xff]  ;;  %v5296_v54 = vld [vmem:[%s7964_s9 + $0x1a0] sm:$0xff]  ;;  %v5301_v55 = vld [vmem:[%s7964_s9 + $0x1a8] sm:$0xff] }
  0xd2   :  { %8705 = vst [vmem:[#allocation67_spill] sm:$0xff] %v5291_v53  ;;  %8706 = vst [vmem:[#allocation68_spill] sm:$0xff] %v5296_v54  ;;  %v5306_v56 = vld [vmem:[%s7964_s9 + $0x1b0] sm:$0xff]  ;;  %v5311_v57 = vld [vmem:[%s7964_s9 + $0x1b8] sm:$0xff] }
  0xd3   :  { %8707 = vst [vmem:[#allocation69_spill] sm:$0xff] %v5301_v55  ;;  %8708 = vst [vmem:[#allocation70_spill] sm:$0xff] %v5306_v56  ;;  %v5316_v58 = vld [vmem:[%s7964_s9 + $0x1c0] sm:$0xff]  ;;  %v5321_v59 = vld [vmem:[%s7964_s9 + $0x1c8] sm:$0xff] }
  0xd4   :  { %8709 = vst [vmem:[#allocation71_spill] sm:$0xff] %v5311_v57  ;;  %v5326_v60 = vld [vmem:[%s7964_s9 + $0x1d0] sm:$0xff]  ;;  %v5331_v61 = vld [vmem:[%s7964_s9 + $0x1d8] sm:$0xff]  ;;  %v5336_v62 = vld [vmem:[%s7964_s9 + $0x1e0] sm:$0xff] }
  0xd5   :  { %8710 = vst [vmem:[#allocation72_spill] sm:$0xff] %v5326_v60  ;;  %8711 = vst [vmem:[#allocation73_spill] sm:$0xff] %v5331_v61  ;;  %v5341_v63 = vld [vmem:[%s7964_s9 + $0x1e8] sm:$0xff]  ;;  %v5346_v0 = vld [vmem:[%s7964_s9 + $0x1f0] sm:$0xff] }
  0xd6   :  { %8712 = vst [vmem:[#allocation74_spill] sm:$0xff] %v5336_v62  ;;  %8713 = vst [vmem:[#allocation75_spill] sm:$0xff] %v5341_v63  ;;  %v5351_v10 = vld [vmem:[%s7964_s9 + $0x1f8] sm:$0xff]  ;;  %v5356_v57 = vld [vmem:[%s7964_s9 + $0x200] sm:$0xff] }
  0xd7   :  { %8714 = vst [vmem:[#allocation76_spill] sm:$0xff] %v5346_v0  ;;  %8715 = vst [vmem:[#allocation77_spill] sm:$0xff] %v5351_v10  ;;  %v5361_v56 = vld [vmem:[%s7964_s9 + $0x208] sm:$0xff]  ;;  %v5366_v41 = vld [vmem:[%s7964_s9 + $0x210] sm:$0xff] }
  0xd8   :  { %8716 = vst [vmem:[#allocation78_spill] sm:$0xff] %v5366_v41  ;;  %v5371_v0 = vld [vmem:[%s7964_s9 + $0x218] sm:$0xff]  ;;  %v5376_v10 = vld [vmem:[%s7964_s9 + $0x220] sm:$0xff]  ;;  %v5381_v49 = vld [vmem:[%s7964_s9 + $0x228] sm:$0xff] }
  0xd9   :  { %8717 = vst [vmem:[#allocation79_spill] sm:$0xff] %v5371_v0  ;;  %8718 = vst [vmem:[#allocation80_spill] sm:$0xff] %v5376_v10  ;;  %v5386_v40 = vld [vmem:[%s7964_s9 + $0x230] sm:$0xff]  ;;  %v5391_v48 = vld [vmem:[%s7964_s9 + $0x238] sm:$0xff]  ;;  %v9029_v0 = vmov 0.0  }
  0xda   :  { %8719 = vst [vmem:[#allocation81_spill] sm:$0xff] %v5381_v49  ;;  %8720 = vst [vmem:[#allocation82_spill] sm:$0xff] %v5386_v40  ;;  %v5396_v25 = vld [vmem:[%s7964_s9 + $0x240] sm:$0xff]  ;;  %v5401_v33 = vld [vmem:[%s7964_s9 + $0x248] sm:$0xff] }
  0xdb   :  { %8721 = vst [vmem:[#allocation83_spill] sm:$0xff] %v5391_v48  ;;  %8722 = vst [vmem:[#allocation84_spill] sm:$0xff] %v5396_v25  ;;  %v5406_v24 = vld [vmem:[%s7964_s9 + $0x250] sm:$0xff]  ;;  %v5411_v40 = vld [vmem:[%s7964_s9 + $0x258] sm:$0xff] }
  0xdc   :  { %8723 = vst [vmem:[#allocation85_spill] sm:$0xff] %v5406_v24  ;;  %8724 = vst [vmem:[#allocation86_spill] sm:$0xff] %v5411_v40  ;;  %v5416_v48 = vld [vmem:[%s7964_s9 + $0x260] sm:$0xff]  ;;  %v5421_v32 = vld [vmem:[%s7964_s9 + $0x268] sm:$0xff] }
  0xdd   :  { %8725 = vst [vmem:[#allocation87_spill] sm:$0xff] %v5416_v48  ;;  %8726 = vst [vmem:[#allocation88_spill] sm:$0xff] %v5421_v32  ;;  %v5426_v8 = vld [vmem:[%s7964_s9 + $0x270] sm:$0xff]  ;;  %v5431_v17 = vld [vmem:[%s7964_s9 + $0x278] sm:$0xff] }
  0xde   :  { %8727 = vst [vmem:[#allocation89_spill] sm:$0xff] %v5426_v8  ;;  %8728 = vst [vmem:[#allocation90_spill] sm:$0xff] %v5431_v17  ;;  %v5436_v7 = vld [vmem:[%s7964_s9 + $0x280] sm:$0xff]  ;;  %v5441_v16 = vld [vmem:[%s7964_s9 + $0x288] sm:$0xff] }
  0xdf   :  { %8729 = vst [vmem:[#allocation91_spill] sm:$0xff] %v5436_v7  ;;  %8730 = vst [vmem:[#allocation92_spill] sm:$0xff] %v5441_v16  ;;  %v5446_v49 = vld [vmem:[%s7964_s9 + $0x290] sm:$0xff]  ;;  %v5451_v8 = vld [vmem:[%s7964_s9 + $0x298] sm:$0xff] }
  0xe0   :  { %8731 = vst [vmem:[#allocation93_spill] sm:$0xff] %v5446_v49  ;;  %8732 = vst [vmem:[#allocation94_spill] sm:$0xff] %v5451_v8  ;;  %v5456_v17 = vld [vmem:[%s7964_s9 + $0x2a0] sm:$0xff]  ;;  %v5461_v32 = vld [vmem:[%s7964_s9 + $0x2a8] sm:$0xff] }
  0xe1   :  { %8733 = vst [vmem:[#allocation95_spill] sm:$0xff] %v5456_v17  ;;  %8734 = vst [vmem:[#allocation96_spill] sm:$0xff] %v5461_v32  ;;  %v5466_v10 = vld [vmem:[%s7964_s9 + $0x2b0] sm:$0xff]  ;;  %v5471_v48 = vld [vmem:[%s7964_s9 + $0x2b8] sm:$0xff] }
  0xe2   :  { %8735 = vst [vmem:[#allocation97_spill] sm:$0xff] %v5466_v10  ;;  %8736 = vst [vmem:[#allocation98_spill] sm:$0xff] %v5471_v48  ;;  %v5476_v55 = vld [vmem:[%s7964_s9 + $0x2c0] sm:$0xff]  ;;  %v5481_v17 = vld [vmem:[%s7964_s9 + $0x2c8] sm:$0xff] }
  0xe3   :  { %8737 = vst [vmem:[#allocation99_spill] sm:$0xff] %v5481_v17  ;;  %v5486_v32 = vld [vmem:[%s7964_s9 + $0x2d0] sm:$0xff]  ;;  %v5491_v10 = vld [vmem:[%s7964_s9 + $0x2d8] sm:$0xff]  ;;  %v5496_v48 = vld [vmem:[%s7964_s9 + $0x2e0] sm:$0xff] }
  0xe4   :  { %8738 = vst [vmem:[#allocation100_spill] sm:$0xff] %v5486_v32  ;;  %8739 = vst [vmem:[#allocation101_spill] sm:$0xff] %v5491_v10  ;;  %v5501_v63 = vld [vmem:[%s7964_s9 + $0x2e8] sm:$0xff]  ;;  %v5506_v54 = vld [vmem:[%s7964_s9 + $0x2f0] sm:$0xff] }
  0xe5   :  { %8740 = vst [vmem:[#allocation102_spill] sm:$0xff] %v5496_v48  ;;  %8741 = vst [vmem:[#allocation103_spill] sm:$0xff] %v5501_v63  ;;  %v5511_v62 = vld [vmem:[%s7964_s9 + $0x2f8] sm:$0xff]  ;;  %v5516_v39 = vld [vmem:[%s7964_s9 + $0x300] sm:$0xff] }
  0xe6   :  { %8742 = vst [vmem:[#allocation104_spill] sm:$0xff] %v5506_v54  ;;  %8743 = vst [vmem:[#allocation105_spill] sm:$0xff] %v5511_v62  ;;  %v5521_v48 = vld [vmem:[%s7964_s9 + $0x308] sm:$0xff]  ;;  %v5526_v63 = vld [vmem:[%s7964_s9 + $0x310] sm:$0xff] }
  0xe7   :  { %8744 = vst [vmem:[#allocation106_spill] sm:$0xff] %v5526_v63  ;;  %v5531_v54 = vld [vmem:[%s7964_s9 + $0x318] sm:$0xff]  ;;  %v5536_v62 = vld [vmem:[%s7964_s9 + $0x320] sm:$0xff]  ;;  %v5541_v47 = vld [vmem:[%s7964_s9 + $0x328] sm:$0xff] }
  0xe8   :  { %8745 = vst [vmem:[#allocation107_spill] sm:$0xff] %v5531_v54  ;;  %8746 = vst [vmem:[#allocation108_spill] sm:$0xff] %v5536_v62  ;;  %v5546_v38 = vld [vmem:[%s7964_s9 + $0x330] sm:$0xff]  ;;  %v5551_v46 = vld [vmem:[%s7964_s9 + $0x338] sm:$0xff] }
  0xe9   :  { %8747 = vst [vmem:[#allocation109_spill] sm:$0xff] %v5541_v47  ;;  %8748 = vst [vmem:[#allocation110_spill] sm:$0xff] %v5546_v38  ;;  %v5556_v23 = vld [vmem:[%s7964_s9 + $0x340] sm:$0xff]  ;;  %v5561_v62 = vld [vmem:[%s7964_s9 + $0x348] sm:$0xff] }
  0xea   :  { %8749 = vst [vmem:[#allocation111_spill] sm:$0xff] %v5551_v46  ;;  %8750 = vst [vmem:[#allocation112_spill] sm:$0xff] %v5556_v23  ;;  %v5566_v47 = vld [vmem:[%s7964_s9 + $0x350] sm:$0xff]  ;;  %v5571_v38 = vld [vmem:[%s7964_s9 + $0x358] sm:$0xff] }
  0xeb   :  { %8751 = vst [vmem:[#allocation113_spill] sm:$0xff] %v5566_v47  ;;  %8752 = vst [vmem:[#allocation114_spill] sm:$0xff] %v5571_v38  ;;  %v5576_v46 = vld [vmem:[%s7964_s9 + $0x360] sm:$0xff]  ;;  %v5581_v31 = vld [vmem:[%s7964_s9 + $0x368] sm:$0xff] }
  0xec   :  { %8753 = vst [vmem:[#allocation115_spill] sm:$0xff] %v5576_v46  ;;  %8754 = vst [vmem:[#allocation116_spill] sm:$0xff] %v5581_v31  ;;  %v5586_v22 = vld [vmem:[%s7964_s9 + $0x370] sm:$0xff]  ;;  %v5591_v30 = vld [vmem:[%s7964_s9 + $0x378] sm:$0xff] }
  0xed   :  { %8755 = vst [vmem:[#allocation117_spill] sm:$0xff] %v5586_v22  ;;  %8756 = vst [vmem:[#allocation118_spill] sm:$0xff] %v5591_v30  ;;  %v5596_v6 = vld [vmem:[%s7964_s9 + $0x380] sm:$0xff]  ;;  %v5601_v46 = vld [vmem:[%s7964_s9 + $0x388] sm:$0xff] }
  0xee   :  { %8757 = vst [vmem:[#allocation119_spill] sm:$0xff] %v5596_v6  ;;  %v5606_v31 = vld [vmem:[%s7964_s9 + $0x390] sm:$0xff]  ;;  %v5611_v22 = vld [vmem:[%s7964_s9 + $0x398] sm:$0xff]  ;;  %v5616_v30 = vld [vmem:[%s7964_s9 + $0x3a0] sm:$0xff] }
  0xef   :  { %8758 = vst [vmem:[#allocation120_spill] sm:$0xff] %v5606_v31  ;;  %8759 = vst [vmem:[#allocation121_spill] sm:$0xff] %v5611_v22  ;;  %v5621_v15 = vld [vmem:[%s7964_s9 + $0x3a8] sm:$0xff]  ;;  %v5626_v5 = vld [vmem:[%s7964_s9 + $0x3b0] sm:$0xff] }
  0xf0   :  { %8760 = vst [vmem:[#allocation122_spill] sm:$0xff] %v5616_v30  ;;  %8761 = vst [vmem:[#allocation123_spill] sm:$0xff] %v5621_v15  ;;  %v5631_v14 = vld [vmem:[%s7964_s9 + $0x3b8] sm:$0xff]  ;;  %v5636_v22 = vld [vmem:[%s7964_s9 + $0x3c0] sm:$0xff] }
  0xf1   :  { %8762 = vst [vmem:[#allocation124_spill] sm:$0xff] %v5626_v5  ;;  %8763 = vst [vmem:[#allocation125_spill] sm:$0xff] %v5631_v14  ;;  %v5641_v30 = vld [vmem:[%s7964_s9 + $0x3c8] sm:$0xff]  ;;  %v5646_v15 = vld [vmem:[%s7964_s9 + $0x3d0] sm:$0xff] }
  0xf2   :  { %8764 = vst [vmem:[#allocation126_spill] sm:$0xff] %v5636_v22  ;;  %8765 = vst [vmem:[#allocation127_spill] sm:$0xff] %v5641_v30  ;;  %v5651_v5 = vld [vmem:[%s7964_s9 + $0x3d8] sm:$0xff]  ;;  %v5656_v14 = vld [vmem:[%s7964_s9 + $0x3e0] sm:$0xff] }
  0xf3   :  { %8766 = vst [vmem:[#allocation128_spill] sm:$0xff] %v5646_v15  ;;  %8767 = vst [vmem:[#allocation129_spill] sm:$0xff] %v5651_v5  ;;  %v5661_v31 = vld [vmem:[%s7964_s9 + $0x3e8] sm:$0xff]  ;;  %v5666_v54 = vld [vmem:[%s7964_s9 + $0x3f0] sm:$0xff] }
  0xf4   :  { %8768 = vst [vmem:[#allocation130_spill] sm:$0xff] %v5656_v14  ;;  %8769 = vst [vmem:[#allocation131_spill] sm:$0xff] %v5661_v31  ;;  %v5671_v15 = vld [vmem:[%s7964_s9 + $0x3f8] sm:$0xff]  ;;  %v5676_v5 = vld [vmem:[%s7966_s11] sm:$0xff] }
  0xf5   :  { %8770 = vst [vmem:[#allocation132_spill] sm:$0xff] %v5666_v54  ;;  %8771 = vst [vmem:[#allocation133_spill] sm:$0xff] %v5671_v15  ;;  %v5681_v14 = vld [vmem:[%s7966_s11 + $0x8] sm:$0xff]  ;;  %v5686_v31 = vld [vmem:[%s7966_s11 + $0x10] sm:$0xff] }
  0xf6   :  { %8772 = vst [vmem:[#allocation134_spill] sm:$0xff] %v5676_v5  ;;  %8773 = vst [vmem:[#allocation135_spill] sm:$0xff] %v5681_v14  ;;  %v5691_v54 = vld [vmem:[%s7966_s11 + $0x18] sm:$0xff]  ;;  %v5696_v15 = vld [vmem:[%s7966_s11 + $0x20] sm:$0xff] }
  0xf7   :  { %8774 = vst [vmem:[#allocation136_spill] sm:$0xff] %v5686_v31  ;;  %8775 = vst [vmem:[#allocation137_spill] sm:$0xff] %v5691_v54  ;;  %v5701_v5 = vld [vmem:[%s7966_s11 + $0x28] sm:$0xff]  ;;  %v5706_v14 = vld [vmem:[%s7966_s11 + $0x30] sm:$0xff] }
  0xf8   :  { %8776 = vst [vmem:[#allocation138_spill] sm:$0xff] %v5696_v15  ;;  %8777 = vst [vmem:[#allocation139_spill] sm:$0xff] %v5701_v5  ;;  %v5711_v31 = vld [vmem:[%s7966_s11 + $0x38] sm:$0xff]  ;;  %v5716_v54 = vld [vmem:[%s7966_s11 + $0x40] sm:$0xff] }
  0xf9   :  { %8778 = vst [vmem:[#allocation140_spill] sm:$0xff] %v5706_v14  ;;  %8779 = vst [vmem:[#allocation141_spill] sm:$0xff] %v5711_v31  ;;  %v5721_v15 = vld [vmem:[%s7966_s11 + $0x48] sm:$0xff]  ;;  %v5726_v5 = vld [vmem:[%s7966_s11 + $0x50] sm:$0xff] }
  0xfa   :  { %8780 = vst [vmem:[#allocation142_spill] sm:$0xff] %v5716_v54  ;;  %8781 = vst [vmem:[#allocation143_spill] sm:$0xff] %v5721_v15  ;;  %v5731_v14 = vld [vmem:[%s7966_s11 + $0x58] sm:$0xff]  ;;  %v5736_v31 = vld [vmem:[%s7966_s11 + $0x60] sm:$0xff] }
  0xfb   :  { %8782 = vst [vmem:[#allocation144_spill] sm:$0xff] %v5726_v5  ;;  %8783 = vst [vmem:[#allocation145_spill] sm:$0xff] %v5731_v14  ;;  %v5741_v54 = vld [vmem:[%s7966_s11 + $0x68] sm:$0xff]  ;;  %v5746_v15 = vld [vmem:[%s7966_s11 + $0x70] sm:$0xff] }
  0xfc   :  { %8784 = vst [vmem:[#allocation146_spill] sm:$0xff] %v5736_v31  ;;  %8785 = vst [vmem:[#allocation147_spill] sm:$0xff] %v5741_v54  ;;  %v5751_v5 = vld [vmem:[%s7966_s11 + $0x78] sm:$0xff]  ;;  %v5756_v14 = vld [vmem:[%s7966_s11 + $0x80] sm:$0xff] }
  0xfd   :  { %8786 = vst [vmem:[#allocation148_spill] sm:$0xff] %v5746_v15  ;;  %8787 = vst [vmem:[#allocation149_spill] sm:$0xff] %v5751_v5  ;;  %v5761_v31 = vld [vmem:[%s7966_s11 + $0x88] sm:$0xff]  ;;  %v5766_v54 = vld [vmem:[%s7966_s11 + $0x90] sm:$0xff] }
  0xfe   :  { %8788 = vst [vmem:[#allocation150_spill] sm:$0xff] %v5756_v14  ;;  %8789 = vst [vmem:[#allocation151_spill] sm:$0xff] %v5761_v31  ;;  %v5771_v15 = vld [vmem:[%s7966_s11 + $0x98] sm:$0xff]  ;;  %v5776_v5 = vld [vmem:[%s7966_s11 + $0xa0] sm:$0xff] }
  0xff   :  { %8790 = vst [vmem:[#allocation152_spill] sm:$0xff] %v5766_v54  ;;  %8791 = vst [vmem:[#allocation153_spill] sm:$0xff] %v5771_v15  ;;  %v5781_v14 = vld [vmem:[%s7966_s11 + $0xa8] sm:$0xff]  ;;  %v5786_v31 = vld [vmem:[%s7966_s11 + $0xb0] sm:$0xff] }
 0x100   :  { %8792 = vst [vmem:[#allocation154_spill] sm:$0xff] %v5776_v5  ;;  %8793 = vst [vmem:[#allocation155_spill] sm:$0xff] %v5781_v14  ;;  %v5791_v54 = vld [vmem:[%s7966_s11 + $0xb8] sm:$0xff]  ;;  %v5796_v15 = vld [vmem:[%s7966_s11 + $0xc0] sm:$0xff] }
 0x101   :  { %8794 = vst [vmem:[#allocation156_spill] sm:$0xff] %v5786_v31  ;;  %8795 = vst [vmem:[#allocation157_spill] sm:$0xff] %v5791_v54  ;;  %v5801_v5 = vld [vmem:[%s7966_s11 + $0xc8] sm:$0xff]  ;;  %v5806_v14 = vld [vmem:[%s7966_s11 + $0xd0] sm:$0xff] }
 0x102   :  { %8796 = vst [vmem:[#allocation158_spill] sm:$0xff] %v5796_v15  ;;  %8797 = vst [vmem:[#allocation159_spill] sm:$0xff] %v5801_v5  ;;  %v5811_v31 = vld [vmem:[%s7966_s11 + $0xd8] sm:$0xff]  ;;  %v5816_v54 = vld [vmem:[%s7966_s11 + $0xe0] sm:$0xff] }
 0x103   :  { %8798 = vst [vmem:[#allocation160_spill] sm:$0xff] %v5806_v14  ;;  %8799 = vst [vmem:[#allocation161_spill] sm:$0xff] %v5811_v31  ;;  %v5821_v15 = vld [vmem:[%s7966_s11 + $0xe8] sm:$0xff]  ;;  %v5826_v5 = vld [vmem:[%s7966_s11 + $0xf0] sm:$0xff] }
 0x104   :  { %8800 = vst [vmem:[#allocation162_spill] sm:$0xff] %v5816_v54  ;;  %8801 = vst [vmem:[#allocation163_spill] sm:$0xff] %v5821_v15  ;;  %v5831_v14 = vld [vmem:[%s7966_s11 + $0xf8] sm:$0xff]  ;;  %v5836_v31 = vld [vmem:[%s7966_s11 + $0x100] sm:$0xff] }
 0x105   :  { %8802 = vst [vmem:[#allocation164_spill] sm:$0xff] %v5826_v5  ;;  %8803 = vst [vmem:[#allocation165_spill] sm:$0xff] %v5831_v14  ;;  %v5841_v54 = vld [vmem:[%s7966_s11 + $0x108] sm:$0xff]  ;;  %v5846_v15 = vld [vmem:[%s7966_s11 + $0x110] sm:$0xff] }
 0x106   :  { %8804 = vst [vmem:[#allocation166_spill] sm:$0xff] %v5836_v31  ;;  %8805 = vst [vmem:[#allocation167_spill] sm:$0xff] %v5841_v54  ;;  %v5851_v5 = vld [vmem:[%s7966_s11 + $0x118] sm:$0xff]  ;;  %v5856_v14 = vld [vmem:[%s7966_s11 + $0x120] sm:$0xff] }
 0x107   :  { %8806 = vst [vmem:[#allocation168_spill] sm:$0xff] %v5846_v15  ;;  %8807 = vst [vmem:[#allocation169_spill] sm:$0xff] %v5851_v5  ;;  %v5861_v31 = vld [vmem:[%s7966_s11 + $0x128] sm:$0xff]  ;;  %v5866_v54 = vld [vmem:[%s7966_s11 + $0x130] sm:$0xff] }
 0x108   :  { %8808 = vst [vmem:[#allocation170_spill] sm:$0xff] %v5856_v14  ;;  %8809 = vst [vmem:[#allocation171_spill] sm:$0xff] %v5861_v31  ;;  %v5871_v15 = vld [vmem:[%s7966_s11 + $0x138] sm:$0xff]  ;;  %v5876_v5 = vld [vmem:[%s7966_s11 + $0x140] sm:$0xff] }
 0x109   :  { %8810 = vst [vmem:[#allocation172_spill] sm:$0xff] %v5866_v54  ;;  %8811 = vst [vmem:[#allocation173_spill] sm:$0xff] %v5871_v15  ;;  %v5881_v14 = vld [vmem:[%s7966_s11 + $0x148] sm:$0xff]  ;;  %v5886_v31 = vld [vmem:[%s7966_s11 + $0x150] sm:$0xff] }
 0x10a   :  { %8812 = vst [vmem:[#allocation174_spill] sm:$0xff] %v5876_v5  ;;  %8813 = vst [vmem:[#allocation175_spill] sm:$0xff] %v5881_v14  ;;  %v5891_v54 = vld [vmem:[%s7966_s11 + $0x158] sm:$0xff]  ;;  %v5896_v15 = vld [vmem:[%s7966_s11 + $0x160] sm:$0xff] }
 0x10b   :  { %8814 = vst [vmem:[#allocation176_spill] sm:$0xff] %v5886_v31  ;;  %8815 = vst [vmem:[#allocation177_spill] sm:$0xff] %v5891_v54  ;;  %v5901_v5 = vld [vmem:[%s7966_s11 + $0x168] sm:$0xff]  ;;  %v5906_v14 = vld [vmem:[%s7966_s11 + $0x170] sm:$0xff] }
 0x10c   :  { %8816 = vst [vmem:[#allocation178_spill] sm:$0xff] %v5896_v15  ;;  %8817 = vst [vmem:[#allocation179_spill] sm:$0xff] %v5901_v5  ;;  %v5911_v31 = vld [vmem:[%s7966_s11 + $0x178] sm:$0xff]  ;;  %v5916_v54 = vld [vmem:[%s7966_s11 + $0x180] sm:$0xff] }
 0x10d   :  { %8818 = vst [vmem:[#allocation180_spill] sm:$0xff] %v5906_v14  ;;  %8819 = vst [vmem:[#allocation181_spill] sm:$0xff] %v5911_v31  ;;  %v5921_v15 = vld [vmem:[%s7966_s11 + $0x188] sm:$0xff]  ;;  %v5926_v5 = vld [vmem:[%s7966_s11 + $0x190] sm:$0xff] }
 0x10e   :  { %8820 = vst [vmem:[#allocation182_spill] sm:$0xff] %v5916_v54  ;;  %8821 = vst [vmem:[#allocation183_spill] sm:$0xff] %v5921_v15  ;;  %v5931_v14 = vld [vmem:[%s7966_s11 + $0x198] sm:$0xff]  ;;  %v5936_v31 = vld [vmem:[%s7966_s11 + $0x1a0] sm:$0xff] }
 0x10f   :  { %8822 = vst [vmem:[#allocation184_spill] sm:$0xff] %v5926_v5  ;;  %8823 = vst [vmem:[#allocation185_spill] sm:$0xff] %v5931_v14  ;;  %v5941_v54 = vld [vmem:[%s7966_s11 + $0x1a8] sm:$0xff]  ;;  %v5946_v15 = vld [vmem:[%s7966_s11 + $0x1b0] sm:$0xff] }
 0x110   :  { %8824 = vst [vmem:[#allocation186_spill] sm:$0xff] %v5936_v31  ;;  %8825 = vst [vmem:[#allocation187_spill] sm:$0xff] %v5941_v54  ;;  %v5951_v5 = vld [vmem:[%s7966_s11 + $0x1b8] sm:$0xff]  ;;  %v5956_v14 = vld [vmem:[%s7966_s11 + $0x1c0] sm:$0xff] }
 0x111   :  { %8826 = vst [vmem:[#allocation188_spill] sm:$0xff] %v5946_v15  ;;  %8827 = vst [vmem:[#allocation189_spill] sm:$0xff] %v5951_v5  ;;  %v5961_v31 = vld [vmem:[%s7966_s11 + $0x1c8] sm:$0xff]  ;;  %v5966_v54 = vld [vmem:[%s7966_s11 + $0x1d0] sm:$0xff] }
 0x112   :  { %8828 = vst [vmem:[#allocation190_spill] sm:$0xff] %v5956_v14  ;;  %8829 = vst [vmem:[#allocation191_spill] sm:$0xff] %v5961_v31  ;;  %v5971_v15 = vld [vmem:[%s7966_s11 + $0x1d8] sm:$0xff]  ;;  %v5976_v5 = vld [vmem:[%s7966_s11 + $0x1e0] sm:$0xff] }
 0x113   :  { %8830 = vst [vmem:[#allocation192_spill] sm:$0xff] %v5966_v54  ;;  %8831 = vst [vmem:[#allocation193_spill] sm:$0xff] %v5971_v15  ;;  %v5981_v14 = vld [vmem:[%s7966_s11 + $0x1e8] sm:$0xff]  ;;  %v5986_v31 = vld [vmem:[%s7966_s11 + $0x1f0] sm:$0xff] }
 0x114   :  { %8832 = vst [vmem:[#allocation194_spill] sm:$0xff] %v5976_v5  ;;  %8833 = vst [vmem:[#allocation195_spill] sm:$0xff] %v5981_v14  ;;  %v5991_v54 = vld [vmem:[%s7966_s11 + $0x1f8] sm:$0xff]  ;;  %v5996_v15 = vld [vmem:[%s7966_s11 + $0x200] sm:$0xff] }
 0x115   :  { %8834 = vst [vmem:[#allocation196_spill] sm:$0xff] %v5986_v31  ;;  %8835 = vst [vmem:[#allocation197_spill] sm:$0xff] %v5991_v54  ;;  %v6001_v5 = vld [vmem:[%s7966_s11 + $0x208] sm:$0xff]  ;;  %v6006_v14 = vld [vmem:[%s7966_s11 + $0x210] sm:$0xff] }
 0x116   :  { %8836 = vst [vmem:[#allocation198_spill] sm:$0xff] %v5996_v15  ;;  %8837 = vst [vmem:[#allocation199_spill] sm:$0xff] %v6001_v5  ;;  %v6011_v31 = vld [vmem:[%s7966_s11 + $0x218] sm:$0xff]  ;;  %v6016_v54 = vld [vmem:[%s7966_s11 + $0x220] sm:$0xff] }
 0x117   :  { %8838 = vst [vmem:[#allocation200_spill] sm:$0xff] %v6006_v14  ;;  %8839 = vst [vmem:[#allocation201_spill] sm:$0xff] %v6011_v31  ;;  %v6021_v15 = vld [vmem:[%s7966_s11 + $0x228] sm:$0xff]  ;;  %v6026_v5 = vld [vmem:[%s7966_s11 + $0x230] sm:$0xff] }
 0x118   :  { %8840 = vst [vmem:[#allocation202_spill] sm:$0xff] %v6016_v54  ;;  %8841 = vst [vmem:[#allocation203_spill] sm:$0xff] %v6021_v15  ;;  %v6031_v14 = vld [vmem:[%s7966_s11 + $0x238] sm:$0xff]  ;;  %v6036_v31 = vld [vmem:[%s7966_s11 + $0x240] sm:$0xff] }
 0x119   :  { %8842 = vst [vmem:[#allocation204_spill] sm:$0xff] %v6026_v5  ;;  %8843 = vst [vmem:[#allocation205_spill] sm:$0xff] %v6031_v14  ;;  %v6041_v54 = vld [vmem:[%s7966_s11 + $0x248] sm:$0xff]  ;;  %v6046_v15 = vld [vmem:[%s7966_s11 + $0x250] sm:$0xff] }
 0x11a   :  { %8844 = vst [vmem:[#allocation206_spill] sm:$0xff] %v6036_v31  ;;  %8845 = vst [vmem:[#allocation207_spill] sm:$0xff] %v6041_v54  ;;  %v6051_v5 = vld [vmem:[%s7966_s11 + $0x258] sm:$0xff]  ;;  %v6056_v14 = vld [vmem:[%s7966_s11 + $0x260] sm:$0xff] }
 0x11b   :  { %8846 = vst [vmem:[#allocation208_spill] sm:$0xff] %v6046_v15  ;;  %8847 = vst [vmem:[#allocation209_spill] sm:$0xff] %v6051_v5  ;;  %v6061_v31 = vld [vmem:[%s7966_s11 + $0x268] sm:$0xff]  ;;  %v6066_v54 = vld [vmem:[%s7966_s11 + $0x270] sm:$0xff] }
 0x11c   :  { %8848 = vst [vmem:[#allocation210_spill] sm:$0xff] %v6056_v14  ;;  %8849 = vst [vmem:[#allocation211_spill] sm:$0xff] %v6061_v31  ;;  %v6071_v15 = vld [vmem:[%s7966_s11 + $0x278] sm:$0xff]  ;;  %v6076_v5 = vld [vmem:[%s7966_s11 + $0x280] sm:$0xff] }
 0x11d   :  { %8850 = vst [vmem:[#allocation212_spill] sm:$0xff] %v6066_v54  ;;  %8851 = vst [vmem:[#allocation213_spill] sm:$0xff] %v6071_v15  ;;  %v6081_v14 = vld [vmem:[%s7966_s11 + $0x288] sm:$0xff]  ;;  %v6086_v31 = vld [vmem:[%s7966_s11 + $0x290] sm:$0xff] }
 0x11e   :  { %8852 = vst [vmem:[#allocation214_spill] sm:$0xff] %v6076_v5  ;;  %8853 = vst [vmem:[#allocation215_spill] sm:$0xff] %v6081_v14  ;;  %v6091_v54 = vld [vmem:[%s7966_s11 + $0x298] sm:$0xff]  ;;  %v6096_v15 = vld [vmem:[%s7966_s11 + $0x2a0] sm:$0xff] }
 0x11f   :  { %8854 = vst [vmem:[#allocation216_spill] sm:$0xff] %v6086_v31  ;;  %8855 = vst [vmem:[#allocation217_spill] sm:$0xff] %v6091_v54  ;;  %v6101_v5 = vld [vmem:[%s7966_s11 + $0x2a8] sm:$0xff]  ;;  %v6106_v14 = vld [vmem:[%s7966_s11 + $0x2b0] sm:$0xff] }
 0x120   :  { %8856 = vst [vmem:[#allocation218_spill] sm:$0xff] %v6096_v15  ;;  %8857 = vst [vmem:[#allocation219_spill] sm:$0xff] %v6101_v5  ;;  %v6111_v31 = vld [vmem:[%s7966_s11 + $0x2b8] sm:$0xff]  ;;  %v6116_v54 = vld [vmem:[%s7966_s11 + $0x2c0] sm:$0xff] }
 0x121   :  { %8858 = vst [vmem:[#allocation220_spill] sm:$0xff] %v6106_v14  ;;  %8859 = vst [vmem:[#allocation221_spill] sm:$0xff] %v6111_v31  ;;  %v6121_v15 = vld [vmem:[%s7966_s11 + $0x2c8] sm:$0xff]  ;;  %v6126_v5 = vld [vmem:[%s7966_s11 + $0x2d0] sm:$0xff] }
 0x122   :  { %8860 = vst [vmem:[#allocation222_spill] sm:$0xff] %v6116_v54  ;;  %8861 = vst [vmem:[#allocation223_spill] sm:$0xff] %v6121_v15  ;;  %v6131_v14 = vld [vmem:[%s7966_s11 + $0x2d8] sm:$0xff]  ;;  %v6136_v31 = vld [vmem:[%s7966_s11 + $0x2e0] sm:$0xff] }
 0x123   :  { %8862 = vst [vmem:[#allocation224_spill] sm:$0xff] %v6126_v5  ;;  %8863 = vst [vmem:[#allocation225_spill] sm:$0xff] %v6131_v14  ;;  %v6141_v54 = vld [vmem:[%s7966_s11 + $0x2e8] sm:$0xff]  ;;  %v6146_v15 = vld [vmem:[%s7966_s11 + $0x2f0] sm:$0xff] }
 0x124   :  { %8864 = vst [vmem:[#allocation226_spill] sm:$0xff] %v6136_v31  ;;  %8865 = vst [vmem:[#allocation227_spill] sm:$0xff] %v6141_v54  ;;  %v6151_v5 = vld [vmem:[%s7966_s11 + $0x2f8] sm:$0xff]  ;;  %v6156_v14 = vld [vmem:[%s7966_s11 + $0x300] sm:$0xff] }
 0x125   :  { %8866 = vst [vmem:[#allocation228_spill] sm:$0xff] %v6146_v15  ;;  %8867 = vst [vmem:[#allocation229_spill] sm:$0xff] %v6151_v5  ;;  %v6161_v31 = vld [vmem:[%s7966_s11 + $0x308] sm:$0xff]  ;;  %v6166_v54 = vld [vmem:[%s7966_s11 + $0x310] sm:$0xff] }
 0x126   :  { %8868 = vst [vmem:[#allocation230_spill] sm:$0xff] %v6156_v14  ;;  %8869 = vst [vmem:[#allocation231_spill] sm:$0xff] %v6161_v31  ;;  %v6171_v15 = vld [vmem:[%s7966_s11 + $0x318] sm:$0xff]  ;;  %v6176_v5 = vld [vmem:[%s7966_s11 + $0x320] sm:$0xff] }
 0x127   :  { %8870 = vst [vmem:[#allocation232_spill] sm:$0xff] %v6166_v54  ;;  %8871 = vst [vmem:[#allocation233_spill] sm:$0xff] %v6171_v15  ;;  %v6181_v14 = vld [vmem:[%s7966_s11 + $0x328] sm:$0xff]  ;;  %v6186_v31 = vld [vmem:[%s7966_s11 + $0x330] sm:$0xff] }
 0x128   :  { %8872 = vst [vmem:[#allocation234_spill] sm:$0xff] %v6176_v5  ;;  %8873 = vst [vmem:[#allocation235_spill] sm:$0xff] %v6181_v14  ;;  %v6191_v54 = vld [vmem:[%s7966_s11 + $0x338] sm:$0xff]  ;;  %v6196_v15 = vld [vmem:[%s7966_s11 + $0x340] sm:$0xff] }
 0x129   :  { %8874 = vst [vmem:[#allocation236_spill] sm:$0xff] %v6186_v31  ;;  %8875 = vst [vmem:[#allocation237_spill] sm:$0xff] %v6191_v54  ;;  %v6201_v5 = vld [vmem:[%s7966_s11 + $0x348] sm:$0xff]  ;;  %v6206_v14 = vld [vmem:[%s7966_s11 + $0x350] sm:$0xff] }
 0x12a   :  { %8876 = vst [vmem:[#allocation238_spill] sm:$0xff] %v6196_v15  ;;  %8877 = vst [vmem:[#allocation239_spill] sm:$0xff] %v6201_v5  ;;  %v6211_v31 = vld [vmem:[%s7966_s11 + $0x358] sm:$0xff]  ;;  %v6216_v54 = vld [vmem:[%s7966_s11 + $0x360] sm:$0xff] }
 0x12b   :  { %8878 = vst [vmem:[#allocation240_spill] sm:$0xff] %v6206_v14  ;;  %8879 = vst [vmem:[#allocation241_spill] sm:$0xff] %v6211_v31  ;;  %v6221_v15 = vld [vmem:[%s7966_s11 + $0x368] sm:$0xff]  ;;  %v6226_v5 = vld [vmem:[%s7966_s11 + $0x370] sm:$0xff] }
 0x12c   :  { %8880 = vst [vmem:[#allocation242_spill] sm:$0xff] %v6216_v54  ;;  %8881 = vst [vmem:[#allocation243_spill] sm:$0xff] %v6221_v15  ;;  %v6231_v14 = vld [vmem:[%s7966_s11 + $0x378] sm:$0xff]  ;;  %v6236_v31 = vld [vmem:[%s7966_s11 + $0x380] sm:$0xff] }
 0x12d   :  { %8882 = vst [vmem:[#allocation244_spill] sm:$0xff] %v6226_v5  ;;  %8883 = vst [vmem:[#allocation245_spill] sm:$0xff] %v6231_v14  ;;  %v6241_v54 = vld [vmem:[%s7966_s11 + $0x388] sm:$0xff]  ;;  %v6246_v15 = vld [vmem:[%s7966_s11 + $0x390] sm:$0xff] }
 0x12e   :  { %8884 = vst [vmem:[#allocation246_spill] sm:$0xff] %v6236_v31  ;;  %8885 = vst [vmem:[#allocation247_spill] sm:$0xff] %v6241_v54  ;;  %v6251_v5 = vld [vmem:[%s7966_s11 + $0x398] sm:$0xff]  ;;  %v6256_v14 = vld [vmem:[%s7966_s11 + $0x3a0] sm:$0xff] }
 0x12f   :  { %8886 = vst [vmem:[#allocation248_spill] sm:$0xff] %v6246_v15  ;;  %8887 = vst [vmem:[#allocation249_spill] sm:$0xff] %v6251_v5  ;;  %v6261_v31 = vld [vmem:[%s7966_s11 + $0x3a8] sm:$0xff]  ;;  %v6266_v54 = vld [vmem:[%s7966_s11 + $0x3b0] sm:$0xff] }
 0x130   :  { %8888 = vst [vmem:[#allocation250_spill] sm:$0xff] %v6256_v14  ;;  %8889 = vst [vmem:[#allocation251_spill] sm:$0xff] %v6261_v31  ;;  %v6271_v15 = vld [vmem:[%s7966_s11 + $0x3b8] sm:$0xff]  ;;  %v6276_v5 = vld [vmem:[%s7966_s11 + $0x3c0] sm:$0xff] }
 0x131   :  { %8890 = vst [vmem:[#allocation252_spill] sm:$0xff] %v6266_v54  ;;  %8891 = vst [vmem:[#allocation253_spill] sm:$0xff] %v6271_v15  ;;  %v6281_v14 = vld [vmem:[%s7966_s11 + $0x3c8] sm:$0xff]  ;;  %v6286_v31 = vld [vmem:[%s7966_s11 + $0x3d0] sm:$0xff] }
 0x132   :  { %8892 = vst [vmem:[#allocation254_spill] sm:$0xff] %v6276_v5  ;;  %8893 = vst [vmem:[#allocation255_spill] sm:$0xff] %v6281_v14  ;;  %v6291_v54 = vld [vmem:[%s7966_s11 + $0x3d8] sm:$0xff]  ;;  %v6296_v15 = vld [vmem:[%s7966_s11 + $0x3e0] sm:$0xff] }
 0x133   :  { %8894 = vst [vmem:[#allocation256_spill] sm:$0xff] %v6286_v31  ;;  %8895 = vst [vmem:[#allocation257_spill] sm:$0xff] %v6291_v54  ;;  %v6301_v5 = vld [vmem:[%s7966_s11 + $0x3e8] sm:$0xff]  ;;  %v6306_v14 = vld [vmem:[%s7966_s11 + $0x3f0] sm:$0xff] }
 0x134   :  { %8896 = vst [vmem:[#allocation258_spill] sm:$0xff] %v6296_v15  ;;  %8897 = vst [vmem:[#allocation259_spill] sm:$0xff] %v6301_v5  ;;  %v6311_v31 = vld [vmem:[%s7966_s11 + $0x3f8] sm:$0xff]  ;;  %v6316_v54 = vld [vmem:[%s7966_s11 + $0x400] sm:$0xff] }
 0x135   :  { %8898 = vst [vmem:[#allocation260_spill] sm:$0xff] %v6306_v14  ;;  %8899 = vst [vmem:[#allocation261_spill] sm:$0xff] %v6311_v31  ;;  %v6321_v15 = vld [vmem:[%s7966_s11 + $0x408] sm:$0xff]  ;;  %v6326_v5 = vld [vmem:[%s7966_s11 + $0x410] sm:$0xff] }
 0x136   :  { %8900 = vst [vmem:[#allocation262_spill] sm:$0xff] %v6316_v54  ;;  %8901 = vst [vmem:[#allocation263_spill] sm:$0xff] %v6321_v15  ;;  %v6331_v14 = vld [vmem:[%s7966_s11 + $0x418] sm:$0xff]  ;;  %v6336_v31 = vld [vmem:[%s7966_s11 + $0x420] sm:$0xff] }
 0x137   :  { %8902 = vst [vmem:[#allocation264_spill] sm:$0xff] %v6326_v5  ;;  %8903 = vst [vmem:[#allocation265_spill] sm:$0xff] %v6331_v14  ;;  %v6341_v54 = vld [vmem:[%s7966_s11 + $0x428] sm:$0xff]  ;;  %v6346_v15 = vld [vmem:[%s7966_s11 + $0x430] sm:$0xff] }
 0x138   :  { %8904 = vst [vmem:[#allocation266_spill] sm:$0xff] %v6336_v31  ;;  %8905 = vst [vmem:[#allocation267_spill] sm:$0xff] %v6341_v54  ;;  %v6351_v5 = vld [vmem:[%s7966_s11 + $0x438] sm:$0xff]  ;;  %v6356_v14 = vld [vmem:[%s7966_s11 + $0x440] sm:$0xff] }
 0x139   :  { %8906 = vst [vmem:[#allocation268_spill] sm:$0xff] %v6346_v15  ;;  %8907 = vst [vmem:[#allocation269_spill] sm:$0xff] %v6351_v5  ;;  %v6361_v31 = vld [vmem:[%s7966_s11 + $0x448] sm:$0xff]  ;;  %v6366_v54 = vld [vmem:[%s7966_s11 + $0x450] sm:$0xff] }
 0x13a   :  { %8908 = vst [vmem:[#allocation270_spill] sm:$0xff] %v6356_v14  ;;  %8909 = vst [vmem:[#allocation271_spill] sm:$0xff] %v6361_v31  ;;  %v6371_v15 = vld [vmem:[%s7966_s11 + $0x458] sm:$0xff]  ;;  %v6376_v5 = vld [vmem:[%s7966_s11 + $0x460] sm:$0xff] }
 0x13b   :  { %8910 = vst [vmem:[#allocation272_spill] sm:$0xff] %v6366_v54  ;;  %8911 = vst [vmem:[#allocation273_spill] sm:$0xff] %v6371_v15  ;;  %v6381_v14 = vld [vmem:[%s7966_s11 + $0x468] sm:$0xff]  ;;  %v6386_v31 = vld [vmem:[%s7966_s11 + $0x470] sm:$0xff] }
 0x13c   :  { %8912 = vst [vmem:[#allocation274_spill] sm:$0xff] %v6376_v5  ;;  %8913 = vst [vmem:[#allocation275_spill] sm:$0xff] %v6381_v14  ;;  %v6391_v54 = vld [vmem:[%s7966_s11 + $0x478] sm:$0xff]  ;;  %v6396_v15 = vld [vmem:[%s7966_s11 + $0x480] sm:$0xff] }
 0x13d   :  { %8914 = vst [vmem:[#allocation276_spill] sm:$0xff] %v6386_v31  ;;  %8915 = vst [vmem:[#allocation277_spill] sm:$0xff] %v6391_v54  ;;  %v6401_v5 = vld [vmem:[%s7966_s11 + $0x488] sm:$0xff]  ;;  %v6406_v14 = vld [vmem:[%s7966_s11 + $0x490] sm:$0xff] }
 0x13e   :  { %8916 = vst [vmem:[#allocation278_spill] sm:$0xff] %v6396_v15  ;;  %8917 = vst [vmem:[#allocation279_spill] sm:$0xff] %v6401_v5  ;;  %v6411_v31 = vld [vmem:[%s7966_s11 + $0x498] sm:$0xff]  ;;  %v6416_v54 = vld [vmem:[%s7966_s11 + $0x4a0] sm:$0xff] }
 0x13f   :  { %8918 = vst [vmem:[#allocation280_spill] sm:$0xff] %v6406_v14  ;;  %8919 = vst [vmem:[#allocation281_spill] sm:$0xff] %v6411_v31  ;;  %v6421_v15 = vld [vmem:[%s7966_s11 + $0x4a8] sm:$0xff]  ;;  %v6426_v5 = vld [vmem:[%s7966_s11 + $0x4b0] sm:$0xff] }
 0x140   :  { %8920 = vst [vmem:[#allocation282_spill] sm:$0xff] %v6416_v54  ;;  %8921 = vst [vmem:[#allocation283_spill] sm:$0xff] %v6421_v15  ;;  %v6431_v14 = vld [vmem:[%s7966_s11 + $0x4b8] sm:$0xff]  ;;  %v6436_v31 = vld [vmem:[%s7966_s11 + $0x4c0] sm:$0xff] }
 0x141   :  { %8922 = vst [vmem:[#allocation284_spill] sm:$0xff] %v6426_v5  ;;  %8923 = vst [vmem:[#allocation285_spill] sm:$0xff] %v6431_v14  ;;  %v6441_v54 = vld [vmem:[%s7966_s11 + $0x4c8] sm:$0xff]  ;;  %v6446_v15 = vld [vmem:[%s7966_s11 + $0x4d0] sm:$0xff] }
 0x142   :  { %8924 = vst [vmem:[#allocation286_spill] sm:$0xff] %v6436_v31  ;;  %8925 = vst [vmem:[#allocation287_spill] sm:$0xff] %v6441_v54  ;;  %v6451_v5 = vld [vmem:[%s7966_s11 + $0x4d8] sm:$0xff]  ;;  %v6456_v14 = vld [vmem:[%s7966_s11 + $0x4e0] sm:$0xff] }
 0x143   :  { %8926 = vst [vmem:[#allocation288_spill] sm:$0xff] %v6446_v15  ;;  %8927 = vst [vmem:[#allocation289_spill] sm:$0xff] %v6451_v5  ;;  %v6461_v31 = vld [vmem:[%s7966_s11 + $0x4e8] sm:$0xff]  ;;  %v6466_v54 = vld [vmem:[%s7966_s11 + $0x4f0] sm:$0xff] }
 0x144   :  { %8928 = vst [vmem:[#allocation290_spill] sm:$0xff] %v6456_v14  ;;  %8929 = vst [vmem:[#allocation291_spill] sm:$0xff] %v6461_v31  ;;  %v6471_v15 = vld [vmem:[%s7966_s11 + $0x4f8] sm:$0xff]  ;;  %v6476_v5 = vld [vmem:[%s7966_s11 + $0x500] sm:$0xff] }
 0x145   :  { %8930 = vst [vmem:[#allocation292_spill] sm:$0xff] %v6466_v54  ;;  %8931 = vst [vmem:[#allocation293_spill] sm:$0xff] %v6471_v15  ;;  %v6481_v14 = vld [vmem:[%s7966_s11 + $0x508] sm:$0xff]  ;;  %v6486_v31 = vld [vmem:[%s7966_s11 + $0x510] sm:$0xff] }
 0x146   :  { %8932 = vst [vmem:[#allocation294_spill] sm:$0xff] %v6476_v5  ;;  %8933 = vst [vmem:[#allocation295_spill] sm:$0xff] %v6481_v14  ;;  %v6491_v54 = vld [vmem:[%s7966_s11 + $0x518] sm:$0xff]  ;;  %v6496_v15 = vld [vmem:[%s7966_s11 + $0x520] sm:$0xff] }
 0x147   :  { %8934 = vst [vmem:[#allocation296_spill] sm:$0xff] %v6486_v31  ;;  %8935 = vst [vmem:[#allocation297_spill] sm:$0xff] %v6491_v54  ;;  %v6501_v5 = vld [vmem:[%s7966_s11 + $0x528] sm:$0xff]  ;;  %v6506_v14 = vld [vmem:[%s7966_s11 + $0x530] sm:$0xff] }
 0x148   :  { %8936 = vst [vmem:[#allocation298_spill] sm:$0xff] %v6496_v15  ;;  %8937 = vst [vmem:[#allocation299_spill] sm:$0xff] %v6501_v5  ;;  %v6511_v31 = vld [vmem:[%s7966_s11 + $0x538] sm:$0xff]  ;;  %v6516_v54 = vld [vmem:[%s7966_s11 + $0x540] sm:$0xff] }
 0x149   :  { %8938 = vst [vmem:[#allocation300_spill] sm:$0xff] %v6506_v14  ;;  %8939 = vst [vmem:[#allocation301_spill] sm:$0xff] %v6511_v31  ;;  %v6521_v15 = vld [vmem:[%s7966_s11 + $0x548] sm:$0xff]  ;;  %v6526_v5 = vld [vmem:[%s7966_s11 + $0x550] sm:$0xff] }
 0x14a   :  { %8940 = vst [vmem:[#allocation302_spill] sm:$0xff] %v6516_v54  ;;  %8941 = vst [vmem:[#allocation303_spill] sm:$0xff] %v6521_v15  ;;  %v6531_v14 = vld [vmem:[%s7966_s11 + $0x558] sm:$0xff]  ;;  %v6536_v31 = vld [vmem:[%s7966_s11 + $0x560] sm:$0xff] }
 0x14b   :  { %8942 = vst [vmem:[#allocation304_spill] sm:$0xff] %v6526_v5  ;;  %8943 = vst [vmem:[#allocation305_spill] sm:$0xff] %v6531_v14  ;;  %v6541_v54 = vld [vmem:[%s7966_s11 + $0x568] sm:$0xff]  ;;  %v6546_v15 = vld [vmem:[%s7966_s11 + $0x570] sm:$0xff] }
 0x14c   :  { %8944 = vst [vmem:[#allocation306_spill] sm:$0xff] %v6536_v31  ;;  %8945 = vst [vmem:[#allocation307_spill] sm:$0xff] %v6541_v54  ;;  %v6551_v5 = vld [vmem:[%s7966_s11 + $0x578] sm:$0xff]  ;;  %v6556_v14 = vld [vmem:[%s7966_s11 + $0x580] sm:$0xff] }
 0x14d   :  { %8946 = vst [vmem:[#allocation308_spill] sm:$0xff] %v6546_v15  ;;  %8947 = vst [vmem:[#allocation309_spill] sm:$0xff] %v6551_v5  ;;  %v6561_v31 = vld [vmem:[%s7966_s11 + $0x588] sm:$0xff]  ;;  %v6566_v54 = vld [vmem:[%s7966_s11 + $0x590] sm:$0xff] }
 0x14e   :  { %8948 = vst [vmem:[#allocation310_spill] sm:$0xff] %v6556_v14  ;;  %8949 = vst [vmem:[#allocation311_spill] sm:$0xff] %v6561_v31  ;;  %v6571_v15 = vld [vmem:[%s7966_s11 + $0x598] sm:$0xff]  ;;  %v6576_v5 = vld [vmem:[%s7966_s11 + $0x5a0] sm:$0xff] }
 0x14f   :  { %8950 = vst [vmem:[#allocation312_spill] sm:$0xff] %v6566_v54  ;;  %8951 = vst [vmem:[#allocation313_spill] sm:$0xff] %v6571_v15  ;;  %v6581_v14 = vld [vmem:[%s7966_s11 + $0x5a8] sm:$0xff]  ;;  %v6586_v31 = vld [vmem:[%s7966_s11 + $0x5b0] sm:$0xff] }
 0x150   :  { %8952 = vst [vmem:[#allocation314_spill] sm:$0xff] %v6576_v5  ;;  %8953 = vst [vmem:[#allocation315_spill] sm:$0xff] %v6581_v14  ;;  %v6591_v54 = vld [vmem:[%s7966_s11 + $0x5b8] sm:$0xff]  ;;  %v6596_v15 = vld [vmem:[%s7966_s11 + $0x5c0] sm:$0xff] }
 0x151   :  { %8954 = vst [vmem:[#allocation316_spill] sm:$0xff] %v6586_v31  ;;  %8955 = vst [vmem:[#allocation317_spill] sm:$0xff] %v6591_v54  ;;  %v6601_v5 = vld [vmem:[%s7966_s11 + $0x5c8] sm:$0xff]  ;;  %v6606_v14 = vld [vmem:[%s7966_s11 + $0x5d0] sm:$0xff] }
 0x152   :  { %8956 = vst [vmem:[#allocation318_spill] sm:$0xff] %v6596_v15  ;;  %8957 = vst [vmem:[#allocation319_spill] sm:$0xff] %v6601_v5  ;;  %v6611_v31 = vld [vmem:[%s7966_s11 + $0x5d8] sm:$0xff]  ;;  %v6616_v54 = vld [vmem:[%s7966_s11 + $0x5e0] sm:$0xff] }
 0x153   :  { %8958 = vst [vmem:[#allocation320_spill] sm:$0xff] %v6606_v14  ;;  %8959 = vst [vmem:[#allocation321_spill] sm:$0xff] %v6611_v31  ;;  %v6621_v15 = vld [vmem:[%s7966_s11 + $0x5e8] sm:$0xff]  ;;  %v6626_v5 = vld [vmem:[%s7966_s11 + $0x5f0] sm:$0xff] }
 0x154   :  { %8960 = vst [vmem:[#allocation322_spill] sm:$0xff] %v6616_v54  ;;  %8961 = vst [vmem:[#allocation323_spill] sm:$0xff] %v6621_v15  ;;  %v6631_v14 = vld [vmem:[%s7966_s11 + $0x5f8] sm:$0xff]  ;;  %v6636_v31 = vld [vmem:[%s7966_s11 + $0x600] sm:$0xff] }
 0x155   :  { %8962 = vst [vmem:[#allocation324_spill] sm:$0xff] %v6626_v5  ;;  %8963 = vst [vmem:[#allocation325_spill] sm:$0xff] %v6631_v14  ;;  %v6641_v54 = vld [vmem:[%s7966_s11 + $0x608] sm:$0xff]  ;;  %v6646_v15 = vld [vmem:[%s7966_s11 + $0x610] sm:$0xff] }
 0x156   :  { %8964 = vst [vmem:[#allocation326_spill] sm:$0xff] %v6636_v31  ;;  %8965 = vst [vmem:[#allocation327_spill] sm:$0xff] %v6641_v54  ;;  %v6651_v5 = vld [vmem:[%s7966_s11 + $0x618] sm:$0xff]  ;;  %v6656_v14 = vld [vmem:[%s7966_s11 + $0x620] sm:$0xff] }
 0x157   :  { %8966 = vst [vmem:[#allocation328_spill] sm:$0xff] %v6646_v15  ;;  %8967 = vst [vmem:[#allocation329_spill] sm:$0xff] %v6651_v5  ;;  %v6661_v31 = vld [vmem:[%s7966_s11 + $0x628] sm:$0xff]  ;;  %v6666_v54 = vld [vmem:[%s7966_s11 + $0x630] sm:$0xff] }
 0x158   :  { %8968 = vst [vmem:[#allocation330_spill] sm:$0xff] %v6656_v14  ;;  %8969 = vst [vmem:[#allocation331_spill] sm:$0xff] %v6661_v31  ;;  %v6671_v15 = vld [vmem:[%s7966_s11 + $0x638] sm:$0xff]  ;;  %v6676_v5 = vld [vmem:[%s7966_s11 + $0x640] sm:$0xff] }
 0x159   :  { %8970 = vst [vmem:[#allocation332_spill] sm:$0xff] %v6666_v54  ;;  %8971 = vst [vmem:[#allocation333_spill] sm:$0xff] %v6671_v15  ;;  %v6681_v14 = vld [vmem:[%s7966_s11 + $0x648] sm:$0xff]  ;;  %v6686_v31 = vld [vmem:[%s7966_s11 + $0x650] sm:$0xff] }
 0x15a   :  { %8972 = vst [vmem:[#allocation334_spill] sm:$0xff] %v6676_v5  ;;  %8973 = vst [vmem:[#allocation335_spill] sm:$0xff] %v6681_v14  ;;  %v6691_v54 = vld [vmem:[%s7966_s11 + $0x658] sm:$0xff]  ;;  %v6696_v15 = vld [vmem:[%s7966_s11 + $0x660] sm:$0xff] }
 0x15b   :  { %8974 = vst [vmem:[#allocation336_spill] sm:$0xff] %v6686_v31  ;;  %8975 = vst [vmem:[#allocation337_spill] sm:$0xff] %v6691_v54  ;;  %v6701_v5 = vld [vmem:[%s7966_s11 + $0x668] sm:$0xff]  ;;  %v6706_v14 = vld [vmem:[%s7966_s11 + $0x670] sm:$0xff] }
 0x15c   :  { %8976 = vst [vmem:[#allocation338_spill] sm:$0xff] %v6696_v15  ;;  %8977 = vst [vmem:[#allocation339_spill] sm:$0xff] %v6701_v5  ;;  %v6711_v31 = vld [vmem:[%s7966_s11 + $0x678] sm:$0xff]  ;;  %v6716_v54 = vld [vmem:[%s7966_s11 + $0x680] sm:$0xff] }
 0x15d   :  { %8978 = vst [vmem:[#allocation340_spill] sm:$0xff] %v6706_v14  ;;  %8979 = vst [vmem:[#allocation341_spill] sm:$0xff] %v6711_v31  ;;  %v6721_v15 = vld [vmem:[%s7966_s11 + $0x688] sm:$0xff]  ;;  %v6726_v5 = vld [vmem:[%s7966_s11 + $0x690] sm:$0xff] }
 0x15e   :  { %8980 = vst [vmem:[#allocation342_spill] sm:$0xff] %v6716_v54  ;;  %8981 = vst [vmem:[#allocation343_spill] sm:$0xff] %v6721_v15  ;;  %v6731_v14 = vld [vmem:[%s7966_s11 + $0x698] sm:$0xff]  ;;  %v6736_v31 = vld [vmem:[%s7966_s11 + $0x6a0] sm:$0xff] }
 0x15f   :  { %8982 = vst [vmem:[#allocation344_spill] sm:$0xff] %v6726_v5  ;;  %8983 = vst [vmem:[#allocation345_spill] sm:$0xff] %v6731_v14  ;;  %v6741_v54 = vld [vmem:[%s7966_s11 + $0x6a8] sm:$0xff]  ;;  %v6746_v15 = vld [vmem:[%s7966_s11 + $0x6b0] sm:$0xff] }
 0x160   :  { %8984 = vst [vmem:[#allocation346_spill] sm:$0xff] %v6736_v31  ;;  %8985 = vst [vmem:[#allocation347_spill] sm:$0xff] %v6741_v54  ;;  %v6751_v5 = vld [vmem:[%s7966_s11 + $0x6b8] sm:$0xff]  ;;  %v6756_v14 = vld [vmem:[%s7966_s11 + $0x6c0] sm:$0xff] }
 0x161   :  { %8986 = vst [vmem:[#allocation348_spill] sm:$0xff] %v6746_v15  ;;  %8987 = vst [vmem:[#allocation349_spill] sm:$0xff] %v6751_v5  ;;  %v6761_v31 = vld [vmem:[%s7966_s11 + $0x6c8] sm:$0xff]  ;;  %v6766_v54 = vld [vmem:[%s7966_s11 + $0x6d0] sm:$0xff] }
 0x162   :  { %8988 = vst [vmem:[#allocation350_spill] sm:$0xff] %v6756_v14  ;;  %8989 = vst [vmem:[#allocation351_spill] sm:$0xff] %v6761_v31  ;;  %v6771_v15 = vld [vmem:[%s7966_s11 + $0x6d8] sm:$0xff]  ;;  %v6776_v5 = vld [vmem:[%s7966_s11 + $0x6e0] sm:$0xff] }
 0x163   :  { %8990 = vst [vmem:[#allocation352_spill] sm:$0xff] %v6766_v54  ;;  %8991 = vst [vmem:[#allocation353_spill] sm:$0xff] %v6771_v15  ;;  %v6781_v14 = vld [vmem:[%s7966_s11 + $0x6e8] sm:$0xff]  ;;  %v6786_v31 = vld [vmem:[%s7966_s11 + $0x6f0] sm:$0xff] }
 0x164   :  { %8992 = vst [vmem:[#allocation354_spill] sm:$0xff] %v6776_v5  ;;  %8993 = vst [vmem:[#allocation355_spill] sm:$0xff] %v6781_v14  ;;  %v6791_v54 = vld [vmem:[%s7966_s11 + $0x6f8] sm:$0xff]  ;;  %v6796_v15 = vld [vmem:[%s7966_s11 + $0x700] sm:$0xff] }
 0x165   :  { %8994 = vst [vmem:[#allocation356_spill] sm:$0xff] %v6786_v31  ;;  %8995 = vst [vmem:[#allocation357_spill] sm:$0xff] %v6791_v54  ;;  %v6801_v5 = vld [vmem:[%s7966_s11 + $0x708] sm:$0xff]  ;;  %v6806_v14 = vld [vmem:[%s7966_s11 + $0x710] sm:$0xff] }
 0x166   :  { %8996 = vst [vmem:[#allocation358_spill] sm:$0xff] %v6796_v15  ;;  %8997 = vst [vmem:[#allocation359_spill] sm:$0xff] %v6801_v5  ;;  %v6811_v31 = vld [vmem:[%s7966_s11 + $0x718] sm:$0xff]  ;;  %v6816_v54 = vld [vmem:[%s7966_s11 + $0x720] sm:$0xff] }
 0x167   :  { %8998 = vst [vmem:[#allocation360_spill] sm:$0xff] %v6806_v14  ;;  %8999 = vst [vmem:[#allocation361_spill] sm:$0xff] %v6811_v31  ;;  %v6821_v15 = vld [vmem:[%s7966_s11 + $0x728] sm:$0xff]  ;;  %v6826_v5 = vld [vmem:[%s7966_s11 + $0x730] sm:$0xff] }
 0x168   :  { %9000 = vst [vmem:[#allocation362_spill] sm:$0xff] %v6816_v54  ;;  %9001 = vst [vmem:[#allocation363_spill] sm:$0xff] %v6821_v15  ;;  %v6831_v14 = vld [vmem:[%s7966_s11 + $0x738] sm:$0xff]  ;;  %v6836_v31 = vld [vmem:[%s7966_s11 + $0x740] sm:$0xff] }
 0x169   :  { %9002 = vst [vmem:[#allocation364_spill] sm:$0xff] %v6826_v5  ;;  %9003 = vst [vmem:[#allocation365_spill] sm:$0xff] %v6831_v14  ;;  %v6841_v54 = vld [vmem:[%s7966_s11 + $0x748] sm:$0xff]  ;;  %v6846_v15 = vld [vmem:[%s7966_s11 + $0x750] sm:$0xff] }
 0x16a   :  { %9004 = vst [vmem:[#allocation366_spill] sm:$0xff] %v6836_v31  ;;  %9005 = vst [vmem:[#allocation367_spill] sm:$0xff] %v6841_v54  ;;  %v6851_v5 = vld [vmem:[%s7966_s11 + $0x758] sm:$0xff]  ;;  %v6856_v14 = vld [vmem:[%s7966_s11 + $0x760] sm:$0xff] }
 0x16b   :  { %9006 = vst [vmem:[#allocation368_spill] sm:$0xff] %v6846_v15  ;;  %9007 = vst [vmem:[#allocation369_spill] sm:$0xff] %v6851_v5  ;;  %v6861_v31 = vld [vmem:[%s7966_s11 + $0x768] sm:$0xff]  ;;  %v6866_v54 = vld [vmem:[%s7966_s11 + $0x770] sm:$0xff] }
 0x16c   :  { %9008 = vst [vmem:[#allocation370_spill] sm:$0xff] %v6856_v14  ;;  %9009 = vst [vmem:[#allocation371_spill] sm:$0xff] %v6861_v31  ;;  %v6871_v15 = vld [vmem:[%s7966_s11 + $0x778] sm:$0xff]  ;;  %v6876_v5 = vld [vmem:[%s7966_s11 + $0x780] sm:$0xff] }
 0x16d   :  { %9010 = vst [vmem:[#allocation372_spill] sm:$0xff] %v6866_v54  ;;  %9011 = vst [vmem:[#allocation373_spill] sm:$0xff] %v6871_v15  ;;  %v6881_v14 = vld [vmem:[%s7966_s11 + $0x788] sm:$0xff]  ;;  %v6886_v31 = vld [vmem:[%s7966_s11 + $0x790] sm:$0xff] }
 0x16e   :  { %9012 = vst [vmem:[#allocation374_spill] sm:$0xff] %v6876_v5  ;;  %9013 = vst [vmem:[#allocation375_spill] sm:$0xff] %v6881_v14  ;;  %v6891_v54 = vld [vmem:[%s7966_s11 + $0x798] sm:$0xff]  ;;  %v6896_v15 = vld [vmem:[%s7966_s11 + $0x7a0] sm:$0xff] }
 0x16f   :  { %9014 = vst [vmem:[#allocation376_spill] sm:$0xff] %v6886_v31  ;;  %9015 = vst [vmem:[#allocation377_spill] sm:$0xff] %v6891_v54  ;;  %v6901_v5 = vld [vmem:[%s7966_s11 + $0x7a8] sm:$0xff]  ;;  %v6906_v14 = vld [vmem:[%s7966_s11 + $0x7b0] sm:$0xff] }
 0x170   :  { %9016 = vst [vmem:[#allocation378_spill] sm:$0xff] %v6896_v15  ;;  %9017 = vst [vmem:[#allocation379_spill] sm:$0xff] %v6901_v5  ;;  %v6911_v31 = vld [vmem:[%s7966_s11 + $0x7b8] sm:$0xff]  ;;  %v6916_v54 = vld [vmem:[%s7966_s11 + $0x7c0] sm:$0xff] }
 0x171   :  { %9018 = vst [vmem:[#allocation380_spill] sm:$0xff] %v6906_v14  ;;  %9019 = vst [vmem:[#allocation381_spill] sm:$0xff] %v6911_v31  ;;  %v6921_v15 = vld [vmem:[%s7966_s11 + $0x7c8] sm:$0xff]  ;;  %v6926_v14 = vld [vmem:[%s7968_s13] sm:$0xff] }
 0x172   :  { %9020 = vst [vmem:[#allocation382_spill] sm:$0xff] %v6916_v54  ;;  %9021 = vst [vmem:[#allocation383_spill] sm:$0xff] %v6921_v15  ;;  %v6931_v31 = vld [vmem:[%s7968_s13 + $0x8] sm:$0xff]  ;;  %v6936_v54 = vld [vmem:[%s7968_s13 + $0x10] sm:$0xff] }
 0x173   :  { %9022 = vst [vmem:[#allocation384_spill] sm:$0xff] %v6926_v14  ;;  %9023 = vst [vmem:[#allocation385_spill] sm:$0xff] %v6931_v31  ;;  %v6941_v15 = vld [vmem:[%s7968_s13 + $0x18] sm:$0xff]  ;;  %v6943_v5 = vld [vmem:[#allocation15] ss:$0 sm:$0xff] }
 0x174   :  { %9024 = vst [vmem:[#allocation386_spill] sm:$0xff] %v6936_v54  ;;  %9025 = vst [vmem:[#allocation387_spill] sm:$0xff] %v6941_v15  ;;  %v174_v38 = vld [vmem:[#allocation2] sm:$0x3]  ;;  %v6948_v14 = vld [vmem:[%s9027_s5] sm:$0xff]  ;;  %v9028_v15 = vmov 0.0|0.0  }
 0x175   :  { %9026 = vst [vmem:[#allocation388_spill] sm:$0xff] %v6943_v5  ;;  %4280 = vmatpush3.msk.msra.mxu0 %vm186_vm1, %v174_v38  ;;  %v261_v31 = vld [vmem:[%s7962_s7] sm:$0xff]  ;;  %v262_v54 = vld [vmem:[%s7962_s7 + $0x8] sm:$0xff]  ;;  %v355_v63 = vld [vmem:[#allocation6 + $0x8] sm:$0xff] }
 0x176   :  { %4282 = vmatmul.mubr.msk.f32.vlgmr.msra.gmra.mrb[0].mxu0 %vm182_vm2, %v6948_v14  ;;  %4424 = vmatprep.subr.bf16.mxu0 %v9028_v15  ;;  %v4401_v5 = vpack.c.bf16 %v262_v54, %v261_v31  ;;  %v354_v38 = vld [vmem:[#allocation6] sm:$0xff]  ;;  %v264_v10 = vld [vmem:[%s7962_s7 + $0x18] sm:$0xff]  ;;  %v357_v32 = vld [vmem:[#allocation6 + $0x18] sm:$0xff] }
 0x177   :  { %v263_v47 = vld [vmem:[%s7962_s7 + $0x10] sm:$0xff]  ;;  %v4425_v8 = vpack.c.bf16 %v355_v63, %v354_v38  ;;  %v356_v49 = vld [vmem:[#allocation6 + $0x10] sm:$0xff]  ;;  %4351 = vmatprep.mubr.msk.f32.mxu0 %vm4803_vm0, %v9029_v0  ;;  %v266_v63 = vld [vmem:[%s7962_s7 + $0x28] sm:$0xff] }
 0x178   :  { %4402 = vmatpush3.bf16.msra.mxu1 %v4401_v5  ;;  %v4404_v40 = vpack.c.bf16 %v264_v10, %v263_v47  ;;  %v4428_v31 = vpack.c.bf16 %v357_v32, %v356_v49  ;;  %v265_v54 = vld [vmem:[%s7962_s7 + $0x20] sm:$0xff]  ;;  %v358_v38 = vld [vmem:[#allocation6 + $0x20] sm:$0xff]  ;;  %v359_v41 = vld [vmem:[#allocation6 + $0x28] sm:$0xff] }
 0x179   :  { %4426 = vmatpush3.bf16.msra.mxu0 %v4425_v8  ;;  %4403 = vmatprep.subr.bf16.mxu1 %v9028_v15  ;;  %v4407_v24 = vpack.c.bf16 %v266_v63, %v265_v54  ;;  %v4431_v5 = vpack.c.bf16 %v359_v41, %v358_v38  ;;  %v267_v8 = vld [vmem:[%s7962_s7 + $0x30] sm:$0xff]  ;;  %v268_v10 = vld [vmem:[%s7962_s7 + $0x38] sm:$0xff]  ;;  %v361_v47 = vld [vmem:[#allocation6 + $0x38] sm:$0xff] }
 0x17a   :  { %4427 = vmatprep.subr.bf16.mxu0 %v9028_v15  ;;  %v360_v32 = vld [vmem:[#allocation6 + $0x30] sm:$0xff]  ;;  %v4410_v49 = vpack.c.bf16 %v268_v10, %v267_v8  ;;  %v362_v54 = vld [vmem:[#allocation6 + $0x40] sm:$0xff]  ;;  %v363_v63 = vld [vmem:[#allocation6 + $0x48] sm:$0xff] }
 0x17b   :  { %v269_v41 = vld [vmem:[%s7962_s7 + $0x40] sm:$0xff]  ;;  %v272_v8 = vld [vmem:[%s7962_s7 + $0x58] sm:$0xff] }
 0x17c   :  { %4405 = vmatpush3.bf16.msra.mxu1 %v4404_v40  ;;  %v4434_v40 = vpack.c.bf16 %v361_v47, %v360_v32  ;;  %v364_v10 = vld [vmem:[#allocation6 + $0x50] sm:$0xff]  ;;  %v365_v32 = vld [vmem:[#allocation6 + $0x58] sm:$0xff] }
 0x17d   :  { %4429 = vmatpush3.bf16.msra.mxu0 %v4428_v31  ;;  %4406 = vmatprep.subr.bf16.mxu1 %v9028_v15  ;;  %v270_v31 = vld [vmem:[%s7962_s7 + $0x48] sm:$0xff]  ;;  %v450_v61 = vld [vmem:[#allocation9 + $0x10] sm:$0xff] }
 0x17e   :  { %4430 = vmatprep.subr.bf16.mxu0 %v9028_v15  ;;  %v4413_v38 = vpack.c.bf16 %v270_v31, %v269_v41  ;;  %v274_v41 = vld [vmem:[%s7962_s7 + $0x68] sm:$0xff] }
 0x17f   :  { %v366_v31 = vld [vmem:[#allocation6 + $0x60] sm:$0xff] }
 0x180   :  { %4408 = vmatpush3.bf16.msra.mxu1 %v4407_v24  ;;  %v4437_v24 = vpack.c.bf16 %v363_v63, %v362_v54  ;;  %v367_v54 = vld [vmem:[#allocation6 + $0x68] sm:$0xff]  ;;  %v451_v52 = vld [vmem:[#allocation9 + $0x18] sm:$0xff] }
 0x181   :  { %4432 = vmatpush3.bf16.msra.mxu0 %v4431_v5  ;;  %4409 = vmatprep.subr.bf16.mxu1 %v9028_v15  ;;  %v271_v5 = vld [vmem:[%s7962_s7 + $0x50] sm:$0xff] }
 0x182   :  { %4433 = vmatprep.subr.bf16.mxu0 %v9028_v15  ;;  %v4416_v47 = vpack.c.bf16 %v272_v8, %v271_v5  ;;  %v276_v5 = vld [vmem:[%s7962_s7 + $0x78] sm:$0xff] }
 0x183   :  { %v368_v8 = vld [vmem:[#allocation6 + $0x70] sm:$0xff] }
 0x184   :  { %4411 = vmatpush3.bf16.msra.mxu1 %v4410_v49  ;;  %v4440_v49 = vpack.c.bf16 %v365_v32, %v364_v10  ;;  %v369_v32 = vld [vmem:[#allocation6 + $0x78] sm:$0xff] }
 0x185   :  { %4435 = vmatpush3.bf16.msra.mxu0 %v4434_v40  ;;  %4412 = vmatprep.subr.bf16.mxu1 %v9028_v15  ;;  %v273_v40 = vld [vmem:[%s7962_s7 + $0x60] sm:$0xff] }
 0x186   :  { %4436 = vmatprep.subr.bf16.mxu0 %v9028_v15  ;;  %v4419_v63 = vpack.c.bf16 %v274_v41, %v273_v40  ;;  %v448_v40 = vld [vmem:[#allocation9] sm:$0xff]  ;;  %v449_v41 = vld [vmem:[#allocation9 + $0x8] sm:$0xff] }
 0x188   :  { %4414 = vmatpush3.bf16.msra.mxu1 %v4413_v38  ;;  %v4443_v38 = vpack.c.bf16 %v367_v54, %v366_v31 }
 0x189   :  { %4438 = vmatpush3.bf16.msra.mxu0 %v4437_v24  ;;  %4415 = vmatprep.subr.bf16.mxu1 %v9028_v15  ;;  %v275_v24 = vld [vmem:[%s7962_s7 + $0x70] sm:$0xff]  ;;  %s7077_s7 = smov 0  }
 0x18a   :  { %4439 = vmatprep.subr.bf16.mxu0 %v9028_v15  ;;  %v4422_v10 = vpack.c.bf16 %v276_v5, %v275_v24  ;;  %v4452_v24 = vpack.c.bf16 %v451_v52, %v450_v61  ;;  %v452_v5 = vld [vmem:[#allocation9 + $0x20] sm:$0xff]  ;;  %v459_v61 = vld [vmem:[#allocation9 + $0x58] sm:$0xff] }
 0x18c   :  { %4417 = vmatpush3.bf16.msra.mxu1 %v4416_v47  ;;  %v4446_v47 = vpack.c.bf16 %v369_v32, %v368_v8  ;;  %v453_v8 = vld [vmem:[#allocation9 + $0x28] sm:$0xff]  ;;  %v454_v32 = vld [vmem:[#allocation9 + $0x30] sm:$0xff] }
 0x18d   :  { %4441 = vmatpush3.bf16.msra.mxu0 %v4440_v49  ;;  %4418 = vmatprep.subr.bf16.mxu1 %v9028_v15  ;;  %v3831_v49 = vld [vmem:[#allocation4] ss:$0 sm:$0xff] }
 0x18e   :  { %4442 = vmatprep.subr.bf16.mxu0 %v9028_v15 }
 0x190   :  { %4420 = vmatpush3.bf16.msra.mxu1 %v4419_v63 }
 0x191   :  { %4444 = vmatpush3.bf16.msra.mxu0 %v4443_v38  ;;  %4421 = vmatprep.subr.bf16.mxu1 %v9028_v15  ;;  %v4449_v38 = vpack.c.bf16 %v449_v41, %v448_v40  ;;  %v457_v40 = vld [vmem:[#allocation9 + $0x48] sm:$0xff] }
 0x192   :  { %4445 = vmatprep.subr.bf16.mxu0 %v9028_v15 }
 0x194   :  { %4423 = vmatpush3.bf16.msra.mxu1 %v4422_v10  ;;  %v4455_v10 = vpack.c.bf16 %v453_v8, %v452_v5  ;;  %v547_v8 = vmul.f32 0.03, %v6948_v14 }
 0x195   :  { %4447 = vmatpush3.bf16.msra.mxu0 %v4446_v47  ;;  %4448 = vmatprep.subr.bf16.mxu1 %v9028_v15  ;;  %v455_v47 = vld [vmem:[#allocation9 + $0x38] sm:$0xff] }
 0x249   :  { %v256_v31 = vpop.f32.mrb[0].mxu0 }
 0x24a   :  { %v257_v54 = vadd.f32 %v3831_v49, %v256_v31  ;;  %v4283_v63 = vpop.f32.mrb[1].mxu0  ;;  %v4458_v49 = vpack.c.bf16 %v455_v47, %v454_v32  ;;  %v460_v31 = vld [vmem:[#allocation9 + $0x60] sm:$0xff]  ;;  %v4805_v32 = vmov 0   ;;  %v549_v47 = vadd.f32 0.3, %v547_v8 }
 0x24b   :  { %4527 = vset.pattern.permute.xlu0 %v4805_v32  ;;  %4528 = vset.pattern.permute.xlu1 %v4805_v32 }
 0x24c   :  { %v260_v53 = vmax.f32 %v257_v54, 0.0  ;;  %v461_v54 = vld [vmem:[#allocation9 + $0x68] sm:$0xff]  ;;  %563 = vperm.xlu1 %4528, %v6948_v14   ;;  %552 = vperm.xlu0 %4527, %v549_v47  }
 0x24d   :  { %v4467_v63 = vpack.c.bf16 %v461_v54, %v460_v31 }
 0x24e   :  { %4317 = vmatmul.mubr.f32.vlgmr.msra.gmra.mrb[0].mxu1 %v260_v53  ;;  %4352 = vmatmul.mubr.f32.vlgmr.msra.gmra.mrb[2].mxu0 %v260_v53  ;;  %v456_v53 = vld [vmem:[#allocation9 + $0x40] sm:$0xff] }
 0x24f   :  { %4450 = vmatpush3.bf16.msra.mxu1 %v4449_v38  ;;  %4386 = vmatprep.mubr.msk.f32.mxu1 %vm4803_vm0, %v9029_v0  ;;  %v4461_v52 = vpack.c.bf16 %v457_v40, %v456_v53  ;;  %v458_v0 = vld [vmem:[#allocation9 + $0x50] sm:$0xff]  ;;  %v949_v40 = vld [vmem:[#allocation13] sm:$0xff] }
 0x250   :  { %4451 = vmatprep.subr.bf16.mxu1 %v9028_v15  ;;  %v4464_v41 = vpack.c.bf16 %v459_v61, %v458_v0  ;;  %v462_v38 = vld [vmem:[#allocation9 + $0x70] sm:$0xff] }
 0x251   :  { %v950_v61 = vld [vmem:[#allocation13 + $0x8] sm:$0xff] }
 0x253   :  { %4453 = vmatpush3.bf16.msra.mxu1 %v4452_v24  ;;  %v463_v24 = vld [vmem:[#allocation9 + $0x78] sm:$0xff] }
 0x254   :  { %4454 = vmatprep.subr.bf16.mxu1 %v9028_v15  ;;  %v4470_v5 = vpack.c.bf16 %v463_v24, %v462_v38 }
 0x257   :  { %4456 = vmatpush3.bf16.msra.mxu1 %v4455_v10  ;;  %v541_v10 = vlaneseq }
 0x258   :  { %4457 = vmatprep.subr.bf16.mxu1 %v9028_v15 }
 0x259   :  { %v954_v53 = vshrl.u32 %v541_v10, 7 }
 0x25b   :  { %4459 = vmatpush3.bf16.msra.mxu1 %v4458_v49  ;;  %v7029_v49 = vand.u32 127, %v541_v10  ;;  %v959_v0 = vsub.s32 1, %v954_v53  ;;  %v967_v31 = vsub.s32 3, %v954_v53  ;;  %v971_v54 = vsub.s32 4, %v954_v53 }
 0x25c   :  { %4460 = vmatprep.subr.bf16.mxu1 %v9028_v15  ;;  %v979_v14 = vsub.s32 6, %v954_v53 }
 0x25d   :  { %vm544_vm3 = vcmp.eq.s32.totalorder %v7029_v49, 1  ;;  %v7034_v24 = vrot.slane %v949_v40, %v959_v0  ;;  %v7038_v10 = vrot.slane %v949_v40, %v967_v31  ;;  %vm546_vm4 = vcmp.eq.s32.totalorder %v7029_v49, 3 }
 0x25e   :  { %v7044_v60 = vrot.slane %v949_v40, %v979_v14  ;;  %vm545_vm5 = vcmp.eq.s32.totalorder %v7029_v49, 2  ;;  %vm543_vm6 = vcmp.eq.s32.totalorder %v7029_v49, 0 }
 0x25f   :  { %4462 = vmatpush3.bf16.msra.mxu1 %v4461_v52  ;;  %v548_v52 = vsub.f32 0.3, %v547_v8  ;;  %9031 = vst [vmem:[#allocation390_spill] sm:$0xff] %v7034_v24  ;;  %9033 = vst [vmem:[#allocation392_spill] sm:$0xff] %v7038_v10  ;;  %v7040_v8 = vrot.slane %v949_v40, %v971_v54 }
 0x260   :  { %4463 = vmatprep.subr.bf16.mxu1 %v9028_v15  ;;  %9036 = vst [vmem:[#allocation395_spill] sm:$0xff] %v7044_v60  ;;  %v3835_v60 = vld [vmem:[#allocation7] ss:$0 sm:$0xff] }
 0x261   :  { %9034 = vst [vmem:[#allocation393_spill] sm:$0xff] %v7040_v8  ;;  %558 = vperm.xlu0 %4527, %v548_v52   ;;  %v7060_v8 = vrot.slane %v950_v61, %v979_v14  ;;  %v3834_v52 = vld [vmem:[#allocation12] ss:$0 sm:$0xff] }
 0x263   :  { %4465 = vmatpush3.bf16.msra.mxu1 %v4464_v41  ;;  %v963_v41 = vsub.s32 2, %v954_v53  ;;  %9042 = vst [vmem:[#allocation401_spill] sm:$0xff] %v7060_v8 }
 0x264   :  { %4466 = vmatprep.subr.bf16.mxu1 %v9028_v15 }
 0x265   :  { %v7036_v32 = vrot.slane %v949_v40, %v963_v41  ;;  %v7052_v24 = vrot.slane %v950_v61, %v963_v41 }
 0x267   :  { %4468 = vmatpush3.bf16.msra.mxu1 %v4467_v63  ;;  %v975_v63 = vsub.s32 5, %v954_v53  ;;  %9032 = vst [vmem:[#allocation391_spill] sm:$0xff] %v7036_v32  ;;  %9040 = vst [vmem:[#allocation399_spill] sm:$0xff] %v7052_v24  ;;  %v7056_v32 = vrot.slane %v950_v61, %v971_v54 }
 0x268   :  { %4469 = vmatprep.subr.bf16.mxu1 %v9028_v15  ;;  %v955_v15 = vsub.s32 0, %v954_v53 }
 0x269   :  { %v7042_v47 = vrot.slane %v949_v40, %v975_v63  ;;  %v7058_v10 = vrot.slane %v950_v61, %v975_v63 }
 0x26a   :  { %v7032_v38 = vrot.slane %v949_v40, %v955_v15  ;;  %v7048_v45 = vrot.slane %v950_v61, %v955_v15 }
 0x26b   :  { %4471 = vmatpush3.bf16.msra.mxu1 %v4470_v5  ;;  %v983_v5 = vsub.s32 7, %v954_v53  ;;  %9035 = vst [vmem:[#allocation394_spill] sm:$0xff] %v7042_v47  ;;  %v7054_v53 = vrot.slane %v950_v61, %v967_v31  ;;  %9041 = vst [vmem:[#allocation400_spill] sm:$0xff] %v7058_v10 }
 0x26c   :  { %9030 = vst [vmem:[#allocation389_spill] sm:$0xff] %v7032_v38  ;;  %9038 = vst [vmem:[#allocation397_spill] sm:$0xff] %v7048_v45  ;;  %v7050_v38 = vrot.slane %v950_v61, %v959_v0 }
 0x26d   :  { %v7046_v37 = vrot.slane %v949_v40, %v983_v5  ;;  %v7062_v47 = vrot.slane %v950_v61, %v983_v5 }
 0x26e   :  { %9039 = vst [vmem:[#allocation398_spill] sm:$0xff] %v7050_v38 }
 0x26f   :  { %9037 = vst [vmem:[#allocation396_spill] sm:$0xff] %v7046_v37  ;;  %v3838_v37 = vld [vmem:[#allocation16] ss:$0 sm:$0xff] }
 0x2cb   :  { %v553_v54 = vpop.permute.xlu0 %552  ;;  %v564_v61 = vpop.permute.xlu1 %563 }
 0x2cc   :  { %v555_v63 = vsel %vm546_vm4, %v553_v54, 0.0 }
 0x2e0   :  { %v559_v14 = vpop.permute.xlu0 %558 }
 0x2e1   :  { %v561_v5 = vsel %vm545_vm5, %v559_v14, %v555_v63 }
 0x321   :  { %v350_v40 = vpop.f32.mrb[0].mxu1  ;;  %v443_v15 = vpop.f32.mrb[2].mxu0 }
 0x322   :  { %v351_v45 = vadd.f32 %v3834_v52, %v350_v40  ;;  %v444_v0 = vadd.f32 %v3835_v60, %v443_v15  ;;  %v4318_v38 = vpop.f32.mrb[1].mxu1  ;;  %v4353_v41 = vpop.f32.mrb[3].mxu0  ;;  %v566_v60 = vsel %vm543_vm6, %v564_v61, %v561_v5  }
 0x324   :  { %v7064_v24 = vadd.f32 %v3838_v37, %v351_v45  ;;  %v447_v31 = vmax.f32 %v444_v0, 0.0  ;;  %v3836_v37 = vld [vmem:[#allocation10] ss:$0 sm:$0xff] }
 0x326   :  { %4387 = vmatmul.mubr.f32.vlgmr.msra.gmra.mrb[2].mxu1 %v447_v31 }
 0x3f9   :  { %v537_v45 = vpop.f32.mrb[2].mxu1 }
 0x3fa   :  { %v538_v38 = vadd.f32 %v3836_v37, %v537_v45   ;;  %v4388_v52 = vpop.f32.mrb[3].mxu1 }
 0x3fb LB: > { %v9043_v30 = vld [vmem:[#allocation127_spill] sm:$0xff]  ;;  %v9045_v28 = vld [vmem:[#allocation50_spill] sm:$0xff]  ;;  %v9046_v27 = vld [vmem:[#allocation49_spill] sm:$0xff]  ;;  %v3872_v14 = vcombine.high %v5196_v34, %v5236_v42  ;;  %v3874_v5 = vcombine.high %v5201_v35, %v5241_v43  ;;  %v8315_v37 = vmov 0   ;;  %v3871_v45 = vcombine.low %v5196_v34, %v5236_v42  ;;  %s4810_s13 = smov 125   ;;  %s4811_s21 = smov 127   ;;  %s4788_s7 = sphi %s7077_s7, %s1053_s7   ;;  %v4784_v38 = vphi %v538_v38, %v7913_v38   ;;  %v4780_v60 = vphi %v566_v60, %v3798_v60  }
 0x3fc   : > { %v9044_v29 = vld [vmem:[#allocation51_spill] sm:$0xff]  ;;  %v9047_v26 = vld [vmem:[#allocation48_spill] sm:$0xff]  ;;  %v9050_v22 = vld [vmem:[#allocation126_spill] sm:$0xff]  ;;  %1729 = vmatprep.mubr.bf16.mxu0 %v8315_v37  ;;  %1770 = vmatprep.mubr.bf16.mxu1 %v8315_v37  ;;  %v3873_v52 = vcombine.low %v5201_v35, %v5241_v43  ;;  %vm3307_vm7 = vcmask 654336   ;;  %vm4808_vm8 = vmmov 0   ;;  %vm3641_vm9 = vcmask 261120  }
 0x3fd   : > { %v9048_v25 = vld [vmem:[#allocation84_spill] sm:$0xff]  ;;  %v9051_v21 = vld [vmem:[#allocation43_spill] sm:$0xff]  ;;  %v9052_v20 = vld [vmem:[#allocation42_spill] sm:$0xff]  ;;  %4530 = vset.pattern.permute.xlu1 %v8315_v37  ;;  %4529 = vset.pattern.permute.xlu0 %v8315_v37  ;;  %s4219_s25 = sshll.u32 %s4788_s7, 3  ;;  %s4812_s6 = smov 126   ;;  %vm3800_vm13 = vcmask 31744  }
 0x3fe   : > { %v9049_v23 = vld [vmem:[#allocation112_spill] sm:$0xff]  ;;  %v9053_v19 = vld [vmem:[#allocation41_spill] sm:$0xff]  ;;  %v9055_v17 = vld [vmem:[#allocation99_spill] sm:$0xff]  ;;  %3747 = vrot.lane.b32.xlu1 %v4780_v60, %s4810_s13  ;;  %s3716_s26 = scalar_lea.vmem %s7971_s16, %s4219_s25  ;;  %s4814_s3 = smov 1  }
 0x3ff   : > { %v9054_v18 = vld [vmem:[#allocation40_spill] sm:$0xff]  ;;  %v9057_v13 = vld [vmem:[#allocation35_spill] sm:$0xff]  ;;  %v9058_v12 = vld [vmem:[#allocation34_spill] sm:$0xff]  ;;  %v3858_v54 = vcombine.high %v9053_v19, %v9046_v27  ;;  %v3857_v61 = vcombine.low %v9053_v19, %v9046_v27  ;;  %s3799_s27 = scalar_lea.vmem %s7970_s15, %s4219_s25  ;;  %s1053_s7 = sadd.s32 1, %s4788_s7  }
 0x400   : > { %v9056_v16 = vld [vmem:[#allocation92_spill] sm:$0xff]  ;;  %v9059_v11 = vld [vmem:[#allocation33_spill] sm:$0xff]  ;;  %v9061_v7 = vld [vmem:[#allocation91_spill] sm:$0xff]  ;;  %v3856_v31 = vcombine.high %v9054_v18, %v9047_v26  ;;  %v3855_v63 = vcombine.low %v9054_v18, %v9047_v26  ;;  %p1050_p10 = scmp.ge.s32.totalorder %s1053_s7, 700  }
 0x401   : > { %v9060_v9 = vld [vmem:[#allocation32_spill] sm:$0xff]  ;;  %v9062_v6 = vld [vmem:[#allocation119_spill] sm:$0xff]  ;;  %v9064_v3 = vld [vmem:[#allocation26_spill] sm:$0xff] }
 0x402   : > { %v9063_v4 = vld [vmem:[#allocation27_spill] sm:$0xff]  ;;  %v9065_v2 = vld [vmem:[#allocation25_spill] sm:$0xff]  ;;  %v9066_v1 = vld [vmem:[#allocation24_spill] sm:$0xff] }
 0x403   : > { %v3840_v40 = vcombine.high %v9066_v1, %v9060_v9  ;;  %v3842_v15 = vcombine.high %v9065_v2, %v9059_v11  ;;  %v3839_v0 = vcombine.low %v9066_v1, %v9060_v9  ;;  %v3841_v41 = vcombine.low %v9065_v2, %v9059_v11  ;;  %v9071_v1 = vld [vmem:[#allocation73_spill] sm:$0xff]  ;;  %v9072_v2 = vld [vmem:[#allocation67_spill] sm:$0xff]  ;;  %v9077_v9 = vld [vmem:[#allocation100_spill] sm:$0xff] }
 0x404   : > { %v9357_v10 = vld [vmem:[#allocation400_spill] sm:$0xff]  ;;  %v9406_v8 = vld [vmem:[#allocation401_spill] sm:$0xff] }
 0x405   : > { %1697 = vmatprep.subr.bf16.mxu0 %v3840_v40  ;;  %1738 = vmatprep.subr.bf16.mxu1 %v3842_v15  ;;  %v3888_v40 = vcombine.high %v5276_v50, %v5316_v58  ;;  %v3890_v15 = vcombine.high %v5281_v51, %v5321_v59 }
 0x406   : > { %1698 = vmatpush1.bf16.msra.mxu0 %v3839_v0  ;;  %1739 = vmatpush1.bf16.msra.mxu1 %v3841_v41  ;;  %v3887_v0 = vcombine.low %v5276_v50, %v5316_v58  ;;  %v3889_v41 = vcombine.low %v5281_v51, %v5321_v59 }
 0x407   : > { %1699 = vmatprep.subr.bf16.mxu0 %v3856_v31  ;;  %1740 = vmatprep.subr.bf16.mxu1 %v3858_v54  ;;  %v3904_v31 = vcombine.high %v5356_v57, %v9048_v25  ;;  %v3906_v54 = vcombine.high %v5361_v56, %v5401_v33 }
 0x40a   : > { %1700 = vmatpush1.bf16.msra.mxu0 %v3855_v63  ;;  %1741 = vmatpush1.bf16.msra.mxu1 %v3857_v61  ;;  %v3903_v63 = vcombine.low %v5356_v57, %v9048_v25  ;;  %v3905_v61 = vcombine.low %v5361_v56, %v5401_v33 }
 0x40b   : > { %1701 = vmatprep.subr.bf16.mxu0 %v3872_v14  ;;  %1742 = vmatprep.subr.bf16.mxu1 %v3874_v5  ;;  %v3920_v14 = vcombine.high %v9061_v7, %v5476_v55  ;;  %v3922_v5 = vcombine.high %v9056_v16, %v9055_v17 }
 0x40e   : > { %1702 = vmatpush1.bf16.msra.mxu0 %v3871_v45  ;;  %1743 = vmatpush1.bf16.msra.mxu1 %v3873_v52  ;;  %v3919_v45 = vcombine.low %v9061_v7, %v5476_v55  ;;  %v3921_v52 = vcombine.low %v9056_v16, %v9055_v17  ;;  %v9222_v16 = vld [vmem:[#allocation389_spill] sm:$0xff] }
 0x40f   : > { %1703 = vmatprep.subr.bf16.mxu0 %v3888_v40  ;;  %1744 = vmatprep.subr.bf16.mxu1 %v3890_v15  ;;  %v3936_v40 = vcombine.high %v5516_v39, %v9049_v23  ;;  %v3938_v15 = vcombine.high %v5521_v48, %v5561_v62 }
 0x412   : > { %1704 = vmatpush1.bf16.msra.mxu0 %v3887_v0  ;;  %1745 = vmatpush1.bf16.msra.mxu1 %v3889_v41  ;;  %v3935_v0 = vcombine.low %v5516_v39, %v9049_v23  ;;  %v3937_v41 = vcombine.low %v5521_v48, %v5561_v62 }
 0x413   : > { %1705 = vmatprep.subr.bf16.mxu0 %v3904_v31  ;;  %1746 = vmatprep.subr.bf16.mxu1 %v3906_v54  ;;  %v3952_v31 = vcombine.high %v9062_v6, %v9050_v22  ;;  %v3954_v54 = vcombine.high %v5601_v46, %v9043_v30 }
 0x416   : > { %1706 = vmatpush1.bf16.msra.mxu0 %v3903_v63  ;;  %1747 = vmatpush1.bf16.msra.mxu1 %v3905_v61  ;;  %v3951_v63 = vcombine.low %v9062_v6, %v9050_v22  ;;  %v3953_v61 = vcombine.low %v5601_v46, %v9043_v30  ;;  %v9076_v6 = vld [vmem:[#allocation79_spill] sm:$0xff] }
 0x417   : > { %1707 = vmatprep.subr.bf16.mxu0 %v3920_v14  ;;  %1748 = vmatprep.subr.bf16.mxu1 %v3922_v5  ;;  %v3844_v14 = vcombine.high %v9064_v3, %v9058_v12  ;;  %v3846_v5 = vcombine.high %v9063_v4, %v9057_v13 }
 0x41a   : > { %1708 = vmatpush1.bf16.msra.mxu0 %v3919_v45  ;;  %1749 = vmatpush1.bf16.msra.mxu1 %v3921_v52  ;;  %v7162_v45 = vpack.c.bf16 %v4784_v38, %v4784_v38  ;;  %v3843_v52 = vcombine.low %v9064_v3, %v9058_v12  ;;  %v3894_v3 = vcombine.high %v9072_v2, %v9071_v1  ;;  %v9084_v12 = vld [vmem:[#allocation107_spill] sm:$0xff] }
 0x41b   : > { %1709 = vmatprep.subr.bf16.mxu0 %v3936_v40  ;;  %1750 = vmatprep.subr.bf16.mxu1 %v3938_v15  ;;  %v3845_v40 = vcombine.low %v9063_v4, %v9057_v13  ;;  %v3860_v15 = vcombine.high %v9052_v20, %v9045_v28  ;;  %v9074_v4 = vld [vmem:[#allocation78_spill] sm:$0xff] }
 0x41e   : > { %1710 = vmatpush1.bf16.msra.mxu0 %v3935_v0  ;;  %1751 = vmatpush1.bf16.msra.mxu1 %v3937_v41  ;;  %v3862_v0 = vcombine.high %v9051_v21, %v9044_v29  ;;  %v3859_v41 = vcombine.low %v9052_v20, %v9045_v28 }
 0x41f   : > { %1711 = vmatprep.subr.bf16.mxu0 %v3952_v31  ;;  %1752 = vmatprep.subr.bf16.mxu1 %v3954_v54  ;;  %v3861_v31 = vcombine.low %v9051_v21, %v9044_v29  ;;  %v3876_v54 = vcombine.high %v5206_v36, %v5246_v44 }
 0x422   : > { %1712 = vmatpush1.bf16.msra.mxu0 %v3951_v63  ;;  %1753 = vmatpush1.bf16.msra.mxu1 %v3953_v61  ;;  %v9067_v63 = vld [vmem:[#allocation61_spill] sm:$0xff]  ;;  %v9068_v61 = vld [vmem:[#allocation56_spill] sm:$0xff] }
 0x423   : > { %1779 = vmatprep.subr.bf16.mxu0 %v3844_v14  ;;  %1820 = vmatprep.subr.bf16.mxu1 %v3846_v5  ;;  %v3878_v14 = vcombine.high %v9068_v61, %v9067_v63  ;;  %v3875_v5 = vcombine.low %v5206_v36, %v5246_v44 }
 0x425   : > { %1730 = vmatmul.mubr.bf16.vlgmr.msra.gmra.mrb[0].mxu0 %v7162_v45  ;;  %1771 = vmatmul.mubr.bf16.vlgmr.msra.gmra.mrb[0].mxu1 %v7162_v45 }
 0x426   : > { %1780 = vmatpush1.bf16.msra.mxu0 %v3843_v52  ;;  %1821 = vmatpush1.bf16.msra.mxu1 %v3845_v40  ;;  %v3877_v52 = vcombine.low %v9068_v61, %v9067_v63  ;;  %v9069_v40 = vld [vmem:[#allocation72_spill] sm:$0xff] }
 0x427   : > { %1781 = vmatprep.subr.bf16.mxu0 %v3860_v15  ;;  %1822 = vmatprep.subr.bf16.mxu1 %v3862_v0  ;;  %v9070_v15 = vld [vmem:[#allocation66_spill] sm:$0xff] }
 0x428   : > { %1811 = vmatprep.mubr.bf16.mxu0 %v8315_v37  ;;  %1852 = vmatprep.mubr.bf16.mxu1 %v8315_v37  ;;  %v3892_v0 = vcombine.high %v9070_v15, %v9069_v40  ;;  %v9073_v37 = vld [vmem:[#allocation85_spill] sm:$0xff] }
 0x42a   : > { %1782 = vmatpush1.bf16.msra.mxu0 %v3859_v41  ;;  %1823 = vmatpush1.bf16.msra.mxu1 %v3861_v31  ;;  %v3891_v41 = vcombine.low %v9070_v15, %v9069_v40  ;;  %v3893_v31 = vcombine.low %v9072_v2, %v9071_v1  ;;  %v9078_v1 = vld [vmem:[#allocation93_spill] sm:$0xff]  ;;  %v9080_v2 = vld [vmem:[#allocation94_spill] sm:$0xff] }
 0x42b   : > { %1783 = vmatprep.subr.bf16.mxu0 %v3876_v54  ;;  %1824 = vmatprep.subr.bf16.mxu1 %v3878_v14  ;;  %v3908_v54 = vcombine.high %v9074_v4, %v9073_v37  ;;  %v9075_v14 = vld [vmem:[#allocation86_spill] sm:$0xff] }
 0x42c   : > { %v3910_v7 = vcombine.high %v9076_v6, %v9075_v14 }
 0x42e   : > { %1784 = vmatpush1.bf16.msra.mxu0 %v3875_v5  ;;  %1825 = vmatpush1.bf16.msra.mxu1 %v3877_v52  ;;  %v3907_v5 = vcombine.low %v9074_v4, %v9073_v37  ;;  %v3909_v52 = vcombine.low %v9076_v6, %v9075_v14  ;;  %v9081_v4 = vld [vmem:[#allocation113_spill] sm:$0xff]  ;;  %v9082_v6 = vld [vmem:[#allocation106_spill] sm:$0xff]  ;;  %v9101_v14 = vmov 0  }
 0x42f   : > { %1785 = vmatprep.subr.bf16.mxu0 %v3892_v0  ;;  %1826 = vmatprep.subr.bf16.mxu1 %v3894_v3  ;;  %v3924_v0 = vcombine.high %v9078_v1, %v9077_v9  ;;  %v9079_v3 = vld [vmem:[#allocation101_spill] sm:$0xff] }
 0x430   : > { %v3926_v11 = vcombine.high %v9080_v2, %v9079_v3 }
 0x432   : > { %1786 = vmatpush1.bf16.msra.mxu0 %v3891_v41  ;;  %1827 = vmatpush1.bf16.msra.mxu1 %v3893_v31  ;;  %v3923_v41 = vcombine.low %v9078_v1, %v9077_v9  ;;  %v3925_v31 = vcombine.low %v9080_v2, %v9079_v3  ;;  %v9085_v1 = vld [vmem:[#allocation128_spill] sm:$0xff]  ;;  %v9088_v3 = vld [vmem:[#allocation121_spill] sm:$0xff] }
 0x433   : > { %1787 = vmatprep.subr.bf16.mxu0 %v3908_v54  ;;  %1828 = vmatprep.subr.bf16.mxu1 %v3910_v7  ;;  %v3940_v54 = vcombine.high %v9082_v6, %v9081_v4  ;;  %v9083_v7 = vld [vmem:[#allocation114_spill] sm:$0xff]  ;;  %v9086_v2 = vld [vmem:[#allocation120_spill] sm:$0xff] }
 0x434   : > { %v3942_v13 = vcombine.high %v9084_v12, %v9083_v7 }
 0x436   : > { %1788 = vmatpush1.bf16.msra.mxu0 %v3907_v5  ;;  %1829 = vmatpush1.bf16.msra.mxu1 %v3909_v52  ;;  %v3939_v5 = vcombine.low %v9082_v6, %v9081_v4  ;;  %v3941_v52 = vcombine.low %v9084_v12, %v9083_v7  ;;  %v9089_v4 = vld [vmem:[#allocation36_spill] sm:$0xff]  ;;  %v9092_v7 = vld [vmem:[#allocation29_spill] sm:$0xff] }
 0x437   : > { %1789 = vmatprep.subr.bf16.mxu0 %v3924_v0  ;;  %1830 = vmatprep.subr.bf16.mxu1 %v3926_v11  ;;  %v3956_v0 = vcombine.high %v9086_v2, %v9085_v1  ;;  %v9087_v11 = vld [vmem:[#allocation129_spill] sm:$0xff]  ;;  %v9090_v6 = vld [vmem:[#allocation28_spill] sm:$0xff] }
 0x438   : > { %v3958_v9 = vcombine.high %v9088_v3, %v9087_v11 }
 0x43a   : > { %1790 = vmatpush1.bf16.msra.mxu0 %v3923_v41  ;;  %1831 = vmatpush1.bf16.msra.mxu1 %v3925_v31  ;;  %v3955_v41 = vcombine.low %v9086_v2, %v9085_v1  ;;  %v3957_v31 = vcombine.low %v9088_v3, %v9087_v11  ;;  %v9093_v1 = vld [vmem:[#allocation52_spill] sm:$0xff]  ;;  %v9096_v3 = vld [vmem:[#allocation45_spill] sm:$0xff] }
 0x43b   : > { %1791 = vmatprep.subr.bf16.mxu0 %v3940_v54  ;;  %1832 = vmatprep.subr.bf16.mxu1 %v3942_v13  ;;  %v3848_v54 = vcombine.high %v9090_v6, %v9089_v4  ;;  %v9091_v13 = vld [vmem:[#allocation37_spill] sm:$0xff]  ;;  %v9094_v2 = vld [vmem:[#allocation44_spill] sm:$0xff] }
 0x43c   : > { %v3850_v12 = vcombine.high %v9092_v7, %v9091_v13 }
 0x43e   : > { %1792 = vmatpush1.bf16.msra.mxu0 %v3939_v5  ;;  %1833 = vmatpush1.bf16.msra.mxu1 %v3941_v52  ;;  %v3847_v5 = vcombine.low %v9090_v6, %v9089_v4  ;;  %v3849_v52 = vcombine.low %v9092_v7, %v9091_v13  ;;  %v9099_v6 = vld [vmem:[#allocation63_spill] sm:$0xff]  ;;  %v9100_v7 = vld [vmem:[#allocation58_spill] sm:$0xff] }
 0x43f   : > { %1793 = vmatprep.subr.bf16.mxu0 %v3956_v0  ;;  %1834 = vmatprep.subr.bf16.mxu1 %v3958_v9  ;;  %v3864_v0 = vcombine.high %v9094_v2, %v9093_v1  ;;  %v9095_v9 = vld [vmem:[#allocation53_spill] sm:$0xff]  ;;  %v3882_v13 = vcombine.high %v9100_v7, %v9099_v6 }
 0x440   : > { %v3866_v11 = vcombine.high %v9096_v3, %v9095_v9 }
 0x442   : > { %1794 = vmatpush1.bf16.msra.mxu0 %v3955_v41  ;;  %1835 = vmatpush1.bf16.msra.mxu1 %v3957_v31  ;;  %v3863_v41 = vcombine.low %v9094_v2, %v9093_v1  ;;  %v3865_v31 = vcombine.low %v9096_v3, %v9095_v9  ;;  %v9104_v2 = vld [vmem:[#allocation75_spill] sm:$0xff]  ;;  %v9105_v3 = vld [vmem:[#allocation69_spill] sm:$0xff] }
 0x443   : > { %1861 = vmatprep.subr.bf16.mxu0 %v3848_v54  ;;  %1902 = vmatprep.subr.bf16.mxu1 %v3850_v12  ;;  %v9097_v12 = vld [vmem:[#allocation62_spill] sm:$0xff]  ;;  %v9098_v54 = vld [vmem:[#allocation57_spill] sm:$0xff]  ;;  %v3898_v9 = vcombine.high %v9105_v3, %v9104_v2 }
 0x444   : > { %v3880_v4 = vcombine.high %v9098_v54, %v9097_v12 }
 0x445   : > { %1812 = vmatmul.mubr.bf16.vlgmr.msra.gmra.mrb[4].mxu0 %v7162_v45  ;;  %1853 = vmatmul.mubr.bf16.vlgmr.msra.gmra.mrb[4].mxu1 %v7162_v45 }
 0x446   : > { %1862 = vmatpush1.bf16.msra.mxu0 %v3847_v5  ;;  %1903 = vmatpush1.bf16.msra.mxu1 %v3849_v52  ;;  %v3879_v5 = vcombine.low %v9098_v54, %v9097_v12  ;;  %v3881_v52 = vcombine.low %v9100_v7, %v9099_v6  ;;  %v9106_v12 = vld [vmem:[#allocation87_spill] sm:$0xff]  ;;  %v9107_v6 = vld [vmem:[#allocation80_spill] sm:$0xff]  ;;  %v9109_v7 = vld [vmem:[#allocation81_spill] sm:$0xff] }
 0x447   : > { %1863 = vmatprep.subr.bf16.mxu0 %v3864_v0  ;;  %1904 = vmatprep.subr.bf16.mxu1 %v3866_v11  ;;  %v9102_v11 = vld [vmem:[#allocation74_spill] sm:$0xff]  ;;  %v9103_v0 = vld [vmem:[#allocation68_spill] sm:$0xff] }
 0x448   : > { %1893 = vmatprep.mubr.bf16.mxu0 %v9101_v14  ;;  %1934 = vmatprep.mubr.bf16.mxu1 %v9101_v14  ;;  %v3896_v1 = vcombine.high %v9103_v0, %v9102_v11 }
 0x44a   : > { %1864 = vmatpush1.bf16.msra.mxu0 %v3863_v41  ;;  %1905 = vmatpush1.bf16.msra.mxu1 %v3865_v31  ;;  %v3895_v41 = vcombine.low %v9103_v0, %v9102_v11  ;;  %v3897_v31 = vcombine.low %v9105_v3, %v9104_v2  ;;  %v9110_v0 = vld [vmem:[#allocation102_spill] sm:$0xff]  ;;  %v9111_v2 = vld [vmem:[#allocation95_spill] sm:$0xff]  ;;  %v9113_v3 = vld [vmem:[#allocation96_spill] sm:$0xff] }
 0x44b   : > { %1865 = vmatprep.subr.bf16.mxu0 %v3880_v4  ;;  %1906 = vmatprep.subr.bf16.mxu1 %v3882_v13  ;;  %v3912_v4 = vcombine.high %v9107_v6, %v9106_v12  ;;  %v9108_v13 = vld [vmem:[#allocation88_spill] sm:$0xff] }
 0x44c   : > { %v3914_v15 = vcombine.high %v9109_v7, %v9108_v13 }
 0x44e   : > { %1866 = vmatpush1.bf16.msra.mxu0 %v3879_v5  ;;  %1907 = vmatpush1.bf16.msra.mxu1 %v3881_v52  ;;  %v3911_v5 = vcombine.low %v9107_v6, %v9106_v12  ;;  %v3913_v52 = vcombine.low %v9109_v7, %v9108_v13  ;;  %v9114_v6 = vld [vmem:[#allocation115_spill] sm:$0xff]  ;;  %v9115_v7 = vld [vmem:[#allocation108_spill] sm:$0xff]  ;;  %v9117_v12 = vld [vmem:[#allocation109_spill] sm:$0xff] }
 0x44f   : > { %1867 = vmatprep.subr.bf16.mxu0 %v3896_v1  ;;  %1908 = vmatprep.subr.bf16.mxu1 %v3898_v9  ;;  %v3928_v1 = vcombine.high %v9111_v2, %v9110_v0  ;;  %v9112_v9 = vld [vmem:[#allocation103_spill] sm:$0xff] }
 0x450   : > { %v3930_v11 = vcombine.high %v9113_v3, %v9112_v9 }
 0x452   : > { %1868 = vmatpush1.bf16.msra.mxu0 %v3895_v41  ;;  %1909 = vmatpush1.bf16.msra.mxu1 %v3897_v31  ;;  %v3927_v41 = vcombine.low %v9111_v2, %v9110_v0  ;;  %v3929_v31 = vcombine.low %v9113_v3, %v9112_v9  ;;  %v9118_v0 = vld [vmem:[#allocation130_spill] sm:$0xff]  ;;  %v9121_v3 = vld [vmem:[#allocation123_spill] sm:$0xff] }
 0x453   : > { %1869 = vmatprep.subr.bf16.mxu0 %v3912_v4  ;;  %1910 = vmatprep.subr.bf16.mxu1 %v3914_v15  ;;  %v3944_v4 = vcombine.high %v9115_v7, %v9114_v6  ;;  %v9116_v15 = vld [vmem:[#allocation116_spill] sm:$0xff]  ;;  %v9119_v2 = vld [vmem:[#allocation122_spill] sm:$0xff] }
 0x454   : > { %v3946_v13 = vcombine.high %v9117_v12, %v9116_v15 }
 0x456   : > { %1870 = vmatpush1.bf16.msra.mxu0 %v3911_v5  ;;  %1911 = vmatpush1.bf16.msra.mxu1 %v3913_v52  ;;  %v3943_v5 = vcombine.low %v9115_v7, %v9114_v6  ;;  %v3945_v52 = vcombine.low %v9117_v12, %v9116_v15  ;;  %v9122_v6 = vld [vmem:[#allocation38_spill] sm:$0xff]  ;;  %v9125_v12 = vld [vmem:[#allocation31_spill] sm:$0xff] }
 0x457   : > { %1871 = vmatprep.subr.bf16.mxu0 %v3928_v1  ;;  %1912 = vmatprep.subr.bf16.mxu1 %v3930_v11  ;;  %v3960_v1 = vcombine.high %v9119_v2, %v9118_v0  ;;  %v9120_v11 = vld [vmem:[#allocation131_spill] sm:$0xff]  ;;  %v9123_v7 = vld [vmem:[#allocation30_spill] sm:$0xff] }
 0x458   : > { %v3962_v9 = vcombine.high %v9121_v3, %v9120_v11 }
 0x45a   : > { %1872 = vmatpush1.bf16.msra.mxu0 %v3927_v41  ;;  %1913 = vmatpush1.bf16.msra.mxu1 %v3929_v31  ;;  %v3959_v41 = vcombine.low %v9119_v2, %v9118_v0  ;;  %v3961_v31 = vcombine.low %v9121_v3, %v9120_v11  ;;  %v9126_v0 = vld [vmem:[#allocation54_spill] sm:$0xff]  ;;  %v9129_v3 = vld [vmem:[#allocation47_spill] sm:$0xff] }
 0x45b   : > { %1873 = vmatprep.subr.bf16.mxu0 %v3944_v4  ;;  %1914 = vmatprep.subr.bf16.mxu1 %v3946_v13  ;;  %v3852_v4 = vcombine.high %v9123_v7, %v9122_v6  ;;  %v9124_v13 = vld [vmem:[#allocation39_spill] sm:$0xff]  ;;  %v9127_v2 = vld [vmem:[#allocation46_spill] sm:$0xff] }
 0x45c   : > { %v3854_v15 = vcombine.high %v9125_v12, %v9124_v13 }
 0x45e   : > { %1874 = vmatpush1.bf16.msra.mxu0 %v3943_v5  ;;  %1915 = vmatpush1.bf16.msra.mxu1 %v3945_v52  ;;  %v3851_v5 = vcombine.low %v9123_v7, %v9122_v6  ;;  %v3853_v52 = vcombine.low %v9125_v12, %v9124_v13  ;;  %v9132_v7 = vld [vmem:[#allocation65_spill] sm:$0xff]  ;;  %v9133_v12 = vld [vmem:[#allocation60_spill] sm:$0xff] }
 0x45f   : > { %1875 = vmatprep.subr.bf16.mxu0 %v3960_v1  ;;  %1916 = vmatprep.subr.bf16.mxu1 %v3962_v9  ;;  %v3868_v1 = vcombine.high %v9127_v2, %v9126_v0  ;;  %v9128_v9 = vld [vmem:[#allocation55_spill] sm:$0xff]  ;;  %v3886_v13 = vcombine.high %v9133_v12, %v9132_v7 }
 0x460   : > { %v3870_v11 = vcombine.high %v9129_v3, %v9128_v9 }
 0x462   : > { %1876 = vmatpush1.bf16.msra.mxu0 %v3959_v41  ;;  %1917 = vmatpush1.bf16.msra.mxu1 %v3961_v31  ;;  %v3867_v41 = vcombine.low %v9127_v2, %v9126_v0  ;;  %v3869_v31 = vcombine.low %v9129_v3, %v9128_v9  ;;  %v9136_v2 = vld [vmem:[#allocation77_spill] sm:$0xff]  ;;  %v9137_v3 = vld [vmem:[#allocation71_spill] sm:$0xff] }
 0x463   : > { %1943 = vmatprep.subr.bf16.mxu0 %v3852_v4  ;;  %1984 = vmatprep.subr.bf16.mxu1 %v3854_v15  ;;  %v9130_v15 = vld [vmem:[#allocation64_spill] sm:$0xff]  ;;  %v9131_v4 = vld [vmem:[#allocation59_spill] sm:$0xff]  ;;  %v3902_v9 = vcombine.high %v9137_v3, %v9136_v2 }
 0x464   : > { %v3884_v6 = vcombine.high %v9131_v4, %v9130_v15 }
 0x465   : > { %1894 = vmatmul.mubr.bf16.vlgmr.msra.gmra.mrb[8].mxu0 %v7162_v45  ;;  %1935 = vmatmul.mubr.bf16.vlgmr.msra.gmra.mrb[8].mxu1 %v7162_v45 }
 0x466   : > { %1944 = vmatpush1.bf16.msra.mxu0 %v3851_v5  ;;  %1985 = vmatpush1.bf16.msra.mxu1 %v3853_v52  ;;  %v3883_v5 = vcombine.low %v9131_v4, %v9130_v15  ;;  %v3885_v52 = vcombine.low %v9133_v12, %v9132_v7  ;;  %v9138_v4 = vld [vmem:[#allocation89_spill] sm:$0xff]  ;;  %v9139_v7 = vld [vmem:[#allocation82_spill] sm:$0xff]  ;;  %v9141_v12 = vld [vmem:[#allocation83_spill] sm:$0xff] }
 0x467   : > { %1945 = vmatprep.subr.bf16.mxu0 %v3868_v1  ;;  %1986 = vmatprep.subr.bf16.mxu1 %v3870_v11  ;;  %v9134_v11 = vld [vmem:[#allocation76_spill] sm:$0xff]  ;;  %v9135_v1 = vld [vmem:[#allocation70_spill] sm:$0xff] }
 0x468   : > { %1975 = vmatprep.mubr.bf16.mxu0 %v9101_v14  ;;  %2016 = vmatprep.mubr.bf16.mxu1 %v9101_v14  ;;  %v3900_v0 = vcombine.high %v9135_v1, %v9134_v11 }
 0x46a   : > { %1946 = vmatpush1.bf16.msra.mxu0 %v3867_v41  ;;  %1987 = vmatpush1.bf16.msra.mxu1 %v3869_v31  ;;  %v3899_v41 = vcombine.low %v9135_v1, %v9134_v11  ;;  %v3901_v31 = vcombine.low %v9137_v3, %v9136_v2  ;;  %v9142_v1 = vld [vmem:[#allocation104_spill] sm:$0xff]  ;;  %v9143_v2 = vld [vmem:[#allocation97_spill] sm:$0xff]  ;;  %v9145_v3 = vld [vmem:[#allocation98_spill] sm:$0xff] }
 0x46b   : > { %1947 = vmatprep.subr.bf16.mxu0 %v3884_v6  ;;  %1988 = vmatprep.subr.bf16.mxu1 %v3886_v13  ;;  %v3916_v6 = vcombine.high %v9139_v7, %v9138_v4  ;;  %v9140_v13 = vld [vmem:[#allocation90_spill] sm:$0xff] }
 0x46c   : > { %v3918_v15 = vcombine.high %v9141_v12, %v9140_v13 }
 0x46e   : > { %1948 = vmatpush1.bf16.msra.mxu0 %v3883_v5  ;;  %1989 = vmatpush1.bf16.msra.mxu1 %v3885_v52  ;;  %v3915_v5 = vcombine.low %v9139_v7, %v9138_v4  ;;  %v3917_v52 = vcombine.low %v9141_v12, %v9140_v13  ;;  %v9146_v4 = vld [vmem:[#allocation117_spill] sm:$0xff]  ;;  %v9147_v7 = vld [vmem:[#allocation110_spill] sm:$0xff]  ;;  %v9149_v12 = vld [vmem:[#allocation111_spill] sm:$0xff] }
 0x46f   : > { %1949 = vmatprep.subr.bf16.mxu0 %v3900_v0  ;;  %1990 = vmatprep.subr.bf16.mxu1 %v3902_v9  ;;  %v3932_v0 = vcombine.high %v9143_v2, %v9142_v1  ;;  %v9144_v9 = vld [vmem:[#allocation105_spill] sm:$0xff] }
 0x470   : > { %v3934_v11 = vcombine.high %v9145_v3, %v9144_v9 }
 0x472   : > { %1950 = vmatpush1.bf16.msra.mxu0 %v3899_v41  ;;  %1991 = vmatpush1.bf16.msra.mxu1 %v3901_v31  ;;  %v3931_v41 = vcombine.low %v9143_v2, %v9142_v1  ;;  %v3933_v31 = vcombine.low %v9145_v3, %v9144_v9  ;;  %v9150_v1 = vld [vmem:[#allocation132_spill] sm:$0xff]  ;;  %v9153_v3 = vld [vmem:[#allocation125_spill] sm:$0xff] }
 0x473   : > { %1951 = vmatprep.subr.bf16.mxu0 %v3916_v6  ;;  %1992 = vmatprep.subr.bf16.mxu1 %v3918_v15  ;;  %v3948_v6 = vcombine.high %v9147_v7, %v9146_v4  ;;  %v9148_v15 = vld [vmem:[#allocation118_spill] sm:$0xff]  ;;  %v9151_v2 = vld [vmem:[#allocation124_spill] sm:$0xff] }
 0x474   : > { %v3950_v13 = vcombine.high %v9149_v12, %v9148_v15 }
 0x476   : > { %1952 = vmatpush1.bf16.msra.mxu0 %v3915_v5  ;;  %1993 = vmatpush1.bf16.msra.mxu1 %v3917_v52  ;;  %v3947_v5 = vcombine.low %v9147_v7, %v9146_v4  ;;  %v3949_v52 = vcombine.low %v9149_v12, %v9148_v15  ;;  %v9154_v4 = vld [vmem:[#allocation135_spill] sm:$0xff]  ;;  %v9155_v7 = vld [vmem:[#allocation134_spill] sm:$0xff] }
 0x477   : > { %1953 = vmatprep.subr.bf16.mxu0 %v3932_v0  ;;  %1994 = vmatprep.subr.bf16.mxu1 %v3934_v11  ;;  %v3964_v0 = vcombine.high %v9151_v2, %v9150_v1  ;;  %v9152_v11 = vld [vmem:[#allocation133_spill] sm:$0xff]  ;;  %v9157_v12 = vld [vmem:[#allocation166_spill] sm:$0xff] }
 0x478   : > { %v3966_v9 = vcombine.high %v9153_v3, %v9152_v11 }
 0x47a   : > { %1954 = vmatpush1.bf16.msra.mxu0 %v3931_v41  ;;  %1995 = vmatpush1.bf16.msra.mxu1 %v3933_v31  ;;  %v3963_v41 = vcombine.low %v9151_v2, %v9150_v1  ;;  %v3965_v31 = vcombine.low %v9153_v3, %v9152_v11  ;;  %v9158_v1 = vld [vmem:[#allocation137_spill] sm:$0xff]  ;;  %v9159_v2 = vld [vmem:[#allocation136_spill] sm:$0xff] }
 0x47b   : > { %1955 = vmatprep.subr.bf16.mxu0 %v3948_v6  ;;  %1996 = vmatprep.subr.bf16.mxu1 %v3950_v13  ;;  %v3968_v6 = vcombine.high %v9155_v7, %v9154_v4  ;;  %v9156_v13 = vld [vmem:[#allocation167_spill] sm:$0xff]  ;;  %v9161_v3 = vld [vmem:[#allocation168_spill] sm:$0xff] }
 0x47c   : > { %v4000_v15 = vcombine.high %v9157_v12, %v9156_v13 }
 0x47e   : > { %1956 = vmatpush1.bf16.msra.mxu0 %v3947_v5  ;;  %1997 = vmatpush1.bf16.msra.mxu1 %v3949_v52  ;;  %v3967_v5 = vcombine.low %v9155_v7, %v9154_v4  ;;  %v3999_v52 = vcombine.low %v9157_v12, %v9156_v13  ;;  %v9164_v7 = vld [vmem:[#allocation171_spill] sm:$0xff]  ;;  %v9165_v12 = vld [vmem:[#allocation170_spill] sm:$0xff] }
 0x47f   : > { %1957 = vmatprep.subr.bf16.mxu0 %v3964_v0  ;;  %1998 = vmatprep.subr.bf16.mxu1 %v3966_v9  ;;  %v3970_v0 = vcombine.high %v9159_v2, %v9158_v1  ;;  %v9160_v9 = vld [vmem:[#allocation169_spill] sm:$0xff]  ;;  %v4004_v13 = vcombine.high %v9165_v12, %v9164_v7 }
 0x480   : > { %v4002_v11 = vcombine.high %v9161_v3, %v9160_v9 }
 0x482   : > { %1958 = vmatpush1.bf16.msra.mxu0 %v3963_v41  ;;  %1999 = vmatpush1.bf16.msra.mxu1 %v3965_v31  ;;  %v3969_v41 = vcombine.low %v9159_v2, %v9158_v1  ;;  %v4001_v31 = vcombine.low %v9161_v3, %v9160_v9  ;;  %v9167_v1 = vld [vmem:[#allocation140_spill] sm:$0xff]  ;;  %v9173_v9 = vld [vmem:[#allocation174_spill] sm:$0xff] }
 0x483   : > { %3311 = vmatprep.subr.bf16.mxu0 %v3968_v6  ;;  %3352 = vmatprep.subr.bf16.mxu1 %v4000_v15  ;;  %v9162_v15 = vld [vmem:[#allocation139_spill] sm:$0xff]  ;;  %v9163_v6 = vld [vmem:[#allocation138_spill] sm:$0xff]  ;;  %v9169_v2 = vld [vmem:[#allocation172_spill] sm:$0xff] }
 0x484   : > { %v3972_v4 = vcombine.high %v9163_v6, %v9162_v15 }
 0x485   : > { %1976 = vmatmul.mubr.bf16.vlgmr.msra.gmra.mrb[12].mxu0 %v7162_v45  ;;  %2017 = vmatmul.mubr.bf16.vlgmr.msra.gmra.mrb[12].mxu1 %v7162_v45  ;;  %v3971_v45 = vcombine.low %v9163_v6, %v9162_v15  ;;  %v9170_v6 = vld [vmem:[#allocation143_spill] sm:$0xff] }
 0x486   : > { %3312 = vmatpush1.bf16.msra.mxu0 %v3967_v5  ;;  %3353 = vmatpush1.bf16.msra.mxu1 %v3999_v52  ;;  %v4003_v5 = vcombine.low %v9165_v12, %v9164_v7  ;;  %v9166_v52 = vld [vmem:[#allocation141_spill] sm:$0xff]  ;;  %v9171_v7 = vld [vmem:[#allocation142_spill] sm:$0xff] }
 0x487   : > { %3313 = vmatprep.subr.bf16.mxu0 %v3970_v0  ;;  %3354 = vmatprep.subr.bf16.mxu1 %v4002_v11  ;;  %v3974_v0 = vcombine.high %v9167_v1, %v9166_v52  ;;  %v9168_v11 = vld [vmem:[#allocation173_spill] sm:$0xff] }
 0x488   : > { %v4006_v3 = vcombine.high %v9169_v2, %v9168_v11 }
 0x48a   : > { %3314 = vmatpush1.bf16.msra.mxu0 %v3969_v41  ;;  %3355 = vmatpush1.bf16.msra.mxu1 %v4001_v31  ;;  %v3973_v41 = vcombine.low %v9167_v1, %v9166_v52  ;;  %v4005_v31 = vcombine.low %v9169_v2, %v9168_v11  ;;  %v9174_v1 = vld [vmem:[#allocation145_spill] sm:$0xff]  ;;  %v9175_v2 = vld [vmem:[#allocation144_spill] sm:$0xff] }
 0x48b   : > { %3315 = vmatprep.subr.bf16.mxu0 %v3972_v4  ;;  %3356 = vmatprep.subr.bf16.mxu1 %v4004_v13  ;;  %v3976_v4 = vcombine.high %v9171_v7, %v9170_v6  ;;  %v9172_v13 = vld [vmem:[#allocation175_spill] sm:$0xff]  ;;  %v9177_v11 = vld [vmem:[#allocation176_spill] sm:$0xff] }
 0x48c   : > { %v4008_v12 = vcombine.high %v9173_v9, %v9172_v13 }
 0x48e   : > { %3316 = vmatpush1.bf16.msra.mxu0 %v3971_v45  ;;  %3357 = vmatpush1.bf16.msra.mxu1 %v4003_v5  ;;  %v3975_v45 = vcombine.low %v9171_v7, %v9170_v6  ;;  %v4007_v5 = vcombine.low %v9173_v9, %v9172_v13  ;;  %v9178_v6 = vld [vmem:[#allocation147_spill] sm:$0xff]  ;;  %v9179_v7 = vld [vmem:[#allocation146_spill] sm:$0xff] }
 0x48f   : > { %3317 = vmatprep.subr.bf16.mxu0 %v3974_v0  ;;  %3358 = vmatprep.subr.bf16.mxu1 %v4006_v3  ;;  %v3978_v0 = vcombine.high %v9175_v2, %v9174_v1  ;;  %v9176_v3 = vld [vmem:[#allocation177_spill] sm:$0xff]  ;;  %v9181_v9 = vld [vmem:[#allocation178_spill] sm:$0xff] }
 0x490   : > { %v4010_v15 = vcombine.high %v9177_v11, %v9176_v3 }
 0x492   : > { %3318 = vmatpush1.bf16.msra.mxu0 %v3973_v41  ;;  %3359 = vmatpush1.bf16.msra.mxu1 %v4005_v31  ;;  %v3977_v41 = vcombine.low %v9175_v2, %v9174_v1  ;;  %v4009_v31 = vcombine.low %v9177_v11, %v9176_v3  ;;  %v9182_v1 = vld [vmem:[#allocation149_spill] sm:$0xff]  ;;  %v9183_v2 = vld [vmem:[#allocation148_spill] sm:$0xff] }
 0x493   : > { %3319 = vmatprep.subr.bf16.mxu0 %v3976_v4  ;;  %3360 = vmatprep.subr.bf16.mxu1 %v4008_v12  ;;  %v3980_v4 = vcombine.high %v9179_v7, %v9178_v6  ;;  %v9180_v12 = vld [vmem:[#allocation179_spill] sm:$0xff]  ;;  %v9185_v3 = vld [vmem:[#allocation180_spill] sm:$0xff] }
 0x494   : > { %v4012_v13 = vcombine.high %v9181_v9, %v9180_v12 }
 0x496   : > { %3320 = vmatpush1.bf16.msra.mxu0 %v3975_v45  ;;  %3361 = vmatpush1.bf16.msra.mxu1 %v4007_v5  ;;  %v3979_v45 = vcombine.low %v9179_v7, %v9178_v6  ;;  %v4011_v5 = vcombine.low %v9181_v9, %v9180_v12  ;;  %v9186_v6 = vld [vmem:[#allocation151_spill] sm:$0xff]  ;;  %v9187_v7 = vld [vmem:[#allocation150_spill] sm:$0xff] }
 0x497   : > { %3321 = vmatprep.subr.bf16.mxu0 %v3978_v0  ;;  %3362 = vmatprep.subr.bf16.mxu1 %v4010_v15  ;;  %v3982_v0 = vcombine.high %v9183_v2, %v9182_v1  ;;  %v9184_v15 = vld [vmem:[#allocation181_spill] sm:$0xff]  ;;  %v9189_v9 = vld [vmem:[#allocation182_spill] sm:$0xff] }
 0x498   : > { %v4014_v11 = vcombine.high %v9185_v3, %v9184_v15 }
 0x49a   : > { %3322 = vmatpush1.bf16.msra.mxu0 %v3977_v41  ;;  %3363 = vmatpush1.bf16.msra.mxu1 %v4009_v31  ;;  %v3981_v41 = vcombine.low %v9183_v2, %v9182_v1  ;;  %v4013_v31 = vcombine.low %v9185_v3, %v9184_v15  ;;  %v9190_v1 = vld [vmem:[#allocation153_spill] sm:$0xff]  ;;  %v9191_v2 = vld [vmem:[#allocation152_spill] sm:$0xff] }
 0x49b   : > { %3323 = vmatprep.subr.bf16.mxu0 %v3980_v4  ;;  %3364 = vmatprep.subr.bf16.mxu1 %v4012_v13  ;;  %v3984_v4 = vcombine.high %v9187_v7, %v9186_v6  ;;  %v9188_v13 = vld [vmem:[#allocation183_spill] sm:$0xff]  ;;  %v9193_v3 = vld [vmem:[#allocation184_spill] sm:$0xff] }
 0x49c   : > { %v4016_v12 = vcombine.high %v9189_v9, %v9188_v13 }
 0x49e   : > { %3324 = vmatpush1.bf16.msra.mxu0 %v3979_v45  ;;  %3365 = vmatpush1.bf16.msra.mxu1 %v4011_v5  ;;  %v3983_v45 = vcombine.low %v9187_v7, %v9186_v6  ;;  %v4015_v5 = vcombine.low %v9189_v9, %v9188_v13  ;;  %v9194_v6 = vld [vmem:[#allocation155_spill] sm:$0xff]  ;;  %v9195_v7 = vld [vmem:[#allocation154_spill] sm:$0xff] }
 0x49f   : > { %3325 = vmatprep.subr.bf16.mxu0 %v3982_v0  ;;  %3366 = vmatprep.subr.bf16.mxu1 %v4014_v11  ;;  %v3986_v0 = vcombine.high %v9191_v2, %v9190_v1  ;;  %v9192_v11 = vld [vmem:[#allocation185_spill] sm:$0xff]  ;;  %v9197_v9 = vld [vmem:[#allocation186_spill] sm:$0xff] }
 0x4a0   : > { %v4018_v15 = vcombine.high %v9193_v3, %v9192_v11 }
 0x4a2   : > { %3326 = vmatpush1.bf16.msra.mxu0 %v3981_v41  ;;  %3367 = vmatpush1.bf16.msra.mxu1 %v4013_v31  ;;  %v3985_v41 = vcombine.low %v9191_v2, %v9190_v1  ;;  %v4017_v31 = vcombine.low %v9193_v3, %v9192_v11  ;;  %v9198_v1 = vld [vmem:[#allocation157_spill] sm:$0xff]  ;;  %v9199_v2 = vld [vmem:[#allocation156_spill] sm:$0xff] }
 0x4a3   : > { %3327 = vmatprep.subr.bf16.mxu0 %v3984_v4  ;;  %3368 = vmatprep.subr.bf16.mxu1 %v4016_v12  ;;  %v3988_v4 = vcombine.high %v9195_v7, %v9194_v6  ;;  %v9196_v12 = vld [vmem:[#allocation187_spill] sm:$0xff]  ;;  %v9201_v3 = vld [vmem:[#allocation188_spill] sm:$0xff] }
 0x4a4   : > { %v4020_v13 = vcombine.high %v9197_v9, %v9196_v12 }
 0x4a6   : > { %3328 = vmatpush1.bf16.msra.mxu0 %v3983_v45  ;;  %3369 = vmatpush1.bf16.msra.mxu1 %v4015_v5  ;;  %v3987_v45 = vcombine.low %v9195_v7, %v9194_v6  ;;  %v4019_v5 = vcombine.low %v9197_v9, %v9196_v12  ;;  %v9202_v6 = vld [vmem:[#allocation159_spill] sm:$0xff]  ;;  %v9203_v7 = vld [vmem:[#allocation158_spill] sm:$0xff] }
 0x4a7   : > { %3329 = vmatprep.subr.bf16.mxu0 %v3986_v0  ;;  %3370 = vmatprep.subr.bf16.mxu1 %v4018_v15  ;;  %v3990_v0 = vcombine.high %v9199_v2, %v9198_v1  ;;  %v9200_v15 = vld [vmem:[#allocation189_spill] sm:$0xff]  ;;  %v9205_v9 = vld [vmem:[#allocation190_spill] sm:$0xff] }
 0x4a8   : > { %v4022_v11 = vcombine.high %v9201_v3, %v9200_v15 }
 0x4aa   : > { %3330 = vmatpush1.bf16.msra.mxu0 %v3985_v41  ;;  %3371 = vmatpush1.bf16.msra.mxu1 %v4017_v31  ;;  %v3989_v41 = vcombine.low %v9199_v2, %v9198_v1  ;;  %v4021_v31 = vcombine.low %v9201_v3, %v9200_v15  ;;  %v9206_v1 = vld [vmem:[#allocation161_spill] sm:$0xff]  ;;  %v9207_v2 = vld [vmem:[#allocation160_spill] sm:$0xff] }
 0x4ab   : > { %3331 = vmatprep.subr.bf16.mxu0 %v3988_v4  ;;  %3372 = vmatprep.subr.bf16.mxu1 %v4020_v13  ;;  %v3992_v4 = vcombine.high %v9203_v7, %v9202_v6  ;;  %v9204_v13 = vld [vmem:[#allocation191_spill] sm:$0xff]  ;;  %v9209_v3 = vld [vmem:[#allocation192_spill] sm:$0xff] }
 0x4ac   : > { %v4024_v12 = vcombine.high %v9205_v9, %v9204_v13 }
 0x4ae   : > { %3332 = vmatpush1.bf16.msra.mxu0 %v3987_v45  ;;  %3373 = vmatpush1.bf16.msra.mxu1 %v4019_v5  ;;  %v3991_v45 = vcombine.low %v9203_v7, %v9202_v6  ;;  %v4023_v5 = vcombine.low %v9205_v9, %v9204_v13  ;;  %v9210_v6 = vld [vmem:[#allocation163_spill] sm:$0xff]  ;;  %v9211_v7 = vld [vmem:[#allocation162_spill] sm:$0xff] }
 0x4af   : > { %3333 = vmatprep.subr.bf16.mxu0 %v3990_v0  ;;  %3374 = vmatprep.subr.bf16.mxu1 %v4022_v11  ;;  %v3994_v0 = vcombine.high %v9207_v2, %v9206_v1  ;;  %v9208_v11 = vld [vmem:[#allocation193_spill] sm:$0xff]  ;;  %v9213_v9 = vld [vmem:[#allocation194_spill] sm:$0xff] }
 0x4b0   : > { %v4026_v15 = vcombine.high %v9209_v3, %v9208_v11 }
 0x4b2   : > { %3334 = vmatpush1.bf16.msra.mxu0 %v3989_v41  ;;  %3375 = vmatpush1.bf16.msra.mxu1 %v4021_v31  ;;  %v3993_v41 = vcombine.low %v9207_v2, %v9206_v1  ;;  %v4025_v31 = vcombine.low %v9209_v3, %v9208_v11  ;;  %v9214_v1 = vld [vmem:[#allocation165_spill] sm:$0xff]  ;;  %v9215_v2 = vld [vmem:[#allocation164_spill] sm:$0xff] }
 0x4b3   : > { %3335 = vmatprep.subr.bf16.mxu0 %v3992_v4  ;;  %3376 = vmatprep.subr.bf16.mxu1 %v4024_v12  ;;  %v3996_v4 = vcombine.high %v9211_v7, %v9210_v6  ;;  %v9212_v12 = vld [vmem:[#allocation195_spill] sm:$0xff]  ;;  %v9217_v3 = vld [vmem:[#allocation196_spill] sm:$0xff] }
 0x4b4   : > { %v4028_v13 = vcombine.high %v9213_v9, %v9212_v12 }
 0x4b6   : > { %3336 = vmatpush1.bf16.msra.mxu0 %v3991_v45  ;;  %3377 = vmatpush1.bf16.msra.mxu1 %v4023_v5  ;;  %v3995_v45 = vcombine.low %v9211_v7, %v9210_v6  ;;  %v4027_v5 = vcombine.low %v9213_v9, %v9212_v12  ;;  %v9218_v6 = vld [vmem:[#allocation199_spill] sm:$0xff]  ;;  %v9219_v7 = vld [vmem:[#allocation198_spill] sm:$0xff] }
 0x4b7   : > { %3337 = vmatprep.subr.bf16.mxu0 %v3994_v0  ;;  %3378 = vmatprep.subr.bf16.mxu1 %v4026_v15  ;;  %v3998_v0 = vcombine.high %v9215_v2, %v9214_v1  ;;  %v9216_v15 = vld [vmem:[#allocation197_spill] sm:$0xff]  ;;  %v9221_v9 = vld [vmem:[#allocation230_spill] sm:$0xff] }
 0x4b8   : > { %v4030_v11 = vcombine.high %v9217_v3, %v9216_v15 }
 0x4ba   : > { %3338 = vmatpush1.bf16.msra.mxu0 %v3993_v41  ;;  %3379 = vmatpush1.bf16.msra.mxu1 %v4025_v31  ;;  %v3997_v41 = vcombine.low %v9215_v2, %v9214_v1  ;;  %v4029_v31 = vcombine.low %v9217_v3, %v9216_v15  ;;  %v9223_v1 = vld [vmem:[#allocation391_spill] sm:$0xff]  ;;  %v9225_v15 = vld [vmem:[#allocation392_spill] sm:$0xff] }
 0x4bb   : > { %3339 = vmatprep.subr.bf16.mxu0 %v3996_v4  ;;  %3380 = vmatprep.subr.bf16.mxu1 %v4028_v13  ;;  %v4032_v4 = vcombine.high %v9219_v7, %v9218_v6  ;;  %v9220_v13 = vld [vmem:[#allocation231_spill] sm:$0xff] }
 0x4bc   : > { %v4064_v12 = vcombine.high %v9221_v9, %v9220_v13 }
 0x4be   : > { %3340 = vmatpush1.bf16.msra.mxu0 %v3995_v45  ;;  %3381 = vmatpush1.bf16.msra.mxu1 %v4027_v5 }
 0x4bf   : > { %3341 = vmatprep.subr.bf16.mxu0 %v3998_v0  ;;  %3382 = vmatprep.subr.bf16.mxu1 %v4030_v11  ;;  %v9224_v0 = vld [vmem:[#allocation390_spill] sm:$0xff] }
 0x4c2   : > { %3342 = vmatpush1.bf16.msra.mxu0 %v3997_v41  ;;  %3383 = vmatpush1.bf16.msra.mxu1 %v4029_v31 }
 0x4c3   : > { %3393 = vmatprep.subr.bf16.mxu0 %v4032_v4  ;;  %3434 = vmatprep.subr.bf16.mxu1 %v4064_v12 }
 0x4f8   : > { %v1731_v45 = vpop.f32.mrb[0].mxu0  ;;  %v1772_v5 = vpop.f32.mrb[0].mxu1 }
 0x4f9   : > { %v1732_v17 = vadd.f32 %v1731_v45, %v9222_v16  ;;  %v1773_v2 = vadd.f32 %v1772_v5, %v9223_v1  ;;  %v1733_v18 = vpop.f32.mrb[1].mxu0  ;;  %v1774_v3 = vpop.f32.mrb[1].mxu1  ;;  %v4031_v16 = vcombine.low %v9219_v7, %v9218_v6  ;;  %v4063_v1 = vcombine.low %v9221_v9, %v9220_v13  ;;  %v9226_v45 = vld [vmem:[#allocation201_spill] sm:$0xff]  ;;  %v9243_v6 = vld [vmem:[#allocation208_spill] sm:$0xff] }
 0x4fa   : > { %v1734_v11 = vadd.f32 %v1733_v18, %v9224_v0  ;;  %v1775_v19 = vadd.f32 %v1774_v3, %v9225_v15  ;;  %v1735_v20 = vpop.f32.mrb[2].mxu0  ;;  %v1776_v21 = vpop.f32.mrb[2].mxu1  ;;  %v9227_v3 = vld [vmem:[#allocation200_spill] sm:$0xff]  ;;  %v9231_v15 = vld [vmem:[#allocation202_spill] sm:$0xff]  ;;  %v9232_v0 = vld [vmem:[#allocation235_spill] sm:$0xff] }
 0x4fb   : > { %v2025_v22 = vmax.f32 %v1732_v17, 0.0  ;;  %v2027_v23 = vmax.f32 %v1773_v2, 0.0  ;;  %v1736_v41 = vpop.f32.mrb[3].mxu0  ;;  %v1777_v31 = vpop.f32.mrb[3].mxu1  ;;  %v4034_v20 = vcombine.high %v9227_v3, %v9226_v45  ;;  %v9228_v21 = vld [vmem:[#allocation233_spill] sm:$0xff]  ;;  %v9229_v17 = vld [vmem:[#allocation232_spill] sm:$0xff] }
 0x4fc   : > { %v2026_v4 = vmax.f32 %v1734_v11, 0.0  ;;  %v2028_v12 = vmax.f32 %v1775_v19, 0.0  ;;  %v4066_v2 = vcombine.high %v9229_v17, %v9228_v21  ;;  %v4033_v19 = vcombine.low %v9227_v3, %v9226_v45  ;;  %v9233_v11 = vld [vmem:[#allocation234_spill] sm:$0xff]  ;;  %v9235_v31 = vld [vmem:[#allocation204_spill] sm:$0xff]  ;;  %v9242_v3 = vld [vmem:[#allocation209_spill] sm:$0xff] }
 0x4fd   : > { %v2043_v25 = vpack.c.bf16 %v2027_v23, %v2027_v23  ;;  %v2041_v18 = vpack.c.bf16 %v2025_v22, %v2025_v22  ;;  %v4065_v23 = vcombine.low %v9229_v17, %v9228_v21  ;;  %v9230_v22 = vld [vmem:[#allocation203_spill] sm:$0xff]  ;;  %v4068_v41 = vcombine.high %v9233_v11, %v9232_v0  ;;  %v9245_v7 = vld [vmem:[#allocation240_spill] sm:$0xff]  ;;  %v9257_v21 = vld [vmem:[#allocation214_spill] sm:$0xff] }
 0x4fe   : > { %v2042_v26 = vpack.c.bf16 %v2026_v4, %v2026_v4  ;;  %v2044_v27 = vpack.c.bf16 %v2028_v12, %v2028_v12  ;;  %v4036_v5 = vcombine.high %v9231_v15, %v9230_v22  ;;  %v9236_v12 = vld [vmem:[#allocation237_spill] sm:$0xff] }
 0x500   : > { %3343 = vmatprep.mubr.bf16.mxu0 %v2042_v26  ;;  %3384 = vmatprep.mubr.bf16.mxu1 %v2044_v27  ;;  %v4067_v26 = vcombine.low %v9233_v11, %v9232_v0  ;;  %v9234_v27 = vld [vmem:[#allocation205_spill] sm:$0xff]  ;;  %v9249_v11 = vld [vmem:[#allocation242_spill] sm:$0xff] }
 0x501   : > { %3344 = vmatmul.mubr.bf16.vlgmr.msra.gmra.mrb[16].mxu0 %v2041_v18  ;;  %3385 = vmatmul.mubr.bf16.vlgmr.msra.gmra.mrb[16].mxu1 %v2043_v25  ;;  %v4035_v25 = vcombine.low %v9231_v15, %v9230_v22  ;;  %v4038_v4 = vcombine.high %v9235_v31, %v9234_v27  ;;  %v4037_v18 = vcombine.low %v9235_v31, %v9234_v27  ;;  %v9258_v27 = vld [vmem:[#allocation247_spill] sm:$0xff] }
 0x502   : > { %3394 = vmatpush1.bf16.msra.mxu0 %v4031_v16  ;;  %3435 = vmatpush1.bf16.msra.mxu1 %v4063_v1  ;;  %v9237_v16 = vld [vmem:[#allocation236_spill] sm:$0xff] }
 0x503   : > { %3395 = vmatprep.subr.bf16.mxu0 %v4034_v20  ;;  %3436 = vmatprep.subr.bf16.mxu1 %v4066_v2  ;;  %v4070_v1 = vcombine.high %v9237_v16, %v9236_v12  ;;  %v4069_v20 = vcombine.low %v9237_v16, %v9236_v12  ;;  %v9238_v2 = vld [vmem:[#allocation207_spill] sm:$0xff] }
 0x506   : > { %3396 = vmatpush1.bf16.msra.mxu0 %v4033_v19  ;;  %3437 = vmatpush1.bf16.msra.mxu1 %v4065_v23  ;;  %v9239_v19 = vld [vmem:[#allocation206_spill] sm:$0xff] }
 0x507   : > { %3397 = vmatprep.subr.bf16.mxu0 %v4036_v5  ;;  %3438 = vmatprep.subr.bf16.mxu1 %v4068_v41  ;;  %v4040_v23 = vcombine.high %v9239_v19, %v9238_v2  ;;  %v9240_v5 = vld [vmem:[#allocation239_spill] sm:$0xff]  ;;  %v9241_v41 = vld [vmem:[#allocation238_spill] sm:$0xff] }
 0x508   : > { %v4072_v0 = vcombine.high %v9241_v41, %v9240_v5 }
 0x50a   : > { %3398 = vmatpush1.bf16.msra.mxu0 %v4035_v25  ;;  %3439 = vmatpush1.bf16.msra.mxu1 %v4067_v26  ;;  %v4039_v25 = vcombine.low %v9239_v19, %v9238_v2  ;;  %v4071_v26 = vcombine.low %v9241_v41, %v9240_v5  ;;  %v9246_v2 = vld [vmem:[#allocation211_spill] sm:$0xff]  ;;  %v9247_v5 = vld [vmem:[#allocation210_spill] sm:$0xff] }
 0x50b   : > { %3399 = vmatprep.subr.bf16.mxu0 %v4038_v4  ;;  %3440 = vmatprep.subr.bf16.mxu1 %v4070_v1  ;;  %v4042_v4 = vcombine.high %v9243_v6, %v9242_v3  ;;  %v9244_v1 = vld [vmem:[#allocation241_spill] sm:$0xff]  ;;  %v9256_v19 = vld [vmem:[#allocation215_spill] sm:$0xff] }
 0x50c   : > { %v4074_v9 = vcombine.high %v9245_v7, %v9244_v1  ;;  %v4048_v22 = vcombine.high %v9257_v21, %v9256_v19 }
 0x50e   : > { %3400 = vmatpush1.bf16.msra.mxu0 %v4037_v18  ;;  %3441 = vmatpush1.bf16.msra.mxu1 %v4069_v20  ;;  %v4041_v18 = vcombine.low %v9243_v6, %v9242_v3  ;;  %v4073_v20 = vcombine.low %v9245_v7, %v9244_v1  ;;  %v9250_v3 = vld [vmem:[#allocation213_spill] sm:$0xff]  ;;  %v9251_v1 = vld [vmem:[#allocation212_spill] sm:$0xff] }
 0x50f   : > { %3401 = vmatprep.subr.bf16.mxu0 %v4040_v23  ;;  %3442 = vmatprep.subr.bf16.mxu1 %v4072_v0  ;;  %v4044_v23 = vcombine.high %v9247_v5, %v9246_v2  ;;  %v9248_v0 = vld [vmem:[#allocation243_spill] sm:$0xff]  ;;  %v9253_v6 = vld [vmem:[#allocation244_spill] sm:$0xff] }
 0x510   : > { %v4076_v12 = vcombine.high %v9249_v11, %v9248_v0 }
 0x512   : > { %3402 = vmatpush1.bf16.msra.mxu0 %v4039_v25  ;;  %3443 = vmatpush1.bf16.msra.mxu1 %v4071_v26  ;;  %v4043_v25 = vcombine.low %v9247_v5, %v9246_v2  ;;  %v4075_v26 = vcombine.low %v9249_v11, %v9248_v0  ;;  %v9255_v11 = vld [vmem:[#allocation396_spill] sm:$0xff] }
 0x513   : > { %3403 = vmatprep.subr.bf16.mxu0 %v4042_v4  ;;  %3444 = vmatprep.subr.bf16.mxu1 %v4074_v9  ;;  %v4046_v4 = vcombine.high %v9251_v1, %v9250_v3  ;;  %v9252_v9 = vld [vmem:[#allocation245_spill] sm:$0xff] }
 0x514   : > { %v4078_v7 = vcombine.high %v9253_v6, %v9252_v9 }
 0x516   : > { %3404 = vmatpush1.bf16.msra.mxu0 %v4041_v18  ;;  %3445 = vmatpush1.bf16.msra.mxu1 %v4073_v20  ;;  %v4045_v18 = vcombine.low %v9251_v1, %v9250_v3  ;;  %v9259_v1 = vld [vmem:[#allocation246_spill] sm:$0xff] }
 0x517   : > { %3405 = vmatprep.subr.bf16.mxu0 %v4044_v23  ;;  %3446 = vmatprep.subr.bf16.mxu1 %v4076_v12  ;;  %v4077_v12 = vcombine.low %v9253_v6, %v9252_v9  ;;  %v9254_v23 = vld [vmem:[#allocation394_spill] sm:$0xff]  ;;  %v4080_v3 = vcombine.high %v9259_v1, %v9258_v27  ;;  %v4047_v6 = vcombine.low %v9257_v21, %v9256_v19  ;;  %v9284_v19 = vld [vmem:[#allocation393_spill] sm:$0xff]  ;;  %v9285_v21 = vld [vmem:[#allocation395_spill] sm:$0xff] }
 0x518   : > { %v7558_v13 = vpop.f32.mrb[4].mxu0  ;;  %v7560_v15 = vpop.f32.mrb[4].mxu1 }
 0x519   : > { %v1815_v20 = vpop.f32.mrb[5].mxu0  ;;  %v1856_v2 = vpop.f32.mrb[5].mxu1 }
 0x51a   : > { %3406 = vmatpush1.bf16.msra.mxu0 %v4043_v25  ;;  %3447 = vmatpush1.bf16.msra.mxu1 %v4075_v26  ;;  %v1816_v0 = vadd.f32 %v1815_v20, %v9254_v23  ;;  %v1817_v5 = vpop.f32.mrb[6].mxu0  ;;  %v1857_v16 = vadd.f32 %v1856_v2, %v9255_v11  ;;  %v1858_v17 = vpop.f32.mrb[6].mxu1  ;;  %v9260_v2 = vld [vmem:[#allocation217_spill] sm:$0xff] }
 0x51b   : > { %3407 = vmatprep.subr.bf16.mxu0 %v4046_v4  ;;  %3448 = vmatprep.subr.bf16.mxu1 %v4078_v7  ;;  %v1818_v28 = vpop.f32.mrb[7].mxu0  ;;  %v1859_v25 = vpop.f32.mrb[7].mxu1  ;;  %v4079_v17 = vcombine.low %v9259_v1, %v9258_v27  ;;  %v9261_v5 = vld [vmem:[#allocation216_spill] sm:$0xff]  ;;  %v9262_v20 = vld [vmem:[#allocation249_spill] sm:$0xff] }
 0x51c   : > { %v2030_v26 = vmax.f32 %v1816_v0, 0.0  ;;  %v2032_v29 = vmax.f32 %v1857_v16, 0.0  ;;  %v4050_v4 = vcombine.high %v9261_v5, %v9260_v2  ;;  %v9263_v28 = vld [vmem:[#allocation248_spill] sm:$0xff]  ;;  %v4049_v16 = vcombine.low %v9261_v5, %v9260_v2  ;;  %v9272_v2 = vld [vmem:[#allocation223_spill] sm:$0xff]  ;;  %v9275_v5 = vld [vmem:[#allocation254_spill] sm:$0xff] }
 0x51d   : > { %v4082_v23 = vcombine.high %v9263_v28, %v9262_v20  ;;  %v4081_v0 = vcombine.low %v9263_v28, %v9262_v20  ;;  %v1814_v20 = vadd.f32 %v7558_v13, %v9284_v19  ;;  %v9293_v28 = vld [vmem:[#allocation295_spill] sm:$0xff] }
 0x51e   : > { %3408 = vmatpush1.bf16.msra.mxu0 %v4045_v18  ;;  %3449 = vmatpush1.bf16.msra.mxu1 %v4077_v12  ;;  %v2046_v11 = vpack.c.bf16 %v2030_v26, %v2030_v26  ;;  %v2048_v7 = vpack.c.bf16 %v2032_v29, %v2032_v29  ;;  %v9264_v29 = vld [vmem:[#allocation219_spill] sm:$0xff]  ;;  %v9267_v12 = vld [vmem:[#allocation250_spill] sm:$0xff] }
 0x51f   : > { %3409 = vmatprep.subr.bf16.mxu0 %v4048_v22  ;;  %3450 = vmatprep.subr.bf16.mxu1 %v4080_v3  ;;  %v9265_v3 = vld [vmem:[#allocation218_spill] sm:$0xff]  ;;  %v9266_v18 = vld [vmem:[#allocation251_spill] sm:$0xff] }
 0x520   : > { %3425 = vmatprep.mubr.bf16.mxu0 %v2046_v11  ;;  %3466 = vmatprep.mubr.bf16.mxu1 %v2048_v7  ;;  %v4052_v22 = vcombine.high %v9265_v3, %v9264_v29  ;;  %v4084_v25 = vcombine.high %v9267_v12, %v9266_v18  ;;  %v4083_v26 = vcombine.low %v9267_v12, %v9266_v18  ;;  %v9269_v11 = vld [vmem:[#allocation220_spill] sm:$0xff] }
 0x521   : > { %v9279_v12 = vld [vmem:[#allocation256_spill] sm:$0xff] }
 0x522   : > { %3410 = vmatpush1.bf16.msra.mxu0 %v4047_v6  ;;  %3451 = vmatpush1.bf16.msra.mxu1 %v4079_v17  ;;  %v4051_v6 = vcombine.low %v9265_v3, %v9264_v29  ;;  %v9268_v17 = vld [vmem:[#allocation221_spill] sm:$0xff]  ;;  %v9273_v3 = vld [vmem:[#allocation222_spill] sm:$0xff] }
 0x523   : > { %3411 = vmatprep.subr.bf16.mxu0 %v4050_v4  ;;  %3452 = vmatprep.subr.bf16.mxu1 %v4082_v23  ;;  %v4054_v7 = vcombine.high %v9269_v11, %v9268_v17  ;;  %v9270_v4 = vld [vmem:[#allocation253_spill] sm:$0xff]  ;;  %v9271_v23 = vld [vmem:[#allocation252_spill] sm:$0xff] }
 0x524   : > { %v4086_v1 = vcombine.high %v9271_v23, %v9270_v4 }
 0x526   : > { %3412 = vmatpush1.bf16.msra.mxu0 %v4049_v16  ;;  %3453 = vmatpush1.bf16.msra.mxu1 %v4081_v0  ;;  %v4053_v16 = vcombine.low %v9269_v11, %v9268_v17  ;;  %v4085_v0 = vcombine.low %v9271_v23, %v9270_v4  ;;  %v9276_v11 = vld [vmem:[#allocation225_spill] sm:$0xff]  ;;  %v9277_v4 = vld [vmem:[#allocation224_spill] sm:$0xff] }
 0x527   : > { %3413 = vmatprep.subr.bf16.mxu0 %v4052_v22  ;;  %3454 = vmatprep.subr.bf16.mxu1 %v4084_v25  ;;  %v4056_v22 = vcombine.high %v9273_v3, %v9272_v2  ;;  %v9274_v25 = vld [vmem:[#allocation255_spill] sm:$0xff] }
 0x528   : > { %v4088_v9 = vcombine.high %v9275_v5, %v9274_v25 }
 0x52a   : > { %3414 = vmatpush1.bf16.msra.mxu0 %v4051_v6  ;;  %3455 = vmatpush1.bf16.msra.mxu1 %v4083_v26  ;;  %v4055_v6 = vcombine.low %v9273_v3, %v9272_v2  ;;  %v4087_v26 = vcombine.low %v9275_v5, %v9274_v25  ;;  %v9280_v2 = vld [vmem:[#allocation227_spill] sm:$0xff]  ;;  %v9281_v3 = vld [vmem:[#allocation226_spill] sm:$0xff] }
 0x52b   : > { %3415 = vmatprep.subr.bf16.mxu0 %v4054_v7  ;;  %3456 = vmatprep.subr.bf16.mxu1 %v4086_v1  ;;  %v4058_v7 = vcombine.high %v9277_v4, %v9276_v11  ;;  %v9278_v1 = vld [vmem:[#allocation257_spill] sm:$0xff]  ;;  %v9283_v5 = vld [vmem:[#allocation258_spill] sm:$0xff] }
 0x52c   : > { %v4090_v17 = vcombine.high %v9279_v12, %v9278_v1 }
 0x52e   : > { %3416 = vmatpush1.bf16.msra.mxu0 %v4053_v16  ;;  %3457 = vmatpush1.bf16.msra.mxu1 %v4085_v0  ;;  %v4057_v16 = vcombine.low %v9277_v4, %v9276_v11  ;;  %v4089_v0 = vcombine.low %v9279_v12, %v9278_v1  ;;  %v9287_v1 = vld [vmem:[#allocation228_spill] sm:$0xff]  ;;  %v9288_v11 = vld [vmem:[#allocation261_spill] sm:$0xff] }
 0x52f   : > { %3417 = vmatprep.subr.bf16.mxu0 %v4056_v22  ;;  %3458 = vmatprep.subr.bf16.mxu1 %v4088_v9  ;;  %v4060_v22 = vcombine.high %v9281_v3, %v9280_v2  ;;  %v9282_v9 = vld [vmem:[#allocation259_spill] sm:$0xff]  ;;  %v9289_v12 = vld [vmem:[#allocation260_spill] sm:$0xff] }
 0x530   : > { %v4092_v18 = vcombine.high %v9283_v5, %v9282_v9  ;;  %v4094_v23 = vcombine.high %v9289_v12, %v9288_v11 }
 0x532   : > { %3418 = vmatpush1.bf16.msra.mxu0 %v4055_v6  ;;  %3459 = vmatpush1.bf16.msra.mxu1 %v4087_v26  ;;  %v1855_v6 = vadd.f32 %v7560_v15, %v9285_v21  ;;  %v4059_v26 = vcombine.low %v9281_v3, %v9280_v2  ;;  %v2029_v21 = vmax.f32 %v1814_v20, 0.0  ;;  %v9291_v20 = vld [vmem:[#allocation263_spill] sm:$0xff] }
 0x533   : > { %3419 = vmatprep.subr.bf16.mxu0 %v4058_v7  ;;  %3460 = vmatprep.subr.bf16.mxu1 %v4090_v17  ;;  %v4091_v17 = vcombine.low %v9283_v5, %v9282_v9  ;;  %v9286_v7 = vld [vmem:[#allocation229_spill] sm:$0xff] }
 0x534   : > { %v4062_v4 = vcombine.high %v9287_v1, %v9286_v7  ;;  %v2031_v15 = vmax.f32 %v1855_v6, 0.0  ;;  %v9292_v6 = vld [vmem:[#allocation262_spill] sm:$0xff]  ;;  %v2045_v31 = vpack.c.bf16 %v2029_v21, %v2029_v21 }
 0x535   : > { %v4096_v27 = vcombine.high %v9292_v6, %v9291_v20 }
 0x536   : > { %3420 = vmatpush1.bf16.msra.mxu0 %v4057_v16  ;;  %3461 = vmatpush1.bf16.msra.mxu1 %v4089_v0  ;;  %v4061_v16 = vcombine.low %v9287_v1, %v9286_v7  ;;  %v9294_v1 = vld [vmem:[#allocation294_spill] sm:$0xff] }
 0x537   : > { %3421 = vmatprep.subr.bf16.mxu0 %v4060_v22  ;;  %3462 = vmatprep.subr.bf16.mxu1 %v4092_v18  ;;  %v4093_v18 = vcombine.low %v9289_v12, %v9288_v11  ;;  %v9290_v22 = vld [vmem:[#allocation398_spill] sm:$0xff]  ;;  %v4128_v7 = vcombine.high %v9294_v1, %v9293_v28  ;;  %v2047_v11 = vpack.c.bf16 %v2031_v15, %v2031_v15  ;;  %v9315_v12 = vld [vmem:[#allocation275_spill] sm:$0xff] }
 0x538   : > { %v7632_v13 = vpop.f32.mrb[8].mxu0  ;;  %v7634_v19 = vpop.f32.mrb[8].mxu1 }
 0x539   : > { %v1897_v0 = vpop.f32.mrb[9].mxu0  ;;  %v1938_v2 = vpop.f32.mrb[9].mxu1 }
 0x53a   : > { %3422 = vmatpush1.bf16.msra.mxu0 %v4059_v26  ;;  %3463 = vmatpush1.bf16.msra.mxu1 %v4091_v17  ;;  %v1898_v3 = vadd.f32 %v1897_v0, %v9290_v22  ;;  %v1899_v5 = vpop.f32.mrb[10].mxu0  ;;  %v1939_v9 = vadd.f32 %v1938_v2, %v7054_v53  ;;  %v1940_v25 = vpop.f32.mrb[10].mxu1  ;;  %v4095_v2 = vcombine.low %v9292_v6, %v9291_v20  ;;  %v9297_v0 = vld [vmem:[#allocation297_spill] sm:$0xff] }
 0x53b   : > { %3423 = vmatprep.subr.bf16.mxu0 %v4062_v4  ;;  %3464 = vmatprep.subr.bf16.mxu1 %v4094_v23  ;;  %v1900_v29 = vpop.f32.mrb[11].mxu0  ;;  %v1941_v26 = vpop.f32.mrb[11].mxu1  ;;  %v4127_v5 = vcombine.low %v9294_v1, %v9293_v28  ;;  %v9295_v4 = vld [vmem:[#allocation265_spill] sm:$0xff]  ;;  %v9296_v23 = vld [vmem:[#allocation264_spill] sm:$0xff] }
 0x53c   : > { %v2034_v17 = vmax.f32 %v1898_v3, 0.0  ;;  %v2036_v30 = vmax.f32 %v1939_v9, 0.0  ;;  %v4098_v25 = vcombine.high %v9296_v23, %v9295_v4  ;;  %v9298_v29 = vld [vmem:[#allocation296_spill] sm:$0xff]  ;;  %v4097_v21 = vcombine.low %v9296_v23, %v9295_v4  ;;  %v9302_v26 = vld [vmem:[#allocation298_spill] sm:$0xff]  ;;  %v9311_v6 = vld [vmem:[#allocation273_spill] sm:$0xff] }
 0x53d   : > { %v4130_v22 = vcombine.high %v9298_v29, %v9297_v0  ;;  %v4129_v15 = vcombine.low %v9298_v29, %v9297_v0  ;;  %v9310_v0 = vld [vmem:[#allocation302_spill] sm:$0xff] }
 0x53e   : > { %3424 = vmatpush1.bf16.msra.mxu0 %v4061_v16  ;;  %3465 = vmatpush1.bf16.msra.mxu1 %v4093_v18  ;;  %v2050_v3 = vpack.c.bf16 %v2034_v17, %v2034_v17  ;;  %v2052_v9 = vpack.c.bf16 %v2036_v30, %v2036_v30  ;;  %v9301_v18 = vld [vmem:[#allocation299_spill] sm:$0xff]  ;;  %v9304_v17 = vld [vmem:[#allocation268_spill] sm:$0xff]  ;;  %v9326_v23 = vld [vmem:[#allocation310_spill] sm:$0xff] }
 0x53f   : > { %3475 = vmatprep.subr.bf16.mxu0 %v4096_v27  ;;  %3516 = vmatprep.subr.bf16.mxu1 %v4128_v7  ;;  %v9299_v27 = vld [vmem:[#allocation267_spill] sm:$0xff]  ;;  %v9300_v7 = vld [vmem:[#allocation266_spill] sm:$0xff]  ;;  %v4132_v1 = vcombine.high %v9302_v26, %v9301_v18 }
 0x540   : > { %v4100_v16 = vcombine.high %v9300_v7, %v9299_v27  ;;  %v4099_v30 = vcombine.low %v9300_v7, %v9299_v27  ;;  %v9314_v7 = vld [vmem:[#allocation304_spill] sm:$0xff] }
 0x541   : > { %3426 = vmatmul.mubr.bf16.vlgmr.msra.gmra.mrb[20].mxu0 %v2045_v31  ;;  %3467 = vmatmul.mubr.bf16.vlgmr.msra.gmra.mrb[20].mxu1 %v2047_v11  ;;  %v4131_v31 = vcombine.low %v9302_v26, %v9301_v18  ;;  %v9303_v11 = vld [vmem:[#allocation269_spill] sm:$0xff] }
 0x542   : > { %3476 = vmatpush1.bf16.msra.mxu0 %v4095_v2  ;;  %3517 = vmatpush1.bf16.msra.mxu1 %v4127_v5  ;;  %v4102_v2 = vcombine.high %v9304_v17, %v9303_v11  ;;  %v9305_v5 = vld [vmem:[#allocation301_spill] sm:$0xff] }
 0x543   : > { %3477 = vmatprep.subr.bf16.mxu0 %v4098_v25  ;;  %3518 = vmatprep.subr.bf16.mxu1 %v4130_v22  ;;  %v9306_v25 = vld [vmem:[#allocation300_spill] sm:$0xff] }
 0x544   : > { %3507 = vmatprep.mubr.bf16.mxu0 %v2050_v3  ;;  %3548 = vmatprep.mubr.bf16.mxu1 %v2052_v9  ;;  %v4134_v22 = vcombine.high %v9306_v25, %v9305_v5  ;;  %v4101_v3 = vcombine.low %v9304_v17, %v9303_v11  ;;  %v4133_v9 = vcombine.low %v9306_v25, %v9305_v5  ;;  %v9312_v5 = vld [vmem:[#allocation272_spill] sm:$0xff] }
 0x546   : > { %3478 = vmatpush1.bf16.msra.mxu0 %v4097_v21  ;;  %3519 = vmatpush1.bf16.msra.mxu1 %v4129_v15  ;;  %v9307_v21 = vld [vmem:[#allocation271_spill] sm:$0xff]  ;;  %v9308_v15 = vld [vmem:[#allocation270_spill] sm:$0xff] }
 0x547   : > { %3479 = vmatprep.subr.bf16.mxu0 %v4100_v16  ;;  %3520 = vmatprep.subr.bf16.mxu1 %v4132_v1  ;;  %v4104_v16 = vcombine.high %v9308_v15, %v9307_v21  ;;  %v9309_v1 = vld [vmem:[#allocation303_spill] sm:$0xff] }
 0x548   : > { %v4136_v4 = vcombine.high %v9310_v0, %v9309_v1 }
 0x54a   : > { %3480 = vmatpush1.bf16.msra.mxu0 %v4099_v30  ;;  %3521 = vmatpush1.bf16.msra.mxu1 %v4131_v31  ;;  %v4103_v30 = vcombine.low %v9308_v15, %v9307_v21  ;;  %v4135_v31 = vcombine.low %v9310_v0, %v9309_v1  ;;  %v9316_v0 = vld [vmem:[#allocation274_spill] sm:$0xff] }
 0x54b   : > { %3481 = vmatprep.subr.bf16.mxu0 %v4102_v2  ;;  %3522 = vmatprep.subr.bf16.mxu1 %v4134_v22  ;;  %v4106_v2 = vcombine.high %v9312_v5, %v9311_v6  ;;  %v9313_v22 = vld [vmem:[#allocation305_spill] sm:$0xff]  ;;  %v9318_v1 = vld [vmem:[#allocation306_spill] sm:$0xff] }
 0x54c   : > { %v4138_v11 = vcombine.high %v9314_v7, %v9313_v22 }
 0x54e   : > { %3482 = vmatpush1.bf16.msra.mxu0 %v4101_v3  ;;  %3523 = vmatpush1.bf16.msra.mxu1 %v4133_v9  ;;  %v4105_v3 = vcombine.low %v9312_v5, %v9311_v6  ;;  %v4137_v9 = vcombine.low %v9314_v7, %v9313_v22  ;;  %v9319_v5 = vld [vmem:[#allocation277_spill] sm:$0xff]  ;;  %v9320_v6 = vld [vmem:[#allocation276_spill] sm:$0xff]  ;;  %v9325_v22 = vld [vmem:[#allocation311_spill] sm:$0xff] }
 0x54f   : > { %3483 = vmatprep.subr.bf16.mxu0 %v4104_v16  ;;  %3524 = vmatprep.subr.bf16.mxu1 %v4136_v4  ;;  %v4108_v16 = vcombine.high %v9316_v0, %v9315_v12  ;;  %v9317_v4 = vld [vmem:[#allocation307_spill] sm:$0xff]  ;;  %v9322_v7 = vld [vmem:[#allocation308_spill] sm:$0xff]  ;;  %v4144_v25 = vcombine.high %v9326_v23, %v9325_v22 }
 0x550   : > { %v4140_v15 = vcombine.high %v9318_v1, %v9317_v4 }
 0x552   : > { %3484 = vmatpush1.bf16.msra.mxu0 %v4103_v30  ;;  %3525 = vmatpush1.bf16.msra.mxu1 %v4135_v31  ;;  %v4107_v30 = vcombine.low %v9316_v0, %v9315_v12  ;;  %v4139_v31 = vcombine.low %v9318_v1, %v9317_v4  ;;  %v9323_v4 = vld [vmem:[#allocation279_spill] sm:$0xff]  ;;  %v9324_v12 = vld [vmem:[#allocation278_spill] sm:$0xff] }
 0x553   : > { %3485 = vmatprep.subr.bf16.mxu0 %v4106_v2  ;;  %3526 = vmatprep.subr.bf16.mxu1 %v4138_v11  ;;  %v4110_v2 = vcombine.high %v9320_v6, %v9319_v5  ;;  %v9321_v11 = vld [vmem:[#allocation309_spill] sm:$0xff]  ;;  %v4112_v21 = vcombine.high %v9324_v12, %v9323_v4 }
 0x554   : > { %v4142_v17 = vcombine.high %v9322_v7, %v9321_v11 }
 0x556   : > { %3486 = vmatpush1.bf16.msra.mxu0 %v4105_v3  ;;  %3527 = vmatpush1.bf16.msra.mxu1 %v4137_v9 }
 0x557   : > { %3487 = vmatprep.subr.bf16.mxu0 %v4108_v16  ;;  %3528 = vmatprep.subr.bf16.mxu1 %v4140_v15  ;;  %v4109_v16 = vcombine.low %v9320_v6, %v9319_v5  ;;  %v4141_v15 = vcombine.low %v9322_v7, %v9321_v11  ;;  %v9330_v5 = vld [vmem:[#allocation312_spill] sm:$0xff] }
 0x558   : > { %v7702_v18 = vpop.f32.mrb[12].mxu0  ;;  %v7704_v20 = vpop.f32.mrb[12].mxu1 }
 0x559   : > { %v7706_v3 = vpop.f32.mrb[13].mxu0  ;;  %v7708_v9 = vpop.f32.mrb[13].mxu1 }
 0x55a   : > { %3488 = vmatpush1.bf16.msra.mxu0 %v4107_v30  ;;  %3529 = vmatpush1.bf16.msra.mxu1 %v4139_v31  ;;  %v1981_v0 = vpop.f32.mrb[14].mxu0  ;;  %v2022_v1 = vpop.f32.mrb[14].mxu1  ;;  %v4111_v30 = vcombine.low %v9324_v12, %v9323_v4  ;;  %v4143_v31 = vcombine.low %v9326_v23, %v9325_v22  ;;  %v9334_v4 = vld [vmem:[#allocation314_spill] sm:$0xff]  ;;  %v9339_v12 = vld [vmem:[#allocation287_spill] sm:$0xff]  ;;  %v9356_v23 = vld [vmem:[#allocation324_spill] sm:$0xff] }
 0x55b   : > { %3489 = vmatprep.subr.bf16.mxu0 %v4110_v2  ;;  %3530 = vmatprep.subr.bf16.mxu1 %v4142_v17  ;;  %v1982_v26 = vpop.f32.mrb[15].mxu0  ;;  %v2023_v27 = vpop.f32.mrb[15].mxu1  ;;  %v9327_v0 = vld [vmem:[#allocation281_spill] sm:$0xff]  ;;  %v9328_v17 = vld [vmem:[#allocation280_spill] sm:$0xff] }
 0x55c   : > { %v4114_v1 = vcombine.high %v9328_v17, %v9327_v0  ;;  %v9329_v2 = vld [vmem:[#allocation313_spill] sm:$0xff]  ;;  %v4113_v27 = vcombine.low %v9328_v17, %v9327_v0  ;;  %v9351_v17 = vld [vmem:[#allocation399_spill] sm:$0xff] }
 0x55d   : > { %v4146_v6 = vcombine.high %v9330_v5, %v9329_v2  ;;  %v4145_v26 = vcombine.low %v9330_v5, %v9329_v2  ;;  %v9335_v0 = vld [vmem:[#allocation285_spill] sm:$0xff]  ;;  %v9336_v2 = vld [vmem:[#allocation284_spill] sm:$0xff]  ;;  %v1937_v22 = vadd.f32 %v7634_v19, %v9351_v17  ;;  %v1980_v19 = vadd.f32 %v7706_v3, %v9357_v10  ;;  %v9361_v3 = vld [vmem:[#allocation358_spill] sm:$0xff] }
 0x55e   : > { %3490 = vmatpush1.bf16.msra.mxu0 %v4109_v16  ;;  %3531 = vmatpush1.bf16.msra.mxu1 %v4141_v15  ;;  %v9331_v16 = vld [vmem:[#allocation283_spill] sm:$0xff]  ;;  %v9332_v15 = vld [vmem:[#allocation282_spill] sm:$0xff]  ;;  %v9338_v5 = vld [vmem:[#allocation316_spill] sm:$0xff]  ;;  %v2021_v17 = vadd.f32 %v7708_v9, %v7062_v47 }
 0x55f   : > { %3491 = vmatprep.subr.bf16.mxu0 %v4112_v21  ;;  %3532 = vmatprep.subr.bf16.mxu1 %v4144_v25  ;;  %v4116_v21 = vcombine.high %v9332_v15, %v9331_v16  ;;  %v9333_v25 = vld [vmem:[#allocation315_spill] sm:$0xff] }
 0x560   : > { %v4148_v7 = vcombine.high %v9334_v4, %v9333_v25  ;;  %v2040_v9 = vmax.f32 %v2021_v17, 0.0 }
 0x562   : > { %3492 = vmatpush1.bf16.msra.mxu0 %v4111_v30  ;;  %3533 = vmatpush1.bf16.msra.mxu1 %v4143_v31  ;;  %v4115_v30 = vcombine.low %v9332_v15, %v9331_v16  ;;  %v4147_v31 = vcombine.low %v9334_v4, %v9333_v25  ;;  %v9340_v4 = vld [vmem:[#allocation286_spill] sm:$0xff]  ;;  %v2056_v17 = vpack.c.bf16 %v2040_v9, %v2040_v9 }
 0x563   : > { %3493 = vmatprep.subr.bf16.mxu0 %v4114_v1  ;;  %3534 = vmatprep.subr.bf16.mxu1 %v4146_v6  ;;  %v4118_v1 = vcombine.high %v9336_v2, %v9335_v0  ;;  %v9337_v6 = vld [vmem:[#allocation317_spill] sm:$0xff]  ;;  %v9342_v15 = vld [vmem:[#allocation318_spill] sm:$0xff] }
 0x564   : > { %v4150_v11 = vcombine.high %v9338_v5, %v9337_v6 }
 0x566   : > { %3494 = vmatpush1.bf16.msra.mxu0 %v4113_v27  ;;  %3535 = vmatpush1.bf16.msra.mxu1 %v4145_v26  ;;  %v4117_v27 = vcombine.low %v9336_v2, %v9335_v0  ;;  %v4149_v26 = vcombine.low %v9338_v5, %v9337_v6  ;;  %v9343_v0 = vld [vmem:[#allocation289_spill] sm:$0xff]  ;;  %v9344_v2 = vld [vmem:[#allocation288_spill] sm:$0xff] }
 0x567   : > { %3495 = vmatprep.subr.bf16.mxu0 %v4116_v21  ;;  %3536 = vmatprep.subr.bf16.mxu1 %v4148_v7  ;;  %v4120_v21 = vcombine.high %v9340_v4, %v9339_v12  ;;  %v9341_v7 = vld [vmem:[#allocation319_spill] sm:$0xff]  ;;  %v9346_v5 = vld [vmem:[#allocation320_spill] sm:$0xff] }
 0x568   : > { %v4152_v16 = vcombine.high %v9342_v15, %v9341_v7 }
 0x56a   : > { %3496 = vmatpush1.bf16.msra.mxu0 %v4115_v30  ;;  %3537 = vmatpush1.bf16.msra.mxu1 %v4147_v31  ;;  %v4119_v30 = vcombine.low %v9340_v4, %v9339_v12  ;;  %v4151_v31 = vcombine.low %v9342_v15, %v9341_v7  ;;  %v9347_v4 = vld [vmem:[#allocation291_spill] sm:$0xff]  ;;  %v9348_v7 = vld [vmem:[#allocation290_spill] sm:$0xff] }
 0x56b   : > { %3497 = vmatprep.subr.bf16.mxu0 %v4118_v1  ;;  %3538 = vmatprep.subr.bf16.mxu1 %v4150_v11  ;;  %v4122_v1 = vcombine.high %v9344_v2, %v9343_v0  ;;  %v9345_v11 = vld [vmem:[#allocation321_spill] sm:$0xff]  ;;  %v9350_v12 = vld [vmem:[#allocation322_spill] sm:$0xff] }
 0x56c   : > { %v4154_v6 = vcombine.high %v9346_v5, %v9345_v11 }
 0x56e   : > { %3498 = vmatpush1.bf16.msra.mxu0 %v4117_v27  ;;  %3539 = vmatpush1.bf16.msra.mxu1 %v4149_v26  ;;  %v4121_v27 = vcombine.low %v9344_v2, %v9343_v0  ;;  %v4153_v26 = vcombine.low %v9346_v5, %v9345_v11  ;;  %v9352_v0 = vld [vmem:[#allocation397_spill] sm:$0xff]  ;;  %v9354_v2 = vld [vmem:[#allocation292_spill] sm:$0xff] }
 0x56f   : > { %3499 = vmatprep.subr.bf16.mxu0 %v4120_v21  ;;  %3540 = vmatprep.subr.bf16.mxu1 %v4152_v16  ;;  %v4124_v21 = vcombine.high %v9348_v7, %v9347_v4  ;;  %v9349_v16 = vld [vmem:[#allocation323_spill] sm:$0xff]  ;;  %v9355_v11 = vld [vmem:[#allocation325_spill] sm:$0xff] }
 0x570   : > { %v4156_v15 = vcombine.high %v9350_v12, %v9349_v16  ;;  %v4158_v25 = vcombine.high %v9356_v23, %v9355_v11 }
 0x572   : > { %3500 = vmatpush1.bf16.msra.mxu0 %v4119_v30  ;;  %3541 = vmatpush1.bf16.msra.mxu1 %v4151_v31  ;;  %v4123_v30 = vcombine.low %v9348_v7, %v9347_v4  ;;  %v4155_v31 = vcombine.low %v9350_v12, %v9349_v16  ;;  %v9360_v7 = vld [vmem:[#allocation359_spill] sm:$0xff]  ;;  %v2038_v12 = vmax.f32 %v1980_v19, 0.0 }
 0x573   : > { %3501 = vmatprep.subr.bf16.mxu0 %v4122_v1  ;;  %3542 = vmatprep.subr.bf16.mxu1 %v4154_v6  ;;  %v1896_v6 = vadd.f32 %v7632_v13, %v9352_v0  ;;  %v9353_v1 = vld [vmem:[#allocation293_spill] sm:$0xff]  ;;  %v4157_v0 = vcombine.low %v9356_v23, %v9355_v11  ;;  %v4192_v10 = vcombine.high %v9361_v3, %v9360_v7  ;;  %v9365_v11 = vld [vmem:[#allocation360_spill] sm:$0xff] }
 0x574   : > { %v4126_v5 = vcombine.high %v9354_v2, %v9353_v1  ;;  %v4125_v13 = vcombine.low %v9354_v2, %v9353_v1  ;;  %v9364_v2 = vld [vmem:[#allocation361_spill] sm:$0xff]  ;;  %v2054_v19 = vpack.c.bf16 %v2038_v12, %v2038_v12 }
 0x575   : > { %v4194_v16 = vcombine.high %v9365_v11, %v9364_v2 }
 0x576   : > { %3502 = vmatpush1.bf16.msra.mxu0 %v4121_v27  ;;  %3543 = vmatpush1.bf16.msra.mxu1 %v4153_v26  ;;  %v2035_v27 = vmax.f32 %v1937_v22, 0.0  ;;  %v9358_v26 = vld [vmem:[#allocation327_spill] sm:$0xff] }
 0x577   : > { %3503 = vmatprep.subr.bf16.mxu0 %v4124_v21  ;;  %3544 = vmatprep.subr.bf16.mxu1 %v4156_v15  ;;  %v2033_v15 = vmax.f32 %v1896_v6, 0.0  ;;  %v9359_v21 = vld [vmem:[#allocation326_spill] sm:$0xff] }
 0x578   : > { %v4160_v4 = vcombine.high %v9359_v21, %v9358_v26  ;;  %v2051_v22 = vpack.c.bf16 %v2035_v27, %v2035_v27 }
 0x579   : > { %v2049_v6 = vpack.c.bf16 %v2033_v15, %v2033_v15  ;;  %v9368_v15 = vld [vmem:[#allocation363_spill] sm:$0xff] }
 0x57a   : > { %3504 = vmatpush1.bf16.msra.mxu0 %v4123_v30  ;;  %3545 = vmatpush1.bf16.msra.mxu1 %v4155_v31  ;;  %v4159_v30 = vcombine.low %v9359_v21, %v9358_v26  ;;  %v4191_v31 = vcombine.low %v9361_v3, %v9360_v7  ;;  %v9369_v3 = vld [vmem:[#allocation362_spill] sm:$0xff]  ;;  %v9381_v7 = vld [vmem:[#allocation368_spill] sm:$0xff]  ;;  %v4807_v21 = vmov 0.0|0.0  }
 0x57b   : > { %3505 = vmatprep.subr.bf16.mxu0 %v4126_v5  ;;  %3546 = vmatprep.subr.bf16.mxu1 %v4158_v25  ;;  %v9362_v5 = vld [vmem:[#allocation329_spill] sm:$0xff]  ;;  %v9363_v25 = vld [vmem:[#allocation328_spill] sm:$0xff]  ;;  %v4196_v12 = vcombine.high %v9369_v3, %v9368_v15 }
 0x57c   : > { %v4162_v1 = vcombine.high %v9363_v25, %v9362_v5  ;;  %v4161_v27 = vcombine.low %v9363_v25, %v9362_v5 }
 0x57e   : > { %3506 = vmatpush1.bf16.msra.mxu0 %v4125_v13  ;;  %3547 = vmatpush1.bf16.msra.mxu1 %v4157_v0  ;;  %v9367_v13 = vld [vmem:[#allocation330_spill] sm:$0xff] }
 0x57f   : > { %3557 = vmatprep.subr.bf16.mxu0 %v4160_v4  ;;  %3598 = vmatprep.subr.bf16.mxu1 %v4192_v10  ;;  %v4193_v4 = vcombine.low %v9365_v11, %v9364_v2  ;;  %v9366_v10 = vld [vmem:[#allocation331_spill] sm:$0xff]  ;;  %v9385_v11 = vld [vmem:[#allocation370_spill] sm:$0xff] }
 0x580   : > { %v4164_v0 = vcombine.high %v9367_v13, %v9366_v10  ;;  %v4163_v9 = vcombine.low %v9367_v13, %v9366_v10 }
 0x581   : > { %3508 = vmatmul.mubr.bf16.vlgmr.msra.gmra.mrb[24].mxu0 %v2049_v6  ;;  %3549 = vmatmul.mubr.bf16.vlgmr.msra.gmra.mrb[24].mxu1 %v2051_v22  ;;  %v4195_v22 = vcombine.low %v9369_v3, %v9368_v15  ;;  %v9373_v6 = vld [vmem:[#allocation364_spill] sm:$0xff]  ;;  %v9377_v3 = vld [vmem:[#allocation366_spill] sm:$0xff] }
 0x582   : > { %3558 = vmatpush1.bf16.msra.mxu0 %v4159_v30  ;;  %3599 = vmatpush1.bf16.msra.mxu1 %v4191_v31  ;;  %v9372_v31 = vld [vmem:[#allocation365_spill] sm:$0xff] }
 0x583   : > { %3559 = vmatprep.subr.bf16.mxu0 %v4162_v1  ;;  %3600 = vmatprep.subr.bf16.mxu1 %v4194_v16  ;;  %v9370_v1 = vld [vmem:[#allocation333_spill] sm:$0xff]  ;;  %v9371_v16 = vld [vmem:[#allocation332_spill] sm:$0xff]  ;;  %v4198_v2 = vcombine.high %v9373_v6, %v9372_v31 }
 0x584   : > { %3589 = vmatprep.mubr.bf16.mxu0 %v2054_v19  ;;  %4217 = vmatprep.mubr.msk.bf16.mxu1 %vm3307_vm7, %v2056_v17  ;;  %v4166_v30 = vcombine.high %v9371_v16, %v9370_v1  ;;  %v4165_v19 = vcombine.low %v9371_v16, %v9370_v1  ;;  %v4197_v17 = vcombine.low %v9373_v6, %v9372_v31  ;;  %v9378_v1 = vld [vmem:[#allocation337_spill] sm:$0xff]  ;;  %v9379_v6 = vld [vmem:[#allocation336_spill] sm:$0xff] }
 0x586   : > { %3560 = vmatpush1.bf16.msra.mxu0 %v4161_v27  ;;  %3601 = vmatpush1.bf16.msra.mxu1 %v4193_v4  ;;  %v9374_v27 = vld [vmem:[#allocation335_spill] sm:$0xff]  ;;  %v9375_v4 = vld [vmem:[#allocation334_spill] sm:$0xff] }
 0x587   : > { %3561 = vmatprep.subr.bf16.mxu0 %v4164_v0  ;;  %3602 = vmatprep.subr.bf16.mxu1 %v4196_v12  ;;  %v4168_v0 = vcombine.high %v9375_v4, %v9374_v27  ;;  %v9376_v12 = vld [vmem:[#allocation367_spill] sm:$0xff] }
 0x588   : > { %v4200_v5 = vcombine.high %v9377_v3, %v9376_v12 }
 0x58a   : > { %3562 = vmatpush1.bf16.msra.mxu0 %v4163_v9  ;;  %3603 = vmatpush1.bf16.msra.mxu1 %v4195_v22  ;;  %v4167_v9 = vcombine.low %v9375_v4, %v9374_v27  ;;  %v4199_v22 = vcombine.low %v9377_v3, %v9376_v12  ;;  %v9382_v4 = vld [vmem:[#allocation339_spill] sm:$0xff]  ;;  %v9383_v3 = vld [vmem:[#allocation338_spill] sm:$0xff] }
 0x58b   : > { %3563 = vmatprep.subr.bf16.mxu0 %v4166_v30  ;;  %3604 = vmatprep.subr.bf16.mxu1 %v4198_v2  ;;  %v4170_v30 = vcombine.high %v9379_v6, %v9378_v1  ;;  %v9380_v2 = vld [vmem:[#allocation369_spill] sm:$0xff] }
 0x58c   : > { %v4202_v10 = vcombine.high %v9381_v7, %v9380_v2 }
 0x58e   : > { %3564 = vmatpush1.bf16.msra.mxu0 %v4165_v19  ;;  %3605 = vmatpush1.bf16.msra.mxu1 %v4197_v17  ;;  %v4169_v19 = vcombine.low %v9379_v6, %v9378_v1  ;;  %v4201_v17 = vcombine.low %v9381_v7, %v9380_v2  ;;  %v9386_v1 = vld [vmem:[#allocation341_spill] sm:$0xff]  ;;  %v9387_v2 = vld [vmem:[#allocation340_spill] sm:$0xff] }
 0x58f   : > { %3565 = vmatprep.subr.bf16.mxu0 %v4168_v0  ;;  %3606 = vmatprep.subr.bf16.mxu1 %v4200_v5  ;;  %v4172_v0 = vcombine.high %v9383_v3, %v9382_v4  ;;  %v9384_v5 = vld [vmem:[#allocation371_spill] sm:$0xff]  ;;  %v9389_v6 = vld [vmem:[#allocation372_spill] sm:$0xff] }
 0x590   : > { %v4204_v12 = vcombine.high %v9385_v11, %v9384_v5 }
 0x592   : > { %3566 = vmatpush1.bf16.msra.mxu0 %v4167_v9  ;;  %3607 = vmatpush1.bf16.msra.mxu1 %v4199_v22  ;;  %v4171_v9 = vcombine.low %v9383_v3, %v9382_v4  ;;  %v4203_v22 = vcombine.low %v9385_v11, %v9384_v5  ;;  %v9390_v3 = vld [vmem:[#allocation343_spill] sm:$0xff]  ;;  %v9391_v4 = vld [vmem:[#allocation342_spill] sm:$0xff] }
 0x593   : > { %3567 = vmatprep.subr.bf16.mxu0 %v4170_v30  ;;  %3608 = vmatprep.subr.bf16.mxu1 %v4202_v10  ;;  %v4174_v30 = vcombine.high %v9387_v2, %v9386_v1  ;;  %v9388_v10 = vld [vmem:[#allocation373_spill] sm:$0xff]  ;;  %v9393_v5 = vld [vmem:[#allocation374_spill] sm:$0xff] }
 0x594   : > { %v4206_v7 = vcombine.high %v9389_v6, %v9388_v10 }
 0x596   : > { %3568 = vmatpush1.bf16.msra.mxu0 %v4169_v19  ;;  %3609 = vmatpush1.bf16.msra.mxu1 %v4201_v17  ;;  %v4173_v19 = vcombine.low %v9387_v2, %v9386_v1  ;;  %v4205_v17 = vcombine.low %v9389_v6, %v9388_v10  ;;  %v9394_v1 = vld [vmem:[#allocation345_spill] sm:$0xff]  ;;  %v9395_v2 = vld [vmem:[#allocation344_spill] sm:$0xff] }
 0x597   : > { %3569 = vmatprep.subr.bf16.mxu0 %v4172_v0  ;;  %3610 = vmatprep.subr.bf16.mxu1 %v4204_v12  ;;  %v4176_v0 = vcombine.high %v9391_v4, %v9390_v3  ;;  %v9392_v12 = vld [vmem:[#allocation375_spill] sm:$0xff]  ;;  %v9397_v6 = vld [vmem:[#allocation376_spill] sm:$0xff] }
 0x598   : > { %v4208_v11 = vcombine.high %v9393_v5, %v9392_v12 }
 0x59a   : > { %3570 = vmatpush1.bf16.msra.mxu0 %v4171_v9  ;;  %3611 = vmatpush1.bf16.msra.mxu1 %v4203_v22  ;;  %v4175_v9 = vcombine.low %v9391_v4, %v9390_v3  ;;  %v4207_v22 = vcombine.low %v9393_v5, %v9392_v12  ;;  %v9398_v3 = vld [vmem:[#allocation347_spill] sm:$0xff]  ;;  %v9399_v4 = vld [vmem:[#allocation346_spill] sm:$0xff] }
 0x59b   : > { %3571 = vmatprep.subr.bf16.mxu0 %v4174_v30  ;;  %3612 = vmatprep.subr.bf16.mxu1 %v4206_v7  ;;  %v4178_v30 = vcombine.high %v9395_v2, %v9394_v1  ;;  %v9396_v7 = vld [vmem:[#allocation377_spill] sm:$0xff]  ;;  %v9401_v5 = vld [vmem:[#allocation378_spill] sm:$0xff] }
 0x59c   : > { %v4210_v10 = vcombine.high %v9397_v6, %v9396_v7 }
 0x59e   : > { %3572 = vmatpush1.bf16.msra.mxu0 %v4173_v19  ;;  %3613 = vmatpush1.bf16.msra.mxu1 %v4205_v17  ;;  %v4177_v19 = vcombine.low %v9395_v2, %v9394_v1  ;;  %v4209_v17 = vcombine.low %v9397_v6, %v9396_v7  ;;  %v9402_v1 = vld [vmem:[#allocation349_spill] sm:$0xff]  ;;  %v9403_v2 = vld [vmem:[#allocation348_spill] sm:$0xff] }
 0x59f   : > { %3573 = vmatprep.subr.bf16.mxu0 %v4176_v0  ;;  %3614 = vmatprep.subr.bf16.mxu1 %v4208_v11  ;;  %v4180_v0 = vcombine.high %v9399_v4, %v9398_v3  ;;  %v9400_v11 = vld [vmem:[#allocation379_spill] sm:$0xff]  ;;  %v9405_v6 = vld [vmem:[#allocation380_spill] sm:$0xff] }
 0x5a0   : > { %v4212_v12 = vcombine.high %v9401_v5, %v9400_v11 }
 0x5a2   : > { %3574 = vmatpush1.bf16.msra.mxu0 %v4175_v9  ;;  %3615 = vmatpush1.bf16.msra.mxu1 %v4207_v22  ;;  %v4179_v9 = vcombine.low %v9399_v4, %v9398_v3  ;;  %v4211_v22 = vcombine.low %v9401_v5, %v9400_v11  ;;  %v2019_v3 = vadd.f32 %v7704_v20, %v9406_v8  ;;  %v9409_v5 = vld [vmem:[#allocation383_spill] sm:$0xff]  ;;  %v9410_v11 = vld [vmem:[#allocation382_spill] sm:$0xff]  ;;  %v9411_v20 = vld [vmem:[#allocation353_spill] sm:$0xff] }
 0x5a3   : > { %3575 = vmatprep.subr.bf16.mxu0 %v4178_v30  ;;  %3616 = vmatprep.subr.bf16.mxu1 %v4210_v10  ;;  %v4182_v30 = vcombine.high %v9403_v2, %v9402_v1  ;;  %v9404_v10 = vld [vmem:[#allocation381_spill] sm:$0xff]  ;;  %v4216_v13 = vcombine.high %v9410_v11, %v9409_v5 }
 0x5a4   : > { %v4214_v7 = vcombine.high %v9405_v6, %v9404_v10 }
 0x5a6   : > { %3576 = vmatpush1.bf16.msra.mxu0 %v4177_v19  ;;  %3617 = vmatpush1.bf16.msra.mxu1 %v4209_v17  ;;  %v4181_v19 = vcombine.low %v9403_v2, %v9402_v1  ;;  %v4213_v17 = vcombine.low %v9405_v6, %v9404_v10  ;;  %v2039_v1 = vmax.f32 %v2019_v3, 0.0 }
 0x5a7   : > { %3577 = vmatprep.subr.bf16.mxu0 %v4180_v0  ;;  %3618 = vmatprep.subr.bf16.mxu1 %v4212_v12  ;;  %v9407_v12 = vld [vmem:[#allocation351_spill] sm:$0xff]  ;;  %v9408_v0 = vld [vmem:[#allocation350_spill] sm:$0xff] }
 0x5a8   : > { %v4184_v4 = vcombine.high %v9408_v0, %v9407_v12  ;;  %v2055_v6 = vpack.c.bf16 %v2039_v1, %v2039_v1 }
 0x5aa   : > { %3578 = vmatpush1.bf16.msra.mxu0 %v4179_v9  ;;  %3619 = vmatpush1.bf16.msra.mxu1 %v4211_v22  ;;  %v4183_v9 = vcombine.low %v9408_v0, %v9407_v12  ;;  %v4215_v22 = vcombine.low %v9410_v11, %v9409_v5 }
 0x5ab   : > { %3579 = vmatprep.subr.bf16.mxu0 %v4182_v30  ;;  %3620 = vmatprep.subr.bf16.mxu1 %v4214_v7  ;;  %v9412_v30 = vld [vmem:[#allocation352_spill] sm:$0xff] }
 0x5ac   : > { %v4186_v7 = vcombine.high %v9412_v30, %v9411_v20  ;;  %v4185_v2 = vcombine.low %v9412_v30, %v9411_v20 }
 0x5ae   : > { %3580 = vmatpush1.bf16.msra.mxu0 %v4181_v19  ;;  %3621 = vmatpush1.bf16.msra.mxu1 %v4213_v17  ;;  %v9413_v19 = vld [vmem:[#allocation355_spill] sm:$0xff]  ;;  %v9414_v17 = vld [vmem:[#allocation354_spill] sm:$0xff] }
 0x5af   : > { %3581 = vmatprep.subr.bf16.mxu0 %v4184_v4  ;;  %3622 = vmatprep.subr.bf16.mxu1 %v4216_v13  ;;  %v4188_v8 = vcombine.high %v9414_v17, %v9413_v19  ;;  %v4187_v3 = vcombine.low %v9414_v17, %v9413_v19  ;;  %v1978_v13 = vadd.f32 %v7702_v18, %v7056_v32  ;;  %v9415_v4 = vld [vmem:[#allocation357_spill] sm:$0xff] }
 0x5b2   : > { %3582 = vmatpush1.bf16.msra.mxu0 %v4183_v9  ;;  %3623 = vmatpush1.bf16.msra.mxu1 %v4215_v22  ;;  %v9416_v9 = vld [vmem:[#allocation356_spill] sm:$0xff] }
 0x5b3   : > { %3583 = vmatprep.subr.bf16.mxu0 %v4186_v7  ;;  %v4190_v22 = vcombine.high %v9416_v9, %v9415_v4  ;;  %v4189_v1 = vcombine.low %v9416_v9, %v9415_v4  ;;  %v2037_v7 = vmax.f32 %v1978_v13, 0.0  ;;  %v9417_v13 = vld [vmem:[#allocation384_spill] sm:$0xff]  ;;  %4472 = vmatprep.subr.bf16.mxu1 %v4807_v21 }
 0x5b5   : > { %3631 = vmatmul.mubr.bf16.vlgmr.msra.gmra.mrb[28].mxu1 %v2055_v6  ;;  %v2053_v0 = vpack.c.bf16 %v2037_v7, %v2037_v7 }
 0x5b6   : > { %3584 = vmatpush1.bf16.msra.mxu0 %v4185_v2 }
 0x5b7   : > { %3585 = vmatprep.subr.bf16.mxu0 %v4188_v8 }
 0x5ba   : > { %3586 = vmatpush1.bf16.msra.mxu0 %v4187_v3 }
 0x5bb   : > { %3587 = vmatprep.subr.bf16.mxu0 %v4190_v22  ;;  %v9418_v22 = vld [vmem:[#allocation385_spill] sm:$0xff] }
 0x5be   : > { %3588 = vmatpush1.bf16.msra.mxu0 %v4189_v1  ;;  %v4473_v1 = vpack.c.bf16 %v9418_v22, %v9417_v13 }
 0x5c0   : > { %4474 = vmatpush3.bf16.msra.mxu1 %v4473_v1 }
 0x5c1   : > { %3590 = vmatmul.mubr.bf16.vlgmr.msra.gmra.mrb[28].mxu0 %v2053_v0  ;;  %4475 = vmatprep.subr.bf16.mxu1 %v4807_v21 }
 0x5d4   : > { %v3345_v6 = vpop.f32.mrb[16].mxu0  ;;  %v3386_v2 = vpop.f32.mrb[16].mxu1 }
 0x5d5   : > { %v3387_v5 = vadd.f32 %v3386_v2, %v3345_v6  ;;  %v3347_v10 = vpop.f32.mrb[17].mxu0  ;;  %v3388_v11 = vpop.f32.mrb[17].mxu1 }
 0x5d6   : > { %v3389_v12 = vadd.f32 %v3388_v11, %v3347_v10  ;;  %v3349_v18 = vpop.f32.mrb[18].mxu0  ;;  %v3390_v8 = vpop.f32.mrb[18].mxu1 }
 0x5d7   : > { %v3350_v15 = vpop.f32.mrb[19].mxu0  ;;  %v3391_v16 = vpop.f32.mrb[19].mxu1 }
 0x5d8   : > { %v9419_v15 = vld [vmem:[#allocation386_spill] sm:$0xff]  ;;  %v9420_v16 = vld [vmem:[#allocation387_spill] sm:$0xff] }
 0x5d9   : > { %v4476_v18 = vpack.c.bf16 %v9420_v16, %v9419_v15 }
 0x5db   : > { %4477 = vmatpush3.bf16.msra.mxu1 %v4476_v18 }
 0x614   : > { %v3427_v17 = vpop.f32.mrb[20].mxu0  ;;  %v3468_v3 = vpop.f32.mrb[20].mxu1 }
 0x615   : > { %v3428_v19 = vadd.f32 %v3427_v17, %v3387_v5  ;;  %v3429_v20 = vpop.f32.mrb[21].mxu0  ;;  %v3470_v4 = vpop.f32.mrb[21].mxu1  ;;  %v8658_v5 = vmov 0.0  }
 0x616   : > { %v3430_v7 = vadd.f32 %v3429_v20, %v3389_v12  ;;  %v3431_v0 = vpop.f32.mrb[22].mxu0  ;;  %v3472_v9 = vpop.f32.mrb[22].mxu1  ;;  %4397 = vmatprep.mubr.msk.f32.mxu1 %vm4808_vm8, %v8658_v5 }
 0x617   : > { %v3469_v6 = vadd.f32 %v3468_v3, %v3428_v19  ;;  %v3432_v2 = vpop.f32.mrb[23].mxu0  ;;  %v3473_v11 = vpop.f32.mrb[23].mxu1 }
 0x618   : > { %v3471_v10 = vadd.f32 %v3470_v4, %v3430_v7 }
 0x654   : > { %v3509_v17 = vpop.f32.mrb[24].mxu0  ;;  %v3550_v12 = vpop.f32.mrb[24].mxu1 }
 0x655   : > { %v3510_v20 = vadd.f32 %v3509_v17, %v3469_v6  ;;  %v3511_v9 = vpop.f32.mrb[25].mxu0  ;;  %v3552_v8 = vpop.f32.mrb[25].mxu1 }
 0x656   : > { %v3512_v13 = vadd.f32 %v3511_v9, %v3471_v10  ;;  %v3513_v19 = vpop.f32.mrb[26].mxu0  ;;  %v3554_v3 = vpop.f32.mrb[26].mxu1  ;;  %v9421_v9 = vld [vmem:[#allocation388_spill] sm:$0xff] }
 0x657   : > { %v3551_v22 = vadd.f32 %v3550_v12, %v3510_v20  ;;  %v3514_v1 = vpop.f32.mrb[27].mxu0  ;;  %v3555_v4 = vpop.f32.mrb[27].mxu1  ;;  %v3730_v20 = vmul.f32 0.2, %v4780_v60 }
 0x658   : > { %v3553_v21 = vadd.f32 %v3552_v8, %v3512_v13 }
 0x659   : > { %3732 = vrot.lane.b32.xlu1 %v3730_v20, %s4811_s21 }
 0x688   : > { %v3632_v7 = vpop.f32.mrb[28].mxu1 }
 0x689   : > { %v3634_v0 = vpop.f32.mrb[29].mxu1 }
 0x68a   : > { %v3636_v2 = vpop.f32.mrb[30].mxu1 }
 0x68b   : > { %v3637_v11 = vpop.f32.mrb[31].mxu1 }
 0x68c   : > { %v3728_v11 = vmul.f32 0.5, %v4780_v60 }
 0x694   : > { %v3591_v15 = vpop.f32.mrb[28].mxu0 }
 0x695   : > { %v3592_v16 = vadd.f32 %v3591_v15, %v3551_v22  ;;  %v3593_v18 = vpop.f32.mrb[29].mxu0 }
 0x696   : > { %v3594_v5 = vadd.f32 %v3593_v18, %v3553_v21  ;;  %v3595_v23 = vpop.f32.mrb[30].mxu0 }
 0x697   : > { %v3633_v25 = vadd.f32 %v3632_v7, %v3592_v16  ;;  %v3596_v6 = vpop.f32.mrb[31].mxu0  ;;  %v3738_v23 = vmul.f32 0.03, %v4780_v60 }
 0x698   : > { %v3635_v17 = vadd.f32 %v3634_v0, %v3594_v5 }
 0x699   : > { %v3718_v10 = vmul.f32 0.001, %v3633_v25  ;;  %v3746_v5 = vadd.f32 0.3, %v3738_v23  ;;  %v3748_v25 = vpop.permute.xlu1 %3747  ;;  %v3739_v2 = vsub.f32 0.3, %v3738_v23 }
 0x69a   : > { %v3639_v19 = vadd.f32 %v9421_v9, %v3635_v17 }
 0x69b   : > { %v7913_v38 = vadd.f32 %v4784_v38, %v3718_v10   ;;  %v3750_v8 = vsub.f32 %v3746_v5, %v3748_v25 }
 0x69c   : > { %v3640_v12 = vmax.f32 %v3639_v19, 0.0 }
 0x69d   : > { %v3751_v13 = vmul.f32 20.0, %v3750_v8 }
 0x69e   : > { %4398 = vmatmul.mubr.msk.f32.vlgmr.msra.gmra.mrb[32].mxu1 %vm3641_vm9, %v3640_v12  ;;  %v4813_v12 = vmov 1  }
 0x69f   : > { %3759 = vperm.xlu1 %4530, %v3751_v13  }
 0x6cb   : > { %v3733_v18 = vpop.permute.xlu1 %3732 }
 0x71e   : > { %v3760_v20 = vpop.permute.xlu1 %3759 }
 0x771   : > { %v3711_v3 = vpop.f32.mrb[32].mxu1 }
 0x772   : > { %v3712_v22 = vadd.f32 %v3711_v3, %v7064_v24  ;;  %v4399_v1 = vpop.f32.mrb[33].mxu1 }
 0x774   : > { %3717 = vst.msk [vmem:[%s3716_s26] sm:$0xff] %vm182_vm2, %v3712_v22  ;;  %v3720_v4 = vmax.f32 %v3712_v22, 0.0 }
 0x776   : > { %v3721_v21 = vmul.f32 50.0, %v3720_v4 }
 0x778   : > { %3723 = vrot.lane.b32.xlu0 %v3721_v21, %s4811_s21 }
 0x77c   : > { %3741 = vrot.lane.b32.xlu0 %v4780_v60, %s4812_s6 }
 0x7ea   : > { %v3724_v7 = vpop.permute.xlu0 %3723 }
 0x7eb   : > { %v3726_v0 = vsub.f32 %v3721_v21, %v3724_v7 }
 0x7ed   : > { %v3727_v15 = vmul.f32 0.03, %v3726_v0 }
 0x7ee   : > { %v3742_v16 = vpop.permute.xlu0 %3741 }
 0x7ef   : > { %v3744_v6 = vsub.f32 %v3739_v2, %v3742_v16  ;;  %v3729_v17 = vsub.f32 %v3727_v15, %v3728_v11 }
 0x7f1   : > { %v3745_v10 = vmul.f32 20.0, %v3744_v6  ;;  %v3735_v9 = vsub.f32 %v3729_v17, %v3733_v18 }
 0x7f3   : > { %v3737_v19 = vmul.f32 20.0, %v3735_v9  ;;  %3754 = vperm.xlu0 %4529, %v3745_v10  }
 0x7f5   : > { %3765 = vperm.xlu1 %4530, %v3737_v19  }
 0x7f7   : > { %4531 = vset.pattern.permute.xlu0 %v4813_v12 }
 0x7f8   : > { %3770 = vperm.xlu0 %4531, %v4780_v60  }
 0x7f9   : > { %4532 = vset.pattern.permute.xlu1 %v4813_v12 }
 0x7fc   : > { %4533 = vset.pattern.permute.xlu0 %v9101_v14  ;;  %v9422_v14 = vmov 0.0  }
 0x872   : > { %v3755_v23 = vpop.permute.xlu0 %3754 }
 0x873   : > { %v3762_v5 = vsel %vm545_vm5, %v3755_v23, %v3760_v20 }
 0x874   : > { %v3766_v25 = vpop.permute.xlu1 %3765 }
 0x875   : > { %v3768_v8 = vsel %vm544_vm3, %v3766_v25, %v3762_v5 }
 0x877   : > { %v3771_v13 = vpop.permute.xlu0 %3770 }
 0x878   : > { %v3773_v3 = vsel %vm543_vm6, %v3771_v13, %v3768_v8 }
 0x879   : > { %v3774_v22 = vmul.f32 0.001, %v3773_v3 }
 0x87b   : > { %v3775_v1 = vadd.f32 %v4780_v60, %v3774_v22 }
 0x87d   : > { %v4220_v4 = vclamps-f32 %v3775_v1, 1.5707964  ;;  %vm3778_vm10 = vcmp.gt.f32.partialorder %v3775_v1, -1.5707964  ;;  %vm3779_vm11 = vcmp.lt.f32.partialorder %v3775_v1, 1.5707964 }
 0x87e   : > { %vm3780_vm12 = vmand %vm3778_vm10, %vm3779_vm11 }
 0x87f   : > { %3795 = vperm.xlu0 %4533, %v4220_v4   ;;  %v3781_v21 = vsel %vm3780_vm12, 1.0, %v9422_v14 }
 0x880   : > { %3783 = vrot.lane.b32.xlu1 %v3781_v21, %s4814_s3 }
 0x8f2   : > { %v3784_v7 = vpop.permute.xlu1 %3783 }
 0x8f3   : > { %v3786_v0 = vmul.f32 %v3784_v7, %v3775_v1 }
 0x8f5   : > { %3789 = vperm.xlu1 %4532, %v3786_v0  }
 0x8fe   : > { %v3796_v60 = vpop.permute.xlu0 %3795 }
 0x971   :  { %1052 = sbr.rel (!%p1050_p10) target bundleno = 1019 (0x3fb), region = 137 }
 0x974   : > { %v3790_v2 = vpop.permute.xlu1 %3789 }
 0x975   : > { %v3792_v11 = vsel %vm544_vm3, %v3790_v2, %v3775_v1 }
 0x976   : > { %v3798_v60 = vsel %vm543_vm6, %v3796_v60, %v3792_v11  }
 0x977   : > { %3801 = vst.msk [vmem:[%s3799_s27] sm:$0xff] %vm3800_vm13, %v3798_v60 }
 0x978   :  { %3810 = vsyncpa [#allocation3], 1 }
 0x979   :  { %3811 = vsyncpa [#allocation5], 1 }
 0x97a   :  { %3812 = vsyncpa [#allocation8], 1 }
 0x97b   :  { %3813 = vsyncpa [#allocation11], 1 }
 0x97c   :  { %3814 = vsyncpa [#allocation14], 1 }
 0x97d   :  { %3815 = vsyncpa [#allocation17], 1 }

</bundles_post_ra>
